<compile_context>
chip_gen: v7x
topology: tpu7x:2x2x1
jax: 0.10.0
libtpu: 0.0.40
codegen_flags: <defaults>
</compile_context>

<pallas_src>
import jax
import jax.numpy as jnp
from jax import lax
from jax.experimental import pallas as pl
from jax.experimental.pallas import tpu as pltpu

MAX_LENGTH = 10
SOS_token = 0
_LANE = 128


def _round_up(n, m=_LANE):
    return ((n + m - 1) // m) * m


def _pad_cols(x, m=_LANE):
    pad = _round_up(x.shape[-1], m) - x.shape[-1]
    if pad:
        x = jnp.pad(x, [(0, 0)] * (x.ndim - 1) + [(0, pad)])
    return x


def _decoder_kernel(enc_ref, uak_ref, h0_ref, w_h4_ref, gi_slab_ref,
                    w_outT_ref, b_slab_ref, packed_ref, hout_ref):
    Bt, S, H = enc_ref.shape
    V = w_outT_ref.shape[1]

    keys = enc_ref[...]                        # (Bt, S, H)
    ua_keys = uak_ref[...]                     # (Bt, S, H)  Ua(keys) + ua_b + wa_b
    w_h4 = w_h4_ref[...]                       # (H, 4H)     [Wa^T | Whh^T]
    gi_slab = gi_slab_ref[...]                 # (V+H, 3H)   [emb@W_ih_e^T + b_ih ; W_ih_c^T]
    w_outT = w_outT_ref[...]                   # (H, V)

    # Lane-aligned Ref slices of the 128-padded bias slab (zero-cost views).
    c1 = _round_up(4 * H)
    c2 = c1 + _round_up(V)
    b_h4 = b_slab_ref[:, 0:4 * H]              # (1, 4H)  [0_H | b_hh]
    b_out = b_slab_ref[:, c1:c1 + V]           # (1, V)
    va_b3 = b_slab_ref[:, c2:c2 + H].reshape(1, 1, H)   # hoisted broadcast operand

    vocab_iota = lax.broadcasted_iota(jnp.int32, (Bt, V), 1)

    h = h0_ref[...]                                            # (Bt, H)
    onehot = (vocab_iota == SOS_token).astype(jnp.float32)     # (Bt, V)

    out_rows = []   # per step: [log-probs (Bt,V), attention weights (Bt,S)]

    # Fully unrolled decode loop (MAX_LENGTH is a static constant).
    for _t in range(MAX_LENGTH):
        # --- Bahdanau attention: Wa(query) and GRU hidden gates share 1 matmul
        hcomb = jnp.dot(h, w_h4, preferred_element_type=jnp.float32) + b_h4
        wa_q = hcomb[:, :H]                                     # (Bt, H)
        gh = hcomb[:, H:]                                       # (Bt, 3H)

        e = jnp.tanh(wa_q[:, None, :] + ua_keys)                # (Bt, S, H)
        score = jnp.sum(e * va_b3, axis=-1)                     # (Bt, S)
        s_max = jnp.max(score, axis=-1, keepdims=True)
        s_exp = jnp.exp(score - s_max)
        # exact divide on purpose: weights are a kernel output (reference parity)
        weights = s_exp / jnp.sum(s_exp, axis=-1, keepdims=True)  # (Bt, S)
        context = jnp.sum(weights[:, :, None] * keys, axis=1)     # (Bt, H)

        # --- GRU cell (PyTorch r,z,n layout); single fused input-gate matmul
        gi = jnp.dot(jnp.concatenate([onehot, context], axis=1), gi_slab,
                     preferred_element_type=jnp.float32)          # (Bt, 3H)
        r = jax.nn.sigmoid(gi[:, 0:H] + gh[:, 0:H])
        z = jax.nn.sigmoid(gi[:, H:2 * H] + gh[:, H:2 * H])
        n = jnp.tanh(gi[:, 2 * H:] + r * gh[:, 2 * H:])
        h = (1.0 - z) * n + z * h                                 # (Bt, H)

        # --- output projection + log-softmax (== final log_softmax over dim=-1)
        logits = jnp.dot(h, w_outT, preferred_element_type=jnp.float32) + b_out
        l_max = jnp.max(logits, axis=-1, keepdims=True)
        lse = jnp.log(jnp.sum(jnp.exp(logits - l_max), axis=-1,
                              keepdims=True)) + l_max
        out_rows.append(logits - lse)
        out_rows.append(weights)

        # Greedy argmax (first maximal index) -> next-step one-hot input.
        # NOTE: a NaN logit would give arg==V (all-zero onehot); assumed
        # impossible upstream.
        masked = jnp.where(logits == l_max, vocab_iota, V)
        arg = jnp.min(masked, axis=-1, keepdims=True)             # (Bt, 1)
        onehot = (vocab_iota == arg).astype(jnp.float32)          # (Bt, V)

    # One lane-dense store for all per-step outputs, plus the final hidden.
    packed_ref[...] = jnp.concatenate(out_rows, axis=-1)          # (Bt, T*(V+S))
    hout_ref[...] = h


def attn_decoder_forward(encoder_outputs, hidden, params, *, batch_grid=1,
                         core_parallel=False):
    """Greedy AttnDecoderRNN forward.

    encoder_outputs: (B, S, H) f32, hidden: (1, B, H) f32.
    Returns (log_probs (B,T,V), hidden (1,B,H), attentions (B,T,S)).

    batch_grid: number of batch tiles along a leading grid axis.  On v7x use
    batch_grid=2 with core_parallel=True so the independent per-example decodes
    land on both TensorCores; keep the defaults on single-TC v5e/v6e.
    """
    B, S, H = encoder_outputs.shape
    V = params['emb'].shape[0]
    assert B % batch_grid == 0
    bt = B // batch_grid
    f32 = jnp.float32
    T = MAX_LENGTH

    enc = encoder_outputs.astype(f32)
    h0 = hidden[0].astype(f32)

    emb = params['emb'].astype(f32)                       # (V, H)
    w_ih = params['w_ih'].astype(f32)                     # (3H, 2H): [embedded | context]

    # Fused GRU input-gate slab: [emb @ W_ih_e^T + b_ih ; W_ih_c^T] -> (V+H, 3H).
    # (b_ih fold is exact: one-hot rows sum to 1.)
    emb_gi = emb @ w_ih[:, :H].T + params['b_ih'].astype(f32).reshape(1, 3 * H)
    gi_slab = jnp.concatenate([emb_gi, w_ih[:, H:].T], axis=0)

    # [Wa^T | Whh^T] -> (H, 4H): attention query proj + GRU hidden gates share a matmul.
    w_h4 = jnp.concatenate([params['wa_w'].astype(f32).T,
                            params['w_hh'].astype(f32).T], axis=1)
    w_outT = params['w_out'].astype(f32).T                # (H, V)

    # Step-invariant attention precompute in plain JAX (overlaps the kernel DMAs):
    # Ua(keys) + (ua_b + wa_b); Va's bias is softmax-invariant and dropped exactly.
    ab = (params['ua_b'] + params['wa_b']).astype(f32).reshape(1, 1, H)
    ua_keys = jnp.einsum('bsh,hk->bsk', enc, params['ua_w'].astype(f32).T) + ab

    # Bias slab; each segment padded to a 128-lane boundary -> aligned Ref slices.
    b_h4 = jnp.concatenate([jnp.zeros((H,), f32),
                            params['b_hh'].astype(f32).reshape(3 * H)]).reshape(1, 4 * H)
    b_out = params['b_out'].astype(f32).reshape(1, V)
    va = params['va_w'].astype(f32).reshape(1, H)
    b_slab = jnp.concatenate([_pad_cols(b_h4), _pad_cols(b_out), _pad_cols(va)],
                             axis=1)

    Tp = T * (V + S)
    dim_sem = (pltpu.CORE_PARALLEL,) if core_parallel else ("parallel",)

    packed, h_out = pl.pallas_call(
        _decoder_kernel,
        out_shape=(jax.ShapeDtypeStruct((B, Tp), f32),
                   jax.ShapeDtypeStruct((B, H), f32)),
        grid=(batch_grid,),
        in_specs=[
            pl.BlockSpec((bt, S, H), lambda i: (i, 0, 0)),     # encoder outputs (keys)
            pl.BlockSpec((bt, S, H), lambda i: (i, 0, 0)),     # ua_keys precompute
            pl.BlockSpec((bt, H), lambda i: (i, 0)),           # initial hidden
            pl.BlockSpec(w_h4.shape, lambda i: (0, 0)),        # [Wa^T | Whh^T]
            pl.BlockSpec(gi_slab.shape, lambda i: (0, 0)),     # fused input-gate slab
            pl.BlockSpec(w_outT.shape, lambda i: (0, 0)),      # W_out^T
            pl.BlockSpec(b_slab.shape, lambda i: (0, 0)),      # padded bias slab
        ],
        out_specs=(
            pl.BlockSpec((bt, Tp), lambda i: (i, 0)),
            pl.BlockSpec((bt, H), lambda i: (i, 0)),
        ),
        compiler_params=pltpu.CompilerParams(dimension_semantics=dim_sem),
    )(enc, ua_keys, h0, w_h4, gi_slab, w_outT, b_slab)

    packed = packed.reshape(B, T, V + S)
    log_probs = packed[:, :, :V]
    attns = packed[:, :, V:]
    # TODO(synk): teacher-forcing path (target=...) not implemented; greedy decode only.
    return log_probs, h_out[None], attns                  # hidden back to (1,B,H)


if __name__ == "__main__":
    B, S, H, V = 2, 8, 32, 16
    key = jax.random.PRNGKey(0)
    ks = jax.random.split(key, 16)

    def u(k, shape, scale):
        return jax.random.uniform(k, shape, jnp.float32, -scale, scale)

    inv_h = 1.0 / (H ** 0.5)
    params = dict(
        emb=jax.random.normal(ks[0], (V, H), jnp.float32),
        wa_w=u(ks[1], (H, H), inv_h), wa_b=u(ks[2], (H,), inv_h),
        ua_w=u(ks[3], (H, H), inv_h), ua_b=u(ks[4], (H,), inv_h),
        va_w=u(ks[5], (1, H), inv_h), va_b=u(ks[6], (1,), inv_h),
        w_ih=u(ks[7], (3 * H, 2 * H), inv_h), b_ih=u(ks[8], (3 * H,), inv_h),
        w_hh=u(ks[9], (3 * H, H), inv_h), b_hh=u(ks[10], (3 * H,), inv_h),
        w_out=u(ks[11], (V, H), inv_h), b_out=u(ks[12], (V,), inv_h),
    )
    encoder_outputs = jax.random.normal(ks[13], (B, S, H), jnp.float32)
    hidden = jax.random.normal(ks[14], (1, B, H), jnp.float32)

    log_probs, h_out, attns = attn_decoder_forward(encoder_outputs, hidden, params)
    jax.block_until_ready((log_probs, h_out, attns))

    assert log_probs.shape == (B, MAX_LENGTH, V)
    assert h_out.shape == (1, B, H)
    assert attns.shape == (B, MAX_LENGTH, S)
    print("KERNEL_OK")
</pallas_src>

<mosaic_0001>
module attributes {stable_mosaic.version = 11 : i64} {
  func.func @_decoder_kernel(%arg0: i32, %arg1: memref<2x8x32xf32, #tpu.memory_space<vmem>>, %arg2: memref<2x8x32xf32, #tpu.memory_space<vmem>>, %arg3: memref<2x32xf32, #tpu.memory_space<vmem>>, %arg4: memref<32x128xf32, #tpu.memory_space<vmem>>, %arg5: memref<48x96xf32, #tpu.memory_space<vmem>>, %arg6: memref<32x16xf32, #tpu.memory_space<vmem>>, %arg7: memref<1x384xf32, #tpu.memory_space<vmem>>, %arg8: memref<2x240xf32, #tpu.memory_space<vmem>>, %arg9: memref<2x32xf32, #tpu.memory_space<vmem>>) attributes {dimension_semantics = [#tpu.dimension_semantics<parallel>], iteration_bounds = array<i64: 1>, scalar_prefetch = 0 : i64, scratch_operands = 0 : i64, tpu.core_type = #tpu.core_type<tc>, window_params = [{transform_indices = @transform_0, window_bounds = array<i64: 2, 8, 32>}, {transform_indices = @transform_1, window_bounds = array<i64: 2, 8, 32>}, {transform_indices = @transform_2, window_bounds = array<i64: 2, 32>}, {pipeline_mode = #tpu.pipeline_mode<synchronous>, transform_indices = @transform_3, window_bounds = array<i64: 32, 128>}, {pipeline_mode = #tpu.pipeline_mode<synchronous>, transform_indices = @transform_4, window_bounds = array<i64: 48, 96>}, {pipeline_mode = #tpu.pipeline_mode<synchronous>, transform_indices = @transform_5, window_bounds = array<i64: 32, 16>}, {pipeline_mode = #tpu.pipeline_mode<synchronous>, transform_indices = @transform_6, window_bounds = array<i64: 1, 384>}, {transform_indices = @transform_7, window_bounds = array<i64: 2, 240>}, {transform_indices = @transform_8, window_bounds = array<i64: 2, 32>}]} {
    %c0 = arith.constant 0 : index
    %c0_0 = arith.constant 0 : index
    %c0_1 = arith.constant 0 : index
    %0 = vector.load %arg1[%c0, %c0_0, %c0_1] : memref<2x8x32xf32, #tpu.memory_space<vmem>>, vector<2x8x32xf32>
    %c0_2 = arith.constant 0 : index
    %c0_3 = arith.constant 0 : index
    %c0_4 = arith.constant 0 : index
    %1 = vector.load %arg2[%c0_2, %c0_3, %c0_4] : memref<2x8x32xf32, #tpu.memory_space<vmem>>, vector<2x8x32xf32>
    %c0_5 = arith.constant 0 : index
    %c0_6 = arith.constant 0 : index
    %2 = vector.load %arg4[%c0_5, %c0_6] : memref<32x128xf32, #tpu.memory_space<vmem>>, vector<32x128xf32>
    %c0_7 = arith.constant 0 : index
    %c0_8 = arith.constant 0 : index
    %3 = vector.load %arg5[%c0_7, %c0_8] : memref<48x96xf32, #tpu.memory_space<vmem>>, vector<48x96xf32>
    %c0_9 = arith.constant 0 : index
    %c0_10 = arith.constant 0 : index
    %4 = vector.load %arg6[%c0_9, %c0_10] : memref<32x16xf32, #tpu.memory_space<vmem>>, vector<32x16xf32>
    %c0_11 = arith.constant 0 : index
    %c0_12 = arith.constant 0 : index
    %5 = vector.load %arg7[%c0_11, %c0_12] : memref<1x384xf32, #tpu.memory_space<vmem>>, vector<1x128xf32>
    %c0_13 = arith.constant 0 : index
    %c128 = arith.constant 128 : index
    %6 = vector.load %arg7[%c0_13, %c128] : memref<1x384xf32, #tpu.memory_space<vmem>>, vector<1x16xf32>
    %c0_14 = arith.constant 0 : index
    %c256 = arith.constant 256 : index
    %7 = vector.load %arg7[%c0_14, %c256] : memref<1x384xf32, #tpu.memory_space<vmem>>, vector<1x32xf32>
    %8 = vector.shape_cast %7 : vector<1x32xf32> to vector<1x1x32xf32>
    %9 = tpu.iota {dimensions = array<i32: 1>} : vector<2x16xi32>
    %c0_15 = arith.constant 0 : index
    %c0_16 = arith.constant 0 : index
    %10 = vector.load %arg3[%c0_15, %c0_16] : memref<2x32xf32, #tpu.memory_space<vmem>>, vector<2x32xf32>
    %c0_i32 = arith.constant 0 : i32
    %11 = vector.broadcast %c0_i32 : i32 to vector<2x16xi32>
    %12 = arith.cmpi eq, %9, %11 : vector<2x16xi32>
    %13 = arith.extui %12 : vector<2x16xi1> to vector<2x16xi32>
    %14 = arith.sitofp %13 : vector<2x16xi32> to vector<2x16xf32>
    %cst = arith.constant dense<0.000000e+00> : vector<2x128xf32>
    %15 = tpu.matmul %10, %2, %cst {dimension_numbers = #tpu.dot_dimension_numbers<[1], [0], [0], [1], [0, 0, 1, 1], [], []>} : vector<2x32xf32>, vector<32x128xf32>, vector<2x128xf32> -> vector<2x128xf32>
    %16 = vector.broadcast %5 : vector<1x128xf32> to vector<2x128xf32>
    %17 = arith.addf %15, %16 : vector<2x128xf32>
    %18 = vector.extract_strided_slice %17 {offsets = [0, 0], sizes = [2, 32], strides = [1, 1]} : vector<2x128xf32> to vector<2x32xf32>
    %19 = vector.extract_strided_slice %17 {offsets = [0, 32], sizes = [2, 96], strides = [1, 1]} : vector<2x128xf32> to vector<2x96xf32>
    %20 = vector.shape_cast %18 : vector<2x32xf32> to vector<2x1x32xf32>
    %21 = vector.broadcast %20 : vector<2x1x32xf32> to vector<2x8x32xf32>
    %22 = arith.addf %21, %1 : vector<2x8x32xf32>
    %23 = math.tanh %22 : vector<2x8x32xf32>
    %24 = vector.broadcast %8 : vector<1x1x32xf32> to vector<2x8x32xf32>
    %25 = arith.mulf %23, %24 : vector<2x8x32xf32>
    %cst_17 = arith.constant dense<0.000000e+00> : vector<2x8xf32>
    %26 = vector.multi_reduction <add>, %25, %cst_17 [2] : vector<2x8x32xf32> to vector<2x8xf32>
    %cst_18 = arith.constant dense<0xFF800000> : vector<2xf32>
    %27 = vector.multi_reduction <maximumf>, %26, %cst_18 [1] : vector<2x8xf32> to vector<2xf32>
    %28 = vector.shape_cast %27 : vector<2xf32> to vector<2x1xf32>
    %29 = vector.broadcast %28 : vector<2x1xf32> to vector<2x8xf32>
    %30 = arith.subf %26, %29 : vector<2x8xf32>
    %31 = math.exp %30 : vector<2x8xf32>
    %cst_19 = arith.constant dense<0.000000e+00> : vector<2xf32>
    %32 = vector.multi_reduction <add>, %31, %cst_19 [1] : vector<2x8xf32> to vector<2xf32>
    %33 = vector.shape_cast %32 : vector<2xf32> to vector<2x1xf32>
    %34 = vector.broadcast %33 : vector<2x1xf32> to vector<2x8xf32>
    %35 = arith.divf %31, %34 : vector<2x8xf32>
    %36 = vector.shape_cast %35 : vector<2x8xf32> to vector<2x8x1xf32>
    %37 = vector.broadcast %36 : vector<2x8x1xf32> to vector<2x8x32xf32>
    %38 = arith.mulf %37, %0 : vector<2x8x32xf32>
    %cst_20 = arith.constant dense<0.000000e+00> : vector<2x32xf32>
    %39 = vector.multi_reduction <add>, %38, %cst_20 [1] : vector<2x8x32xf32> to vector<2x32xf32>
    %40 = tpu.concatenate %14, %39 in 1 : vector<2x16xf32>, vector<2x32xf32> -> vector<2x48xf32>
    %cst_21 = arith.constant dense<0.000000e+00> : vector<2x96xf32>
    %41 = tpu.matmul %40, %3, %cst_21 {dimension_numbers = #tpu.dot_dimension_numbers<[1], [0], [0], [1], [0, 0, 1, 1], [], []>} : vector<2x48xf32>, vector<48x96xf32>, vector<2x96xf32> -> vector<2x96xf32>
    %42 = vector.extract_strided_slice %41 {offsets = [0, 0], sizes = [2, 32], strides = [1, 1]} : vector<2x96xf32> to vector<2x32xf32>
    %43 = vector.extract_strided_slice %19 {offsets = [0, 0], sizes = [2, 32], strides = [1, 1]} : vector<2x96xf32> to vector<2x32xf32>
    %44 = arith.addf %42, %43 : vector<2x32xf32>
    %45 = arith.negf %44 : vector<2x32xf32>
    %46 = math.exp %45 : vector<2x32xf32>
    %cst_22 = arith.constant 1.000000e+00 : f32
    %47 = vector.broadcast %cst_22 : f32 to vector<2x32xf32>
    %48 = arith.addf %47, %46 : vector<2x32xf32>
    %49 = arith.divf %47, %48 : vector<2x32xf32>
    %50 = vector.extract_strided_slice %41 {offsets = [0, 32], sizes = [2, 32], strides = [1, 1]} : vector<2x96xf32> to vector<2x32xf32>
    %51 = vector.extract_strided_slice %19 {offsets = [0, 32], sizes = [2, 32], strides = [1, 1]} : vector<2x96xf32> to vector<2x32xf32>
    %52 = arith.addf %50, %51 : vector<2x32xf32>
    %53 = arith.negf %52 : vector<2x32xf32>
    %54 = math.exp %53 : vector<2x32xf32>
    %cst_23 = arith.constant 1.000000e+00 : f32
    %55 = vector.broadcast %cst_23 : f32 to vector<2x32xf32>
    %56 = arith.addf %55, %54 : vector<2x32xf32>
    %57 = arith.divf %55, %56 : vector<2x32xf32>
    %58 = vector.extract_strided_slice %41 {offsets = [0, 64], sizes = [2, 32], strides = [1, 1]} : vector<2x96xf32> to vector<2x32xf32>
    %59 = vector.extract_strided_slice %19 {offsets = [0, 64], sizes = [2, 32], strides = [1, 1]} : vector<2x96xf32> to vector<2x32xf32>
    %60 = arith.mulf %49, %59 : vector<2x32xf32>
    %61 = arith.addf %58, %60 : vector<2x32xf32>
    %62 = math.tanh %61 : vector<2x32xf32>
    %cst_24 = arith.constant 1.000000e+00 : f32
    %63 = vector.broadcast %cst_24 : f32 to vector<2x32xf32>
    %64 = arith.subf %63, %57 : vector<2x32xf32>
    %65 = arith.mulf %64, %62 : vector<2x32xf32>
    %66 = arith.mulf %57, %10 : vector<2x32xf32>
    %67 = arith.addf %65, %66 : vector<2x32xf32>
    %cst_25 = arith.constant dense<0.000000e+00> : vector<2x16xf32>
    %68 = tpu.matmul %67, %4, %cst_25 {dimension_numbers = #tpu.dot_dimension_numbers<[1], [0], [0], [1], [0, 0, 1, 1], [], []>} : vector<2x32xf32>, vector<32x16xf32>, vector<2x16xf32> -> vector<2x16xf32>
    %69 = vector.broadcast %6 : vector<1x16xf32> to vector<2x16xf32>
    %70 = arith.addf %68, %69 : vector<2x16xf32>
    %cst_26 = arith.constant dense<0xFF800000> : vector<2xf32>
    %71 = vector.multi_reduction <maximumf>, %70, %cst_26 [1] : vector<2x16xf32> to vector<2xf32>
    %72 = vector.shape_cast %71 : vector<2xf32> to vector<2x1xf32>
    %73 = vector.broadcast %72 : vector<2x1xf32> to vector<2x16xf32>
    %74 = arith.subf %70, %73 : vector<2x16xf32>
    %75 = math.exp %74 : vector<2x16xf32>
    %cst_27 = arith.constant dense<0.000000e+00> : vector<2xf32>
    %76 = vector.multi_reduction <add>, %75, %cst_27 [1] : vector<2x16xf32> to vector<2xf32>
    %77 = vector.shape_cast %76 : vector<2xf32> to vector<2x1xf32>
    %78 = math.log %77 : vector<2x1xf32>
    %79 = arith.addf %78, %72 : vector<2x1xf32>
    %80 = vector.broadcast %79 : vector<2x1xf32> to vector<2x16xf32>
    %81 = arith.subf %70, %80 : vector<2x16xf32>
    %82 = vector.broadcast %72 : vector<2x1xf32> to vector<2x16xf32>
    %83 = arith.cmpf oeq, %70, %82 : vector<2x16xf32>
    %c16_i32 = arith.constant 16 : i32
    %84 = vector.broadcast %c16_i32 : i32 to vector<2x16xi32>
    %85 = arith.select %83, %9, %84 : vector<2x16xi1>, vector<2x16xi32>
    %cst_28 = arith.constant dense<2147483647> : vector<2xi32>
    %86 = vector.multi_reduction <minsi>, %85, %cst_28 [1] : vector<2x16xi32> to vector<2xi32>
    %87 = vector.shape_cast %86 : vector<2xi32> to vector<2x1xi32>
    %88 = vector.broadcast %87 : vector<2x1xi32> to vector<2x16xi32>
    %89 = arith.cmpi eq, %9, %88 : vector<2x16xi32>
    %90 = arith.extui %89 : vector<2x16xi1> to vector<2x16xi32>
    %91 = arith.sitofp %90 : vector<2x16xi32> to vector<2x16xf32>
    %cst_29 = arith.constant dense<0.000000e+00> : vector<2x128xf32>
    %92 = tpu.matmul %67, %2, %cst_29 {dimension_numbers = #tpu.dot_dimension_numbers<[1], [0], [0], [1], [0, 0, 1, 1], [], []>} : vector<2x32xf32>, vector<32x128xf32>, vector<2x128xf32> -> vector<2x128xf32>
    %93 = vector.broadcast %5 : vector<1x128xf32> to vector<2x128xf32>
    %94 = arith.addf %92, %93 : vector<2x128xf32>
    %95 = vector.extract_strided_slice %94 {offsets = [0, 0], sizes = [2, 32], strides = [1, 1]} : vector<2x128xf32> to vector<2x32xf32>
    %96 = vector.extract_strided_slice %94 {offsets = [0, 32], sizes = [2, 96], strides = [1, 1]} : vector<2x128xf32> to vector<2x96xf32>
    %97 = vector.shape_cast %95 : vector<2x32xf32> to vector<2x1x32xf32>
    %98 = vector.broadcast %97 : vector<2x1x32xf32> to vector<2x8x32xf32>
    %99 = arith.addf %98, %1 : vector<2x8x32xf32>
    %100 = math.tanh %99 : vector<2x8x32xf32>
    %101 = vector.broadcast %8 : vector<1x1x32xf32> to vector<2x8x32xf32>
    %102 = arith.mulf %100, %101 : vector<2x8x32xf32>
    %cst_30 = arith.constant dense<0.000000e+00> : vector<2x8xf32>
    %103 = vector.multi_reduction <add>, %102, %cst_30 [2] : vector<2x8x32xf32> to vector<2x8xf32>
    %cst_31 = arith.constant dense<0xFF800000> : vector<2xf32>
    %104 = vector.multi_reduction <maximumf>, %103, %cst_31 [1] : vector<2x8xf32> to vector<2xf32>
    %105 = vector.shape_cast %104 : vector<2xf32> to vector<2x1xf32>
    %106 = vector.broadcast %105 : vector<2x1xf32> to vector<2x8xf32>
    %107 = arith.subf %103, %106 : vector<2x8xf32>
    %108 = math.exp %107 : vector<2x8xf32>
    %cst_32 = arith.constant dense<0.000000e+00> : vector<2xf32>
    %109 = vector.multi_reduction <add>, %108, %cst_32 [1] : vector<2x8xf32> to vector<2xf32>
    %110 = vector.shape_cast %109 : vector<2xf32> to vector<2x1xf32>
    %111 = vector.broadcast %110 : vector<2x1xf32> to vector<2x8xf32>
    %112 = arith.divf %108, %111 : vector<2x8xf32>
    %113 = vector.shape_cast %112 : vector<2x8xf32> to vector<2x8x1xf32>
    %114 = vector.broadcast %113 : vector<2x8x1xf32> to vector<2x8x32xf32>
    %115 = arith.mulf %114, %0 : vector<2x8x32xf32>
    %cst_33 = arith.constant dense<0.000000e+00> : vector<2x32xf32>
    %116 = vector.multi_reduction <add>, %115, %cst_33 [1] : vector<2x8x32xf32> to vector<2x32xf32>
    %117 = tpu.concatenate %91, %116 in 1 : vector<2x16xf32>, vector<2x32xf32> -> vector<2x48xf32>
    %cst_34 = arith.constant dense<0.000000e+00> : vector<2x96xf32>
    %118 = tpu.matmul %117, %3, %cst_34 {dimension_numbers = #tpu.dot_dimension_numbers<[1], [0], [0], [1], [0, 0, 1, 1], [], []>} : vector<2x48xf32>, vector<48x96xf32>, vector<2x96xf32> -> vector<2x96xf32>
    %119 = vector.extract_strided_slice %118 {offsets = [0, 0], sizes = [2, 32], strides = [1, 1]} : vector<2x96xf32> to vector<2x32xf32>
    %120 = vector.extract_strided_slice %96 {offsets = [0, 0], sizes = [2, 32], strides = [1, 1]} : vector<2x96xf32> to vector<2x32xf32>
    %121 = arith.addf %119, %120 : vector<2x32xf32>
    %122 = arith.negf %121 : vector<2x32xf32>
    %123 = math.exp %122 : vector<2x32xf32>
    %cst_35 = arith.constant 1.000000e+00 : f32
    %124 = vector.broadcast %cst_35 : f32 to vector<2x32xf32>
    %125 = arith.addf %124, %123 : vector<2x32xf32>
    %126 = arith.divf %124, %125 : vector<2x32xf32>
    %127 = vector.extract_strided_slice %118 {offsets = [0, 32], sizes = [2, 32], strides = [1, 1]} : vector<2x96xf32> to vector<2x32xf32>
    %128 = vector.extract_strided_slice %96 {offsets = [0, 32], sizes = [2, 32], strides = [1, 1]} : vector<2x96xf32> to vector<2x32xf32>
    %129 = arith.addf %127, %128 : vector<2x32xf32>
    %130 = arith.negf %129 : vector<2x32xf32>
    %131 = math.exp %130 : vector<2x32xf32>
    %cst_36 = arith.constant 1.000000e+00 : f32
    %132 = vector.broadcast %cst_36 : f32 to vector<2x32xf32>
    %133 = arith.addf %132, %131 : vector<2x32xf32>
    %134 = arith.divf %132, %133 : vector<2x32xf32>
    %135 = vector.extract_strided_slice %118 {offsets = [0, 64], sizes = [2, 32], strides = [1, 1]} : vector<2x96xf32> to vector<2x32xf32>
    %136 = vector.extract_strided_slice %96 {offsets = [0, 64], sizes = [2, 32], strides = [1, 1]} : vector<2x96xf32> to vector<2x32xf32>
    %137 = arith.mulf %126, %136 : vector<2x32xf32>
    %138 = arith.addf %135, %137 : vector<2x32xf32>
    %139 = math.tanh %138 : vector<2x32xf32>
    %cst_37 = arith.constant 1.000000e+00 : f32
    %140 = vector.broadcast %cst_37 : f32 to vector<2x32xf32>
    %141 = arith.subf %140, %134 : vector<2x32xf32>
    %142 = arith.mulf %141, %139 : vector<2x32xf32>
    %143 = arith.mulf %134, %67 : vector<2x32xf32>
    %144 = arith.addf %142, %143 : vector<2x32xf32>
    %cst_38 = arith.constant dense<0.000000e+00> : vector<2x16xf32>
    %145 = tpu.matmul %144, %4, %cst_38 {dimension_numbers = #tpu.dot_dimension_numbers<[1], [0], [0], [1], [0, 0, 1, 1], [], []>} : vector<2x32xf32>, vector<32x16xf32>, vector<2x16xf32> -> vector<2x16xf32>
    %146 = vector.broadcast %6 : vector<1x16xf32> to vector<2x16xf32>
    %147 = arith.addf %145, %146 : vector<2x16xf32>
    %cst_39 = arith.constant dense<0xFF800000> : vector<2xf32>
    %148 = vector.multi_reduction <maximumf>, %147, %cst_39 [1] : vector<2x16xf32> to vector<2xf32>
    %149 = vector.shape_cast %148 : vector<2xf32> to vector<2x1xf32>
    %150 = vector.broadcast %149 : vector<2x1xf32> to vector<2x16xf32>
    %151 = arith.subf %147, %150 : vector<2x16xf32>
    %152 = math.exp %151 : vector<2x16xf32>
    %cst_40 = arith.constant dense<0.000000e+00> : vector<2xf32>
    %153 = vector.multi_reduction <add>, %152, %cst_40 [1] : vector<2x16xf32> to vector<2xf32>
    %154 = vector.shape_cast %153 : vector<2xf32> to vector<2x1xf32>
    %155 = math.log %154 : vector<2x1xf32>
    %156 = arith.addf %155, %149 : vector<2x1xf32>
    %157 = vector.broadcast %156 : vector<2x1xf32> to vector<2x16xf32>
    %158 = arith.subf %147, %157 : vector<2x16xf32>
    %159 = vector.broadcast %149 : vector<2x1xf32> to vector<2x16xf32>
    %160 = arith.cmpf oeq, %147, %159 : vector<2x16xf32>
    %c16_i32_41 = arith.constant 16 : i32
    %161 = vector.broadcast %c16_i32_41 : i32 to vector<2x16xi32>
    %162 = arith.select %160, %9, %161 : vector<2x16xi1>, vector<2x16xi32>
    %cst_42 = arith.constant dense<2147483647> : vector<2xi32>
    %163 = vector.multi_reduction <minsi>, %162, %cst_42 [1] : vector<2x16xi32> to vector<2xi32>
    %164 = vector.shape_cast %163 : vector<2xi32> to vector<2x1xi32>
    %165 = vector.broadcast %164 : vector<2x1xi32> to vector<2x16xi32>
    %166 = arith.cmpi eq, %9, %165 : vector<2x16xi32>
    %167 = arith.extui %166 : vector<2x16xi1> to vector<2x16xi32>
    %168 = arith.sitofp %167 : vector<2x16xi32> to vector<2x16xf32>
    %cst_43 = arith.constant dense<0.000000e+00> : vector<2x128xf32>
    %169 = tpu.matmul %144, %2, %cst_43 {dimension_numbers = #tpu.dot_dimension_numbers<[1], [0], [0], [1], [0, 0, 1, 1], [], []>} : vector<2x32xf32>, vector<32x128xf32>, vector<2x128xf32> -> vector<2x128xf32>
    %170 = vector.broadcast %5 : vector<1x128xf32> to vector<2x128xf32>
    %171 = arith.addf %169, %170 : vector<2x128xf32>
    %172 = vector.extract_strided_slice %171 {offsets = [0, 0], sizes = [2, 32], strides = [1, 1]} : vector<2x128xf32> to vector<2x32xf32>
    %173 = vector.extract_strided_slice %171 {offsets = [0, 32], sizes = [2, 96], strides = [1, 1]} : vector<2x128xf32> to vector<2x96xf32>
    %174 = vector.shape_cast %172 : vector<2x32xf32> to vector<2x1x32xf32>
    %175 = vector.broadcast %174 : vector<2x1x32xf32> to vector<2x8x32xf32>
    %176 = arith.addf %175, %1 : vector<2x8x32xf32>
    %177 = math.tanh %176 : vector<2x8x32xf32>
    %178 = vector.broadcast %8 : vector<1x1x32xf32> to vector<2x8x32xf32>
    %179 = arith.mulf %177, %178 : vector<2x8x32xf32>
    %cst_44 = arith.constant dense<0.000000e+00> : vector<2x8xf32>
    %180 = vector.multi_reduction <add>, %179, %cst_44 [2] : vector<2x8x32xf32> to vector<2x8xf32>
    %cst_45 = arith.constant dense<0xFF800000> : vector<2xf32>
    %181 = vector.multi_reduction <maximumf>, %180, %cst_45 [1] : vector<2x8xf32> to vector<2xf32>
    %182 = vector.shape_cast %181 : vector<2xf32> to vector<2x1xf32>
    %183 = vector.broadcast %182 : vector<2x1xf32> to vector<2x8xf32>
    %184 = arith.subf %180, %183 : vector<2x8xf32>
    %185 = math.exp %184 : vector<2x8xf32>
    %cst_46 = arith.constant dense<0.000000e+00> : vector<2xf32>
    %186 = vector.multi_reduction <add>, %185, %cst_46 [1] : vector<2x8xf32> to vector<2xf32>
    %187 = vector.shape_cast %186 : vector<2xf32> to vector<2x1xf32>
    %188 = vector.broadcast %187 : vector<2x1xf32> to vector<2x8xf32>
    %189 = arith.divf %185, %188 : vector<2x8xf32>
    %190 = vector.shape_cast %189 : vector<2x8xf32> to vector<2x8x1xf32>
    %191 = vector.broadcast %190 : vector<2x8x1xf32> to vector<2x8x32xf32>
    %192 = arith.mulf %191, %0 : vector<2x8x32xf32>
    %cst_47 = arith.constant dense<0.000000e+00> : vector<2x32xf32>
    %193 = vector.multi_reduction <add>, %192, %cst_47 [1] : vector<2x8x32xf32> to vector<2x32xf32>
    %194 = tpu.concatenate %168, %193 in 1 : vector<2x16xf32>, vector<2x32xf32> -> vector<2x48xf32>
    %cst_48 = arith.constant dense<0.000000e+00> : vector<2x96xf32>
    %195 = tpu.matmul %194, %3, %cst_48 {dimension_numbers = #tpu.dot_dimension_numbers<[1], [0], [0], [1], [0, 0, 1, 1], [], []>} : vector<2x48xf32>, vector<48x96xf32>, vector<2x96xf32> -> vector<2x96xf32>
    %196 = vector.extract_strided_slice %195 {offsets = [0, 0], sizes = [2, 32], strides = [1, 1]} : vector<2x96xf32> to vector<2x32xf32>
    %197 = vector.extract_strided_slice %173 {offsets = [0, 0], sizes = [2, 32], strides = [1, 1]} : vector<2x96xf32> to vector<2x32xf32>
    %198 = arith.addf %196, %197 : vector<2x32xf32>
    %199 = arith.negf %198 : vector<2x32xf32>
    %200 = math.exp %199 : vector<2x32xf32>
    %cst_49 = arith.constant 1.000000e+00 : f32
    %201 = vector.broadcast %cst_49 : f32 to vector<2x32xf32>
    %202 = arith.addf %201, %200 : vector<2x32xf32>
    %203 = arith.divf %201, %202 : vector<2x32xf32>
    %204 = vector.extract_strided_slice %195 {offsets = [0, 32], sizes = [2, 32], strides = [1, 1]} : vector<2x96xf32> to vector<2x32xf32>
    %205 = vector.extract_strided_slice %173 {offsets = [0, 32], sizes = [2, 32], strides = [1, 1]} : vector<2x96xf32> to vector<2x32xf32>
    %206 = arith.addf %204, %205 : vector<2x32xf32>
    %207 = arith.negf %206 : vector<2x32xf32>
    %208 = math.exp %207 : vector<2x32xf32>
    %cst_50 = arith.constant 1.000000e+00 : f32
    %209 = vector.broadcast %cst_50 : f32 to vector<2x32xf32>
    %210 = arith.addf %209, %208 : vector<2x32xf32>
    %211 = arith.divf %209, %210 : vector<2x32xf32>
    %212 = vector.extract_strided_slice %195 {offsets = [0, 64], sizes = [2, 32], strides = [1, 1]} : vector<2x96xf32> to vector<2x32xf32>
    %213 = vector.extract_strided_slice %173 {offsets = [0, 64], sizes = [2, 32], strides = [1, 1]} : vector<2x96xf32> to vector<2x32xf32>
    %214 = arith.mulf %203, %213 : vector<2x32xf32>
    %215 = arith.addf %212, %214 : vector<2x32xf32>
    %216 = math.tanh %215 : vector<2x32xf32>
    %cst_51 = arith.constant 1.000000e+00 : f32
    %217 = vector.broadcast %cst_51 : f32 to vector<2x32xf32>
    %218 = arith.subf %217, %211 : vector<2x32xf32>
    %219 = arith.mulf %218, %216 : vector<2x32xf32>
    %220 = arith.mulf %211, %144 : vector<2x32xf32>
    %221 = arith.addf %219, %220 : vector<2x32xf32>
    %cst_52 = arith.constant dense<0.000000e+00> : vector<2x16xf32>
    %222 = tpu.matmul %221, %4, %cst_52 {dimension_numbers = #tpu.dot_dimension_numbers<[1], [0], [0], [1], [0, 0, 1, 1], [], []>} : vector<2x32xf32>, vector<32x16xf32>, vector<2x16xf32> -> vector<2x16xf32>
    %223 = vector.broadcast %6 : vector<1x16xf32> to vector<2x16xf32>
    %224 = arith.addf %222, %223 : vector<2x16xf32>
    %cst_53 = arith.constant dense<0xFF800000> : vector<2xf32>
    %225 = vector.multi_reduction <maximumf>, %224, %cst_53 [1] : vector<2x16xf32> to vector<2xf32>
    %226 = vector.shape_cast %225 : vector<2xf32> to vector<2x1xf32>
    %227 = vector.broadcast %226 : vector<2x1xf32> to vector<2x16xf32>
    %228 = arith.subf %224, %227 : vector<2x16xf32>
    %229 = math.exp %228 : vector<2x16xf32>
    %cst_54 = arith.constant dense<0.000000e+00> : vector<2xf32>
    %230 = vector.multi_reduction <add>, %229, %cst_54 [1] : vector<2x16xf32> to vector<2xf32>
    %231 = vector.shape_cast %230 : vector<2xf32> to vector<2x1xf32>
    %232 = math.log %231 : vector<2x1xf32>
    %233 = arith.addf %232, %226 : vector<2x1xf32>
    %234 = vector.broadcast %233 : vector<2x1xf32> to vector<2x16xf32>
    %235 = arith.subf %224, %234 : vector<2x16xf32>
    %236 = vector.broadcast %226 : vector<2x1xf32> to vector<2x16xf32>
    %237 = arith.cmpf oeq, %224, %236 : vector<2x16xf32>
    %c16_i32_55 = arith.constant 16 : i32
    %238 = vector.broadcast %c16_i32_55 : i32 to vector<2x16xi32>
    %239 = arith.select %237, %9, %238 : vector<2x16xi1>, vector<2x16xi32>
    %cst_56 = arith.constant dense<2147483647> : vector<2xi32>
    %240 = vector.multi_reduction <minsi>, %239, %cst_56 [1] : vector<2x16xi32> to vector<2xi32>
    %241 = vector.shape_cast %240 : vector<2xi32> to vector<2x1xi32>
    %242 = vector.broadcast %241 : vector<2x1xi32> to vector<2x16xi32>
    %243 = arith.cmpi eq, %9, %242 : vector<2x16xi32>
    %244 = arith.extui %243 : vector<2x16xi1> to vector<2x16xi32>
    %245 = arith.sitofp %244 : vector<2x16xi32> to vector<2x16xf32>
    %cst_57 = arith.constant dense<0.000000e+00> : vector<2x128xf32>
    %246 = tpu.matmul %221, %2, %cst_57 {dimension_numbers = #tpu.dot_dimension_numbers<[1], [0], [0], [1], [0, 0, 1, 1], [], []>} : vector<2x32xf32>, vector<32x128xf32>, vector<2x128xf32> -> vector<2x128xf32>
    %247 = vector.broadcast %5 : vector<1x128xf32> to vector<2x128xf32>
    %248 = arith.addf %246, %247 : vector<2x128xf32>
    %249 = vector.extract_strided_slice %248 {offsets = [0, 0], sizes = [2, 32], strides = [1, 1]} : vector<2x128xf32> to vector<2x32xf32>
    %250 = vector.extract_strided_slice %248 {offsets = [0, 32], sizes = [2, 96], strides = [1, 1]} : vector<2x128xf32> to vector<2x96xf32>
    %251 = vector.shape_cast %249 : vector<2x32xf32> to vector<2x1x32xf32>
    %252 = vector.broadcast %251 : vector<2x1x32xf32> to vector<2x8x32xf32>
    %253 = arith.addf %252, %1 : vector<2x8x32xf32>
    %254 = math.tanh %253 : vector<2x8x32xf32>
    %255 = vector.broadcast %8 : vector<1x1x32xf32> to vector<2x8x32xf32>
    %256 = arith.mulf %254, %255 : vector<2x8x32xf32>
    %cst_58 = arith.constant dense<0.000000e+00> : vector<2x8xf32>
    %257 = vector.multi_reduction <add>, %256, %cst_58 [2] : vector<2x8x32xf32> to vector<2x8xf32>
    %cst_59 = arith.constant dense<0xFF800000> : vector<2xf32>
    %258 = vector.multi_reduction <maximumf>, %257, %cst_59 [1] : vector<2x8xf32> to vector<2xf32>
    %259 = vector.shape_cast %258 : vector<2xf32> to vector<2x1xf32>
    %260 = vector.broadcast %259 : vector<2x1xf32> to vector<2x8xf32>
    %261 = arith.subf %257, %260 : vector<2x8xf32>
    %262 = math.exp %261 : vector<2x8xf32>
    %cst_60 = arith.constant dense<0.000000e+00> : vector<2xf32>
    %263 = vector.multi_reduction <add>, %262, %cst_60 [1] : vector<2x8xf32> to vector<2xf32>
    %264 = vector.shape_cast %263 : vector<2xf32> to vector<2x1xf32>
    %265 = vector.broadcast %264 : vector<2x1xf32> to vector<2x8xf32>
    %266 = arith.divf %262, %265 : vector<2x8xf32>
    %267 = vector.shape_cast %266 : vector<2x8xf32> to vector<2x8x1xf32>
    %268 = vector.broadcast %267 : vector<2x8x1xf32> to vector<2x8x32xf32>
    %269 = arith.mulf %268, %0 : vector<2x8x32xf32>
    %cst_61 = arith.constant dense<0.000000e+00> : vector<2x32xf32>
    %270 = vector.multi_reduction <add>, %269, %cst_61 [1] : vector<2x8x32xf32> to vector<2x32xf32>
    %271 = tpu.concatenate %245, %270 in 1 : vector<2x16xf32>, vector<2x32xf32> -> vector<2x48xf32>
    %cst_62 = arith.constant dense<0.000000e+00> : vector<2x96xf32>
    %272 = tpu.matmul %271, %3, %cst_62 {dimension_numbers = #tpu.dot_dimension_numbers<[1], [0], [0], [1], [0, 0, 1, 1], [], []>} : vector<2x48xf32>, vector<48x96xf32>, vector<2x96xf32> -> vector<2x96xf32>
    %273 = vector.extract_strided_slice %272 {offsets = [0, 0], sizes = [2, 32], strides = [1, 1]} : vector<2x96xf32> to vector<2x32xf32>
    %274 = vector.extract_strided_slice %250 {offsets = [0, 0], sizes = [2, 32], strides = [1, 1]} : vector<2x96xf32> to vector<2x32xf32>
    %275 = arith.addf %273, %274 : vector<2x32xf32>
    %276 = arith.negf %275 : vector<2x32xf32>
    %277 = math.exp %276 : vector<2x32xf32>
    %cst_63 = arith.constant 1.000000e+00 : f32
    %278 = vector.broadcast %cst_63 : f32 to vector<2x32xf32>
    %279 = arith.addf %278, %277 : vector<2x32xf32>
    %280 = arith.divf %278, %279 : vector<2x32xf32>
    %281 = vector.extract_strided_slice %272 {offsets = [0, 32], sizes = [2, 32], strides = [1, 1]} : vector<2x96xf32> to vector<2x32xf32>
    %282 = vector.extract_strided_slice %250 {offsets = [0, 32], sizes = [2, 32], strides = [1, 1]} : vector<2x96xf32> to vector<2x32xf32>
    %283 = arith.addf %281, %282 : vector<2x32xf32>
    %284 = arith.negf %283 : vector<2x32xf32>
    %285 = math.exp %284 : vector<2x32xf32>
    %cst_64 = arith.constant 1.000000e+00 : f32
    %286 = vector.broadcast %cst_64 : f32 to vector<2x32xf32>
    %287 = arith.addf %286, %285 : vector<2x32xf32>
    %288 = arith.divf %286, %287 : vector<2x32xf32>
    %289 = vector.extract_strided_slice %272 {offsets = [0, 64], sizes = [2, 32], strides = [1, 1]} : vector<2x96xf32> to vector<2x32xf32>
    %290 = vector.extract_strided_slice %250 {offsets = [0, 64], sizes = [2, 32], strides = [1, 1]} : vector<2x96xf32> to vector<2x32xf32>
    %291 = arith.mulf %280, %290 : vector<2x32xf32>
    %292 = arith.addf %289, %291 : vector<2x32xf32>
    %293 = math.tanh %292 : vector<2x32xf32>
    %cst_65 = arith.constant 1.000000e+00 : f32
    %294 = vector.broadcast %cst_65 : f32 to vector<2x32xf32>
    %295 = arith.subf %294, %288 : vector<2x32xf32>
    %296 = arith.mulf %295, %293 : vector<2x32xf32>
    %297 = arith.mulf %288, %221 : vector<2x32xf32>
    %298 = arith.addf %296, %297 : vector<2x32xf32>
    %cst_66 = arith.constant dense<0.000000e+00> : vector<2x16xf32>
    %299 = tpu.matmul %298, %4, %cst_66 {dimension_numbers = #tpu.dot_dimension_numbers<[1], [0], [0], [1], [0, 0, 1, 1], [], []>} : vector<2x32xf32>, vector<32x16xf32>, vector<2x16xf32> -> vector<2x16xf32>
    %300 = vector.broadcast %6 : vector<1x16xf32> to vector<2x16xf32>
    %301 = arith.addf %299, %300 : vector<2x16xf32>
    %cst_67 = arith.constant dense<0xFF800000> : vector<2xf32>
    %302 = vector.multi_reduction <maximumf>, %301, %cst_67 [1] : vector<2x16xf32> to vector<2xf32>
    %303 = vector.shape_cast %302 : vector<2xf32> to vector<2x1xf32>
    %304 = vector.broadcast %303 : vector<2x1xf32> to vector<2x16xf32>
    %305 = arith.subf %301, %304 : vector<2x16xf32>
    %306 = math.exp %305 : vector<2x16xf32>
    %cst_68 = arith.constant dense<0.000000e+00> : vector<2xf32>
    %307 = vector.multi_reduction <add>, %306, %cst_68 [1] : vector<2x16xf32> to vector<2xf32>
    %308 = vector.shape_cast %307 : vector<2xf32> to vector<2x1xf32>
    %309 = math.log %308 : vector<2x1xf32>
    %310 = arith.addf %309, %303 : vector<2x1xf32>
    %311 = vector.broadcast %310 : vector<2x1xf32> to vector<2x16xf32>
    %312 = arith.subf %301, %311 : vector<2x16xf32>
    %313 = vector.broadcast %303 : vector<2x1xf32> to vector<2x16xf32>
    %314 = arith.cmpf oeq, %301, %313 : vector<2x16xf32>
    %c16_i32_69 = arith.constant 16 : i32
    %315 = vector.broadcast %c16_i32_69 : i32 to vector<2x16xi32>
    %316 = arith.select %314, %9, %315 : vector<2x16xi1>, vector<2x16xi32>
    %cst_70 = arith.constant dense<2147483647> : vector<2xi32>
    %317 = vector.multi_reduction <minsi>, %316, %cst_70 [1] : vector<2x16xi32> to vector<2xi32>
    %318 = vector.shape_cast %317 : vector<2xi32> to vector<2x1xi32>
    %319 = vector.broadcast %318 : vector<2x1xi32> to vector<2x16xi32>
    %320 = arith.cmpi eq, %9, %319 : vector<2x16xi32>
    %321 = arith.extui %320 : vector<2x16xi1> to vector<2x16xi32>
    %322 = arith.sitofp %321 : vector<2x16xi32> to vector<2x16xf32>
    %cst_71 = arith.constant dense<0.000000e+00> : vector<2x128xf32>
    %323 = tpu.matmul %298, %2, %cst_71 {dimension_numbers = #tpu.dot_dimension_numbers<[1], [0], [0], [1], [0, 0, 1, 1], [], []>} : vector<2x32xf32>, vector<32x128xf32>, vector<2x128xf32> -> vector<2x128xf32>
    %324 = vector.broadcast %5 : vector<1x128xf32> to vector<2x128xf32>
    %325 = arith.addf %323, %324 : vector<2x128xf32>
    %326 = vector.extract_strided_slice %325 {offsets = [0, 0], sizes = [2, 32], strides = [1, 1]} : vector<2x128xf32> to vector<2x32xf32>
    %327 = vector.extract_strided_slice %325 {offsets = [0, 32], sizes = [2, 96], strides = [1, 1]} : vector<2x128xf32> to vector<2x96xf32>
    %328 = vector.shape_cast %326 : vector<2x32xf32> to vector<2x1x32xf32>
    %329 = vector.broadcast %328 : vector<2x1x32xf32> to vector<2x8x32xf32>
    %330 = arith.addf %329, %1 : vector<2x8x32xf32>
    %331 = math.tanh %330 : vector<2x8x32xf32>
    %332 = vector.broadcast %8 : vector<1x1x32xf32> to vector<2x8x32xf32>
    %333 = arith.mulf %331, %332 : vector<2x8x32xf32>
    %cst_72 = arith.constant dense<0.000000e+00> : vector<2x8xf32>
    %334 = vector.multi_reduction <add>, %333, %cst_72 [2] : vector<2x8x32xf32> to vector<2x8xf32>
    %cst_73 = arith.constant dense<0xFF800000> : vector<2xf32>
    %335 = vector.multi_reduction <maximumf>, %334, %cst_73 [1] : vector<2x8xf32> to vector<2xf32>
    %336 = vector.shape_cast %335 : vector<2xf32> to vector<2x1xf32>
    %337 = vector.broadcast %336 : vector<2x1xf32> to vector<2x8xf32>
    %338 = arith.subf %334, %337 : vector<2x8xf32>
    %339 = math.exp %338 : vector<2x8xf32>
    %cst_74 = arith.constant dense<0.000000e+00> : vector<2xf32>
    %340 = vector.multi_reduction <add>, %339, %cst_74 [1] : vector<2x8xf32> to vector<2xf32>
    %341 = vector.shape_cast %340 : vector<2xf32> to vector<2x1xf32>
    %342 = vector.broadcast %341 : vector<2x1xf32> to vector<2x8xf32>
    %343 = arith.divf %339, %342 : vector<2x8xf32>
    %344 = vector.shape_cast %343 : vector<2x8xf32> to vector<2x8x1xf32>
    %345 = vector.broadcast %344 : vector<2x8x1xf32> to vector<2x8x32xf32>
    %346 = arith.mulf %345, %0 : vector<2x8x32xf32>
    %cst_75 = arith.constant dense<0.000000e+00> : vector<2x32xf32>
    %347 = vector.multi_reduction <add>, %346, %cst_75 [1] : vector<2x8x32xf32> to vector<2x32xf32>
    %348 = tpu.concatenate %322, %347 in 1 : vector<2x16xf32>, vector<2x32xf32> -> vector<2x48xf32>
    %cst_76 = arith.constant dense<0.000000e+00> : vector<2x96xf32>
    %349 = tpu.matmul %348, %3, %cst_76 {dimension_numbers = #tpu.dot_dimension_numbers<[1], [0], [0], [1], [0, 0, 1, 1], [], []>} : vector<2x48xf32>, vector<48x96xf32>, vector<2x96xf32> -> vector<2x96xf32>
    %350 = vector.extract_strided_slice %349 {offsets = [0, 0], sizes = [2, 32], strides = [1, 1]} : vector<2x96xf32> to vector<2x32xf32>
    %351 = vector.extract_strided_slice %327 {offsets = [0, 0], sizes = [2, 32], strides = [1, 1]} : vector<2x96xf32> to vector<2x32xf32>
    %352 = arith.addf %350, %351 : vector<2x32xf32>
    %353 = arith.negf %352 : vector<2x32xf32>
    %354 = math.exp %353 : vector<2x32xf32>
    %cst_77 = arith.constant 1.000000e+00 : f32
    %355 = vector.broadcast %cst_77 : f32 to vector<2x32xf32>
    %356 = arith.addf %355, %354 : vector<2x32xf32>
    %357 = arith.divf %355, %356 : vector<2x32xf32>
    %358 = vector.extract_strided_slice %349 {offsets = [0, 32], sizes = [2, 32], strides = [1, 1]} : vector<2x96xf32> to vector<2x32xf32>
    %359 = vector.extract_strided_slice %327 {offsets = [0, 32], sizes = [2, 32], strides = [1, 1]} : vector<2x96xf32> to vector<2x32xf32>
    %360 = arith.addf %358, %359 : vector<2x32xf32>
    %361 = arith.negf %360 : vector<2x32xf32>
    %362 = math.exp %361 : vector<2x32xf32>
    %cst_78 = arith.constant 1.000000e+00 : f32
    %363 = vector.broadcast %cst_78 : f32 to vector<2x32xf32>
    %364 = arith.addf %363, %362 : vector<2x32xf32>
    %365 = arith.divf %363, %364 : vector<2x32xf32>
    %366 = vector.extract_strided_slice %349 {offsets = [0, 64], sizes = [2, 32], strides = [1, 1]} : vector<2x96xf32> to vector<2x32xf32>
    %367 = vector.extract_strided_slice %327 {offsets = [0, 64], sizes = [2, 32], strides = [1, 1]} : vector<2x96xf32> to vector<2x32xf32>
    %368 = arith.mulf %357, %367 : vector<2x32xf32>
    %369 = arith.addf %366, %368 : vector<2x32xf32>
    %370 = math.tanh %369 : vector<2x32xf32>
    %cst_79 = arith.constant 1.000000e+00 : f32
    %371 = vector.broadcast %cst_79 : f32 to vector<2x32xf32>
    %372 = arith.subf %371, %365 : vector<2x32xf32>
    %373 = arith.mulf %372, %370 : vector<2x32xf32>
    %374 = arith.mulf %365, %298 : vector<2x32xf32>
    %375 = arith.addf %373, %374 : vector<2x32xf32>
    %cst_80 = arith.constant dense<0.000000e+00> : vector<2x16xf32>
    %376 = tpu.matmul %375, %4, %cst_80 {dimension_numbers = #tpu.dot_dimension_numbers<[1], [0], [0], [1], [0, 0, 1, 1], [], []>} : vector<2x32xf32>, vector<32x16xf32>, vector<2x16xf32> -> vector<2x16xf32>
    %377 = vector.broadcast %6 : vector<1x16xf32> to vector<2x16xf32>
    %378 = arith.addf %376, %377 : vector<2x16xf32>
    %cst_81 = arith.constant dense<0xFF800000> : vector<2xf32>
    %379 = vector.multi_reduction <maximumf>, %378, %cst_81 [1] : vector<2x16xf32> to vector<2xf32>
    %380 = vector.shape_cast %379 : vector<2xf32> to vector<2x1xf32>
    %381 = vector.broadcast %380 : vector<2x1xf32> to vector<2x16xf32>
    %382 = arith.subf %378, %381 : vector<2x16xf32>
    %383 = math.exp %382 : vector<2x16xf32>
    %cst_82 = arith.constant dense<0.000000e+00> : vector<2xf32>
    %384 = vector.multi_reduction <add>, %383, %cst_82 [1] : vector<2x16xf32> to vector<2xf32>
    %385 = vector.shape_cast %384 : vector<2xf32> to vector<2x1xf32>
    %386 = math.log %385 : vector<2x1xf32>
    %387 = arith.addf %386, %380 : vector<2x1xf32>
    %388 = vector.broadcast %387 : vector<2x1xf32> to vector<2x16xf32>
    %389 = arith.subf %378, %388 : vector<2x16xf32>
    %390 = vector.broadcast %380 : vector<2x1xf32> to vector<2x16xf32>
    %391 = arith.cmpf oeq, %378, %390 : vector<2x16xf32>
    %c16_i32_83 = arith.constant 16 : i32
    %392 = vector.broadcast %c16_i32_83 : i32 to vector<2x16xi32>
    %393 = arith.select %391, %9, %392 : vector<2x16xi1>, vector<2x16xi32>
    %cst_84 = arith.constant dense<2147483647> : vector<2xi32>
    %394 = vector.multi_reduction <minsi>, %393, %cst_84 [1] : vector<2x16xi32> to vector<2xi32>
    %395 = vector.shape_cast %394 : vector<2xi32> to vector<2x1xi32>
    %396 = vector.broadcast %395 : vector<2x1xi32> to vector<2x16xi32>
    %397 = arith.cmpi eq, %9, %396 : vector<2x16xi32>
    %398 = arith.extui %397 : vector<2x16xi1> to vector<2x16xi32>
    %399 = arith.sitofp %398 : vector<2x16xi32> to vector<2x16xf32>
    %cst_85 = arith.constant dense<0.000000e+00> : vector<2x128xf32>
    %400 = tpu.matmul %375, %2, %cst_85 {dimension_numbers = #tpu.dot_dimension_numbers<[1], [0], [0], [1], [0, 0, 1, 1], [], []>} : vector<2x32xf32>, vector<32x128xf32>, vector<2x128xf32> -> vector<2x128xf32>
    %401 = vector.broadcast %5 : vector<1x128xf32> to vector<2x128xf32>
    %402 = arith.addf %400, %401 : vector<2x128xf32>
    %403 = vector.extract_strided_slice %402 {offsets = [0, 0], sizes = [2, 32], strides = [1, 1]} : vector<2x128xf32> to vector<2x32xf32>
    %404 = vector.extract_strided_slice %402 {offsets = [0, 32], sizes = [2, 96], strides = [1, 1]} : vector<2x128xf32> to vector<2x96xf32>
    %405 = vector.shape_cast %403 : vector<2x32xf32> to vector<2x1x32xf32>
    %406 = vector.broadcast %405 : vector<2x1x32xf32> to vector<2x8x32xf32>
    %407 = arith.addf %406, %1 : vector<2x8x32xf32>
    %408 = math.tanh %407 : vector<2x8x32xf32>
    %409 = vector.broadcast %8 : vector<1x1x32xf32> to vector<2x8x32xf32>
    %410 = arith.mulf %408, %409 : vector<2x8x32xf32>
    %cst_86 = arith.constant dense<0.000000e+00> : vector<2x8xf32>
    %411 = vector.multi_reduction <add>, %410, %cst_86 [2] : vector<2x8x32xf32> to vector<2x8xf32>
    %cst_87 = arith.constant dense<0xFF800000> : vector<2xf32>
    %412 = vector.multi_reduction <maximumf>, %411, %cst_87 [1] : vector<2x8xf32> to vector<2xf32>
    %413 = vector.shape_cast %412 : vector<2xf32> to vector<2x1xf32>
    %414 = vector.broadcast %413 : vector<2x1xf32> to vector<2x8xf32>
    %415 = arith.subf %411, %414 : vector<2x8xf32>
    %416 = math.exp %415 : vector<2x8xf32>
    %cst_88 = arith.constant dense<0.000000e+00> : vector<2xf32>
    %417 = vector.multi_reduction <add>, %416, %cst_88 [1] : vector<2x8xf32> to vector<2xf32>
    %418 = vector.shape_cast %417 : vector<2xf32> to vector<2x1xf32>
    %419 = vector.broadcast %418 : vector<2x1xf32> to vector<2x8xf32>
    %420 = arith.divf %416, %419 : vector<2x8xf32>
    %421 = vector.shape_cast %420 : vector<2x8xf32> to vector<2x8x1xf32>
    %422 = vector.broadcast %421 : vector<2x8x1xf32> to vector<2x8x32xf32>
    %423 = arith.mulf %422, %0 : vector<2x8x32xf32>
    %cst_89 = arith.constant dense<0.000000e+00> : vector<2x32xf32>
    %424 = vector.multi_reduction <add>, %423, %cst_89 [1] : vector<2x8x32xf32> to vector<2x32xf32>
    %425 = tpu.concatenate %399, %424 in 1 : vector<2x16xf32>, vector<2x32xf32> -> vector<2x48xf32>
    %cst_90 = arith.constant dense<0.000000e+00> : vector<2x96xf32>
    %426 = tpu.matmul %425, %3, %cst_90 {dimension_numbers = #tpu.dot_dimension_numbers<[1], [0], [0], [1], [0, 0, 1, 1], [], []>} : vector<2x48xf32>, vector<48x96xf32>, vector<2x96xf32> -> vector<2x96xf32>
    %427 = vector.extract_strided_slice %426 {offsets = [0, 0], sizes = [2, 32], strides = [1, 1]} : vector<2x96xf32> to vector<2x32xf32>
    %428 = vector.extract_strided_slice %404 {offsets = [0, 0], sizes = [2, 32], strides = [1, 1]} : vector<2x96xf32> to vector<2x32xf32>
    %429 = arith.addf %427, %428 : vector<2x32xf32>
    %430 = arith.negf %429 : vector<2x32xf32>
    %431 = math.exp %430 : vector<2x32xf32>
    %cst_91 = arith.constant 1.000000e+00 : f32
    %432 = vector.broadcast %cst_91 : f32 to vector<2x32xf32>
    %433 = arith.addf %432, %431 : vector<2x32xf32>
    %434 = arith.divf %432, %433 : vector<2x32xf32>
    %435 = vector.extract_strided_slice %426 {offsets = [0, 32], sizes = [2, 32], strides = [1, 1]} : vector<2x96xf32> to vector<2x32xf32>
    %436 = vector.extract_strided_slice %404 {offsets = [0, 32], sizes = [2, 32], strides = [1, 1]} : vector<2x96xf32> to vector<2x32xf32>
    %437 = arith.addf %435, %436 : vector<2x32xf32>
    %438 = arith.negf %437 : vector<2x32xf32>
    %439 = math.exp %438 : vector<2x32xf32>
    %cst_92 = arith.constant 1.000000e+00 : f32
    %440 = vector.broadcast %cst_92 : f32 to vector<2x32xf32>
    %441 = arith.addf %440, %439 : vector<2x32xf32>
    %442 = arith.divf %440, %441 : vector<2x32xf32>
    %443 = vector.extract_strided_slice %426 {offsets = [0, 64], sizes = [2, 32], strides = [1, 1]} : vector<2x96xf32> to vector<2x32xf32>
    %444 = vector.extract_strided_slice %404 {offsets = [0, 64], sizes = [2, 32], strides = [1, 1]} : vector<2x96xf32> to vector<2x32xf32>
    %445 = arith.mulf %434, %444 : vector<2x32xf32>
    %446 = arith.addf %443, %445 : vector<2x32xf32>
    %447 = math.tanh %446 : vector<2x32xf32>
    %cst_93 = arith.constant 1.000000e+00 : f32
    %448 = vector.broadcast %cst_93 : f32 to vector<2x32xf32>
    %449 = arith.subf %448, %442 : vector<2x32xf32>
    %450 = arith.mulf %449, %447 : vector<2x32xf32>
    %451 = arith.mulf %442, %375 : vector<2x32xf32>
    %452 = arith.addf %450, %451 : vector<2x32xf32>
    %cst_94 = arith.constant dense<0.000000e+00> : vector<2x16xf32>
    %453 = tpu.matmul %452, %4, %cst_94 {dimension_numbers = #tpu.dot_dimension_numbers<[1], [0], [0], [1], [0, 0, 1, 1], [], []>} : vector<2x32xf32>, vector<32x16xf32>, vector<2x16xf32> -> vector<2x16xf32>
    %454 = vector.broadcast %6 : vector<1x16xf32> to vector<2x16xf32>
    %455 = arith.addf %453, %454 : vector<2x16xf32>
    %cst_95 = arith.constant dense<0xFF800000> : vector<2xf32>
    %456 = vector.multi_reduction <maximumf>, %455, %cst_95 [1] : vector<2x16xf32> to vector<2xf32>
    %457 = vector.shape_cast %456 : vector<2xf32> to vector<2x1xf32>
    %458 = vector.broadcast %457 : vector<2x1xf32> to vector<2x16xf32>
    %459 = arith.subf %455, %458 : vector<2x16xf32>
    %460 = math.exp %459 : vector<2x16xf32>
    %cst_96 = arith.constant dense<0.000000e+00> : vector<2xf32>
    %461 = vector.multi_reduction <add>, %460, %cst_96 [1] : vector<2x16xf32> to vector<2xf32>
    %462 = vector.shape_cast %461 : vector<2xf32> to vector<2x1xf32>
    %463 = math.log %462 : vector<2x1xf32>
    %464 = arith.addf %463, %457 : vector<2x1xf32>
    %465 = vector.broadcast %464 : vector<2x1xf32> to vector<2x16xf32>
    %466 = arith.subf %455, %465 : vector<2x16xf32>
    %467 = vector.broadcast %457 : vector<2x1xf32> to vector<2x16xf32>
    %468 = arith.cmpf oeq, %455, %467 : vector<2x16xf32>
    %c16_i32_97 = arith.constant 16 : i32
    %469 = vector.broadcast %c16_i32_97 : i32 to vector<2x16xi32>
    %470 = arith.select %468, %9, %469 : vector<2x16xi1>, vector<2x16xi32>
    %cst_98 = arith.constant dense<2147483647> : vector<2xi32>
    %471 = vector.multi_reduction <minsi>, %470, %cst_98 [1] : vector<2x16xi32> to vector<2xi32>
    %472 = vector.shape_cast %471 : vector<2xi32> to vector<2x1xi32>
    %473 = vector.broadcast %472 : vector<2x1xi32> to vector<2x16xi32>
    %474 = arith.cmpi eq, %9, %473 : vector<2x16xi32>
    %475 = arith.extui %474 : vector<2x16xi1> to vector<2x16xi32>
    %476 = arith.sitofp %475 : vector<2x16xi32> to vector<2x16xf32>
    %cst_99 = arith.constant dense<0.000000e+00> : vector<2x128xf32>
    %477 = tpu.matmul %452, %2, %cst_99 {dimension_numbers = #tpu.dot_dimension_numbers<[1], [0], [0], [1], [0, 0, 1, 1], [], []>} : vector<2x32xf32>, vector<32x128xf32>, vector<2x128xf32> -> vector<2x128xf32>
    %478 = vector.broadcast %5 : vector<1x128xf32> to vector<2x128xf32>
    %479 = arith.addf %477, %478 : vector<2x128xf32>
    %480 = vector.extract_strided_slice %479 {offsets = [0, 0], sizes = [2, 32], strides = [1, 1]} : vector<2x128xf32> to vector<2x32xf32>
    %481 = vector.extract_strided_slice %479 {offsets = [0, 32], sizes = [2, 96], strides = [1, 1]} : vector<2x128xf32> to vector<2x96xf32>
    %482 = vector.shape_cast %480 : vector<2x32xf32> to vector<2x1x32xf32>
    %483 = vector.broadcast %482 : vector<2x1x32xf32> to vector<2x8x32xf32>
    %484 = arith.addf %483, %1 : vector<2x8x32xf32>
    %485 = math.tanh %484 : vector<2x8x32xf32>
    %486 = vector.broadcast %8 : vector<1x1x32xf32> to vector<2x8x32xf32>
    %487 = arith.mulf %485, %486 : vector<2x8x32xf32>
    %cst_100 = arith.constant dense<0.000000e+00> : vector<2x8xf32>
    %488 = vector.multi_reduction <add>, %487, %cst_100 [2] : vector<2x8x32xf32> to vector<2x8xf32>
    %cst_101 = arith.constant dense<0xFF800000> : vector<2xf32>
    %489 = vector.multi_reduction <maximumf>, %488, %cst_101 [1] : vector<2x8xf32> to vector<2xf32>
    %490 = vector.shape_cast %489 : vector<2xf32> to vector<2x1xf32>
    %491 = vector.broadcast %490 : vector<2x1xf32> to vector<2x8xf32>
    %492 = arith.subf %488, %491 : vector<2x8xf32>
    %493 = math.exp %492 : vector<2x8xf32>
    %cst_102 = arith.constant dense<0.000000e+00> : vector<2xf32>
    %494 = vector.multi_reduction <add>, %493, %cst_102 [1] : vector<2x8xf32> to vector<2xf32>
    %495 = vector.shape_cast %494 : vector<2xf32> to vector<2x1xf32>
    %496 = vector.broadcast %495 : vector<2x1xf32> to vector<2x8xf32>
    %497 = arith.divf %493, %496 : vector<2x8xf32>
    %498 = vector.shape_cast %497 : vector<2x8xf32> to vector<2x8x1xf32>
    %499 = vector.broadcast %498 : vector<2x8x1xf32> to vector<2x8x32xf32>
    %500 = arith.mulf %499, %0 : vector<2x8x32xf32>
    %cst_103 = arith.constant dense<0.000000e+00> : vector<2x32xf32>
    %501 = vector.multi_reduction <add>, %500, %cst_103 [1] : vector<2x8x32xf32> to vector<2x32xf32>
    %502 = tpu.concatenate %476, %501 in 1 : vector<2x16xf32>, vector<2x32xf32> -> vector<2x48xf32>
    %cst_104 = arith.constant dense<0.000000e+00> : vector<2x96xf32>
    %503 = tpu.matmul %502, %3, %cst_104 {dimension_numbers = #tpu.dot_dimension_numbers<[1], [0], [0], [1], [0, 0, 1, 1], [], []>} : vector<2x48xf32>, vector<48x96xf32>, vector<2x96xf32> -> vector<2x96xf32>
    %504 = vector.extract_strided_slice %503 {offsets = [0, 0], sizes = [2, 32], strides = [1, 1]} : vector<2x96xf32> to vector<2x32xf32>
    %505 = vector.extract_strided_slice %481 {offsets = [0, 0], sizes = [2, 32], strides = [1, 1]} : vector<2x96xf32> to vector<2x32xf32>
    %506 = arith.addf %504, %505 : vector<2x32xf32>
    %507 = arith.negf %506 : vector<2x32xf32>
    %508 = math.exp %507 : vector<2x32xf32>
    %cst_105 = arith.constant 1.000000e+00 : f32
    %509 = vector.broadcast %cst_105 : f32 to vector<2x32xf32>
    %510 = arith.addf %509, %508 : vector<2x32xf32>
    %511 = arith.divf %509, %510 : vector<2x32xf32>
    %512 = vector.extract_strided_slice %503 {offsets = [0, 32], sizes = [2, 32], strides = [1, 1]} : vector<2x96xf32> to vector<2x32xf32>
    %513 = vector.extract_strided_slice %481 {offsets = [0, 32], sizes = [2, 32], strides = [1, 1]} : vector<2x96xf32> to vector<2x32xf32>
    %514 = arith.addf %512, %513 : vector<2x32xf32>
    %515 = arith.negf %514 : vector<2x32xf32>
    %516 = math.exp %515 : vector<2x32xf32>
    %cst_106 = arith.constant 1.000000e+00 : f32
    %517 = vector.broadcast %cst_106 : f32 to vector<2x32xf32>
    %518 = arith.addf %517, %516 : vector<2x32xf32>
    %519 = arith.divf %517, %518 : vector<2x32xf32>
    %520 = vector.extract_strided_slice %503 {offsets = [0, 64], sizes = [2, 32], strides = [1, 1]} : vector<2x96xf32> to vector<2x32xf32>
    %521 = vector.extract_strided_slice %481 {offsets = [0, 64], sizes = [2, 32], strides = [1, 1]} : vector<2x96xf32> to vector<2x32xf32>
    %522 = arith.mulf %511, %521 : vector<2x32xf32>
    %523 = arith.addf %520, %522 : vector<2x32xf32>
    %524 = math.tanh %523 : vector<2x32xf32>
    %cst_107 = arith.constant 1.000000e+00 : f32
    %525 = vector.broadcast %cst_107 : f32 to vector<2x32xf32>
    %526 = arith.subf %525, %519 : vector<2x32xf32>
    %527 = arith.mulf %526, %524 : vector<2x32xf32>
    %528 = arith.mulf %519, %452 : vector<2x32xf32>
    %529 = arith.addf %527, %528 : vector<2x32xf32>
    %cst_108 = arith.constant dense<0.000000e+00> : vector<2x16xf32>
    %530 = tpu.matmul %529, %4, %cst_108 {dimension_numbers = #tpu.dot_dimension_numbers<[1], [0], [0], [1], [0, 0, 1, 1], [], []>} : vector<2x32xf32>, vector<32x16xf32>, vector<2x16xf32> -> vector<2x16xf32>
    %531 = vector.broadcast %6 : vector<1x16xf32> to vector<2x16xf32>
    %532 = arith.addf %530, %531 : vector<2x16xf32>
    %cst_109 = arith.constant dense<0xFF800000> : vector<2xf32>
    %533 = vector.multi_reduction <maximumf>, %532, %cst_109 [1] : vector<2x16xf32> to vector<2xf32>
    %534 = vector.shape_cast %533 : vector<2xf32> to vector<2x1xf32>
    %535 = vector.broadcast %534 : vector<2x1xf32> to vector<2x16xf32>
    %536 = arith.subf %532, %535 : vector<2x16xf32>
    %537 = math.exp %536 : vector<2x16xf32>
    %cst_110 = arith.constant dense<0.000000e+00> : vector<2xf32>
    %538 = vector.multi_reduction <add>, %537, %cst_110 [1] : vector<2x16xf32> to vector<2xf32>
    %539 = vector.shape_cast %538 : vector<2xf32> to vector<2x1xf32>
    %540 = math.log %539 : vector<2x1xf32>
    %541 = arith.addf %540, %534 : vector<2x1xf32>
    %542 = vector.broadcast %541 : vector<2x1xf32> to vector<2x16xf32>
    %543 = arith.subf %532, %542 : vector<2x16xf32>
    %544 = vector.broadcast %534 : vector<2x1xf32> to vector<2x16xf32>
    %545 = arith.cmpf oeq, %532, %544 : vector<2x16xf32>
    %c16_i32_111 = arith.constant 16 : i32
    %546 = vector.broadcast %c16_i32_111 : i32 to vector<2x16xi32>
    %547 = arith.select %545, %9, %546 : vector<2x16xi1>, vector<2x16xi32>
    %cst_112 = arith.constant dense<2147483647> : vector<2xi32>
    %548 = vector.multi_reduction <minsi>, %547, %cst_112 [1] : vector<2x16xi32> to vector<2xi32>
    %549 = vector.shape_cast %548 : vector<2xi32> to vector<2x1xi32>
    %550 = vector.broadcast %549 : vector<2x1xi32> to vector<2x16xi32>
    %551 = arith.cmpi eq, %9, %550 : vector<2x16xi32>
    %552 = arith.extui %551 : vector<2x16xi1> to vector<2x16xi32>
    %553 = arith.sitofp %552 : vector<2x16xi32> to vector<2x16xf32>
    %cst_113 = arith.constant dense<0.000000e+00> : vector<2x128xf32>
    %554 = tpu.matmul %529, %2, %cst_113 {dimension_numbers = #tpu.dot_dimension_numbers<[1], [0], [0], [1], [0, 0, 1, 1], [], []>} : vector<2x32xf32>, vector<32x128xf32>, vector<2x128xf32> -> vector<2x128xf32>
    %555 = vector.broadcast %5 : vector<1x128xf32> to vector<2x128xf32>
    %556 = arith.addf %554, %555 : vector<2x128xf32>
    %557 = vector.extract_strided_slice %556 {offsets = [0, 0], sizes = [2, 32], strides = [1, 1]} : vector<2x128xf32> to vector<2x32xf32>
    %558 = vector.extract_strided_slice %556 {offsets = [0, 32], sizes = [2, 96], strides = [1, 1]} : vector<2x128xf32> to vector<2x96xf32>
    %559 = vector.shape_cast %557 : vector<2x32xf32> to vector<2x1x32xf32>
    %560 = vector.broadcast %559 : vector<2x1x32xf32> to vector<2x8x32xf32>
    %561 = arith.addf %560, %1 : vector<2x8x32xf32>
    %562 = math.tanh %561 : vector<2x8x32xf32>
    %563 = vector.broadcast %8 : vector<1x1x32xf32> to vector<2x8x32xf32>
    %564 = arith.mulf %562, %563 : vector<2x8x32xf32>
    %cst_114 = arith.constant dense<0.000000e+00> : vector<2x8xf32>
    %565 = vector.multi_reduction <add>, %564, %cst_114 [2] : vector<2x8x32xf32> to vector<2x8xf32>
    %cst_115 = arith.constant dense<0xFF800000> : vector<2xf32>
    %566 = vector.multi_reduction <maximumf>, %565, %cst_115 [1] : vector<2x8xf32> to vector<2xf32>
    %567 = vector.shape_cast %566 : vector<2xf32> to vector<2x1xf32>
    %568 = vector.broadcast %567 : vector<2x1xf32> to vector<2x8xf32>
    %569 = arith.subf %565, %568 : vector<2x8xf32>
    %570 = math.exp %569 : vector<2x8xf32>
    %cst_116 = arith.constant dense<0.000000e+00> : vector<2xf32>
    %571 = vector.multi_reduction <add>, %570, %cst_116 [1] : vector<2x8xf32> to vector<2xf32>
    %572 = vector.shape_cast %571 : vector<2xf32> to vector<2x1xf32>
    %573 = vector.broadcast %572 : vector<2x1xf32> to vector<2x8xf32>
    %574 = arith.divf %570, %573 : vector<2x8xf32>
    %575 = vector.shape_cast %574 : vector<2x8xf32> to vector<2x8x1xf32>
    %576 = vector.broadcast %575 : vector<2x8x1xf32> to vector<2x8x32xf32>
    %577 = arith.mulf %576, %0 : vector<2x8x32xf32>
    %cst_117 = arith.constant dense<0.000000e+00> : vector<2x32xf32>
    %578 = vector.multi_reduction <add>, %577, %cst_117 [1] : vector<2x8x32xf32> to vector<2x32xf32>
    %579 = tpu.concatenate %553, %578 in 1 : vector<2x16xf32>, vector<2x32xf32> -> vector<2x48xf32>
    %cst_118 = arith.constant dense<0.000000e+00> : vector<2x96xf32>
    %580 = tpu.matmul %579, %3, %cst_118 {dimension_numbers = #tpu.dot_dimension_numbers<[1], [0], [0], [1], [0, 0, 1, 1], [], []>} : vector<2x48xf32>, vector<48x96xf32>, vector<2x96xf32> -> vector<2x96xf32>
    %581 = vector.extract_strided_slice %580 {offsets = [0, 0], sizes = [2, 32], strides = [1, 1]} : vector<2x96xf32> to vector<2x32xf32>
    %582 = vector.extract_strided_slice %558 {offsets = [0, 0], sizes = [2, 32], strides = [1, 1]} : vector<2x96xf32> to vector<2x32xf32>
    %583 = arith.addf %581, %582 : vector<2x32xf32>
    %584 = arith.negf %583 : vector<2x32xf32>
    %585 = math.exp %584 : vector<2x32xf32>
    %cst_119 = arith.constant 1.000000e+00 : f32
    %586 = vector.broadcast %cst_119 : f32 to vector<2x32xf32>
    %587 = arith.addf %586, %585 : vector<2x32xf32>
    %588 = arith.divf %586, %587 : vector<2x32xf32>
    %589 = vector.extract_strided_slice %580 {offsets = [0, 32], sizes = [2, 32], strides = [1, 1]} : vector<2x96xf32> to vector<2x32xf32>
    %590 = vector.extract_strided_slice %558 {offsets = [0, 32], sizes = [2, 32], strides = [1, 1]} : vector<2x96xf32> to vector<2x32xf32>
    %591 = arith.addf %589, %590 : vector<2x32xf32>
    %592 = arith.negf %591 : vector<2x32xf32>
    %593 = math.exp %592 : vector<2x32xf32>
    %cst_120 = arith.constant 1.000000e+00 : f32
    %594 = vector.broadcast %cst_120 : f32 to vector<2x32xf32>
    %595 = arith.addf %594, %593 : vector<2x32xf32>
    %596 = arith.divf %594, %595 : vector<2x32xf32>
    %597 = vector.extract_strided_slice %580 {offsets = [0, 64], sizes = [2, 32], strides = [1, 1]} : vector<2x96xf32> to vector<2x32xf32>
    %598 = vector.extract_strided_slice %558 {offsets = [0, 64], sizes = [2, 32], strides = [1, 1]} : vector<2x96xf32> to vector<2x32xf32>
    %599 = arith.mulf %588, %598 : vector<2x32xf32>
    %600 = arith.addf %597, %599 : vector<2x32xf32>
    %601 = math.tanh %600 : vector<2x32xf32>
    %cst_121 = arith.constant 1.000000e+00 : f32
    %602 = vector.broadcast %cst_121 : f32 to vector<2x32xf32>
    %603 = arith.subf %602, %596 : vector<2x32xf32>
    %604 = arith.mulf %603, %601 : vector<2x32xf32>
    %605 = arith.mulf %596, %529 : vector<2x32xf32>
    %606 = arith.addf %604, %605 : vector<2x32xf32>
    %cst_122 = arith.constant dense<0.000000e+00> : vector<2x16xf32>
    %607 = tpu.matmul %606, %4, %cst_122 {dimension_numbers = #tpu.dot_dimension_numbers<[1], [0], [0], [1], [0, 0, 1, 1], [], []>} : vector<2x32xf32>, vector<32x16xf32>, vector<2x16xf32> -> vector<2x16xf32>
    %608 = vector.broadcast %6 : vector<1x16xf32> to vector<2x16xf32>
    %609 = arith.addf %607, %608 : vector<2x16xf32>
    %cst_123 = arith.constant dense<0xFF800000> : vector<2xf32>
    %610 = vector.multi_reduction <maximumf>, %609, %cst_123 [1] : vector<2x16xf32> to vector<2xf32>
    %611 = vector.shape_cast %610 : vector<2xf32> to vector<2x1xf32>
    %612 = vector.broadcast %611 : vector<2x1xf32> to vector<2x16xf32>
    %613 = arith.subf %609, %612 : vector<2x16xf32>
    %614 = math.exp %613 : vector<2x16xf32>
    %cst_124 = arith.constant dense<0.000000e+00> : vector<2xf32>
    %615 = vector.multi_reduction <add>, %614, %cst_124 [1] : vector<2x16xf32> to vector<2xf32>
    %616 = vector.shape_cast %615 : vector<2xf32> to vector<2x1xf32>
    %617 = math.log %616 : vector<2x1xf32>
    %618 = arith.addf %617, %611 : vector<2x1xf32>
    %619 = vector.broadcast %618 : vector<2x1xf32> to vector<2x16xf32>
    %620 = arith.subf %609, %619 : vector<2x16xf32>
    %621 = vector.broadcast %611 : vector<2x1xf32> to vector<2x16xf32>
    %622 = arith.cmpf oeq, %609, %621 : vector<2x16xf32>
    %c16_i32_125 = arith.constant 16 : i32
    %623 = vector.broadcast %c16_i32_125 : i32 to vector<2x16xi32>
    %624 = arith.select %622, %9, %623 : vector<2x16xi1>, vector<2x16xi32>
    %cst_126 = arith.constant dense<2147483647> : vector<2xi32>
    %625 = vector.multi_reduction <minsi>, %624, %cst_126 [1] : vector<2x16xi32> to vector<2xi32>
    %626 = vector.shape_cast %625 : vector<2xi32> to vector<2x1xi32>
    %627 = vector.broadcast %626 : vector<2x1xi32> to vector<2x16xi32>
    %628 = arith.cmpi eq, %9, %627 : vector<2x16xi32>
    %629 = arith.extui %628 : vector<2x16xi1> to vector<2x16xi32>
    %630 = arith.sitofp %629 : vector<2x16xi32> to vector<2x16xf32>
    %cst_127 = arith.constant dense<0.000000e+00> : vector<2x128xf32>
    %631 = tpu.matmul %606, %2, %cst_127 {dimension_numbers = #tpu.dot_dimension_numbers<[1], [0], [0], [1], [0, 0, 1, 1], [], []>} : vector<2x32xf32>, vector<32x128xf32>, vector<2x128xf32> -> vector<2x128xf32>
    %632 = vector.broadcast %5 : vector<1x128xf32> to vector<2x128xf32>
    %633 = arith.addf %631, %632 : vector<2x128xf32>
    %634 = vector.extract_strided_slice %633 {offsets = [0, 0], sizes = [2, 32], strides = [1, 1]} : vector<2x128xf32> to vector<2x32xf32>
    %635 = vector.extract_strided_slice %633 {offsets = [0, 32], sizes = [2, 96], strides = [1, 1]} : vector<2x128xf32> to vector<2x96xf32>
    %636 = vector.shape_cast %634 : vector<2x32xf32> to vector<2x1x32xf32>
    %637 = vector.broadcast %636 : vector<2x1x32xf32> to vector<2x8x32xf32>
    %638 = arith.addf %637, %1 : vector<2x8x32xf32>
    %639 = math.tanh %638 : vector<2x8x32xf32>
    %640 = vector.broadcast %8 : vector<1x1x32xf32> to vector<2x8x32xf32>
    %641 = arith.mulf %639, %640 : vector<2x8x32xf32>
    %cst_128 = arith.constant dense<0.000000e+00> : vector<2x8xf32>
    %642 = vector.multi_reduction <add>, %641, %cst_128 [2] : vector<2x8x32xf32> to vector<2x8xf32>
    %cst_129 = arith.constant dense<0xFF800000> : vector<2xf32>
    %643 = vector.multi_reduction <maximumf>, %642, %cst_129 [1] : vector<2x8xf32> to vector<2xf32>
    %644 = vector.shape_cast %643 : vector<2xf32> to vector<2x1xf32>
    %645 = vector.broadcast %644 : vector<2x1xf32> to vector<2x8xf32>
    %646 = arith.subf %642, %645 : vector<2x8xf32>
    %647 = math.exp %646 : vector<2x8xf32>
    %cst_130 = arith.constant dense<0.000000e+00> : vector<2xf32>
    %648 = vector.multi_reduction <add>, %647, %cst_130 [1] : vector<2x8xf32> to vector<2xf32>
    %649 = vector.shape_cast %648 : vector<2xf32> to vector<2x1xf32>
    %650 = vector.broadcast %649 : vector<2x1xf32> to vector<2x8xf32>
    %651 = arith.divf %647, %650 : vector<2x8xf32>
    %652 = vector.shape_cast %651 : vector<2x8xf32> to vector<2x8x1xf32>
    %653 = vector.broadcast %652 : vector<2x8x1xf32> to vector<2x8x32xf32>
    %654 = arith.mulf %653, %0 : vector<2x8x32xf32>
    %cst_131 = arith.constant dense<0.000000e+00> : vector<2x32xf32>
    %655 = vector.multi_reduction <add>, %654, %cst_131 [1] : vector<2x8x32xf32> to vector<2x32xf32>
    %656 = tpu.concatenate %630, %655 in 1 : vector<2x16xf32>, vector<2x32xf32> -> vector<2x48xf32>
    %cst_132 = arith.constant dense<0.000000e+00> : vector<2x96xf32>
    %657 = tpu.matmul %656, %3, %cst_132 {dimension_numbers = #tpu.dot_dimension_numbers<[1], [0], [0], [1], [0, 0, 1, 1], [], []>} : vector<2x48xf32>, vector<48x96xf32>, vector<2x96xf32> -> vector<2x96xf32>
    %658 = vector.extract_strided_slice %657 {offsets = [0, 0], sizes = [2, 32], strides = [1, 1]} : vector<2x96xf32> to vector<2x32xf32>
    %659 = vector.extract_strided_slice %635 {offsets = [0, 0], sizes = [2, 32], strides = [1, 1]} : vector<2x96xf32> to vector<2x32xf32>
    %660 = arith.addf %658, %659 : vector<2x32xf32>
    %661 = arith.negf %660 : vector<2x32xf32>
    %662 = math.exp %661 : vector<2x32xf32>
    %cst_133 = arith.constant 1.000000e+00 : f32
    %663 = vector.broadcast %cst_133 : f32 to vector<2x32xf32>
    %664 = arith.addf %663, %662 : vector<2x32xf32>
    %665 = arith.divf %663, %664 : vector<2x32xf32>
    %666 = vector.extract_strided_slice %657 {offsets = [0, 32], sizes = [2, 32], strides = [1, 1]} : vector<2x96xf32> to vector<2x32xf32>
    %667 = vector.extract_strided_slice %635 {offsets = [0, 32], sizes = [2, 32], strides = [1, 1]} : vector<2x96xf32> to vector<2x32xf32>
    %668 = arith.addf %666, %667 : vector<2x32xf32>
    %669 = arith.negf %668 : vector<2x32xf32>
    %670 = math.exp %669 : vector<2x32xf32>
    %cst_134 = arith.constant 1.000000e+00 : f32
    %671 = vector.broadcast %cst_134 : f32 to vector<2x32xf32>
    %672 = arith.addf %671, %670 : vector<2x32xf32>
    %673 = arith.divf %671, %672 : vector<2x32xf32>
    %674 = vector.extract_strided_slice %657 {offsets = [0, 64], sizes = [2, 32], strides = [1, 1]} : vector<2x96xf32> to vector<2x32xf32>
    %675 = vector.extract_strided_slice %635 {offsets = [0, 64], sizes = [2, 32], strides = [1, 1]} : vector<2x96xf32> to vector<2x32xf32>
    %676 = arith.mulf %665, %675 : vector<2x32xf32>
    %677 = arith.addf %674, %676 : vector<2x32xf32>
    %678 = math.tanh %677 : vector<2x32xf32>
    %cst_135 = arith.constant 1.000000e+00 : f32
    %679 = vector.broadcast %cst_135 : f32 to vector<2x32xf32>
    %680 = arith.subf %679, %673 : vector<2x32xf32>
    %681 = arith.mulf %680, %678 : vector<2x32xf32>
    %682 = arith.mulf %673, %606 : vector<2x32xf32>
    %683 = arith.addf %681, %682 : vector<2x32xf32>
    %cst_136 = arith.constant dense<0.000000e+00> : vector<2x16xf32>
    %684 = tpu.matmul %683, %4, %cst_136 {dimension_numbers = #tpu.dot_dimension_numbers<[1], [0], [0], [1], [0, 0, 1, 1], [], []>} : vector<2x32xf32>, vector<32x16xf32>, vector<2x16xf32> -> vector<2x16xf32>
    %685 = vector.broadcast %6 : vector<1x16xf32> to vector<2x16xf32>
    %686 = arith.addf %684, %685 : vector<2x16xf32>
    %cst_137 = arith.constant dense<0xFF800000> : vector<2xf32>
    %687 = vector.multi_reduction <maximumf>, %686, %cst_137 [1] : vector<2x16xf32> to vector<2xf32>
    %688 = vector.shape_cast %687 : vector<2xf32> to vector<2x1xf32>
    %689 = vector.broadcast %688 : vector<2x1xf32> to vector<2x16xf32>
    %690 = arith.subf %686, %689 : vector<2x16xf32>
    %691 = math.exp %690 : vector<2x16xf32>
    %cst_138 = arith.constant dense<0.000000e+00> : vector<2xf32>
    %692 = vector.multi_reduction <add>, %691, %cst_138 [1] : vector<2x16xf32> to vector<2xf32>
    %693 = vector.shape_cast %692 : vector<2xf32> to vector<2x1xf32>
    %694 = math.log %693 : vector<2x1xf32>
    %695 = arith.addf %694, %688 : vector<2x1xf32>
    %696 = vector.broadcast %695 : vector<2x1xf32> to vector<2x16xf32>
    %697 = arith.subf %686, %696 : vector<2x16xf32>
    %698 = vector.broadcast %688 : vector<2x1xf32> to vector<2x16xf32>
    %699 = arith.cmpf oeq, %686, %698 : vector<2x16xf32>
    %c16_i32_139 = arith.constant 16 : i32
    %700 = vector.broadcast %c16_i32_139 : i32 to vector<2x16xi32>
    %701 = arith.select %699, %9, %700 : vector<2x16xi1>, vector<2x16xi32>
    %cst_140 = arith.constant dense<2147483647> : vector<2xi32>
    %702 = vector.multi_reduction <minsi>, %701, %cst_140 [1] : vector<2x16xi32> to vector<2xi32>
    %703 = vector.shape_cast %702 : vector<2xi32> to vector<2x1xi32>
    %704 = vector.broadcast %703 : vector<2x1xi32> to vector<2x16xi32>
    %705 = arith.cmpi eq, %9, %704 : vector<2x16xi32>
    %706 = arith.extui %705 : vector<2x16xi1> to vector<2x16xi32>
    %707 = arith.sitofp %706 : vector<2x16xi32> to vector<2x16xf32>
    %cst_141 = arith.constant dense<0.000000e+00> : vector<2x128xf32>
    %708 = tpu.matmul %683, %2, %cst_141 {dimension_numbers = #tpu.dot_dimension_numbers<[1], [0], [0], [1], [0, 0, 1, 1], [], []>} : vector<2x32xf32>, vector<32x128xf32>, vector<2x128xf32> -> vector<2x128xf32>
    %709 = vector.broadcast %5 : vector<1x128xf32> to vector<2x128xf32>
    %710 = arith.addf %708, %709 : vector<2x128xf32>
    %711 = vector.extract_strided_slice %710 {offsets = [0, 0], sizes = [2, 32], strides = [1, 1]} : vector<2x128xf32> to vector<2x32xf32>
    %712 = vector.extract_strided_slice %710 {offsets = [0, 32], sizes = [2, 96], strides = [1, 1]} : vector<2x128xf32> to vector<2x96xf32>
    %713 = vector.shape_cast %711 : vector<2x32xf32> to vector<2x1x32xf32>
    %714 = vector.broadcast %713 : vector<2x1x32xf32> to vector<2x8x32xf32>
    %715 = arith.addf %714, %1 : vector<2x8x32xf32>
    %716 = math.tanh %715 : vector<2x8x32xf32>
    %717 = vector.broadcast %8 : vector<1x1x32xf32> to vector<2x8x32xf32>
    %718 = arith.mulf %716, %717 : vector<2x8x32xf32>
    %cst_142 = arith.constant dense<0.000000e+00> : vector<2x8xf32>
    %719 = vector.multi_reduction <add>, %718, %cst_142 [2] : vector<2x8x32xf32> to vector<2x8xf32>
    %cst_143 = arith.constant dense<0xFF800000> : vector<2xf32>
    %720 = vector.multi_reduction <maximumf>, %719, %cst_143 [1] : vector<2x8xf32> to vector<2xf32>
    %721 = vector.shape_cast %720 : vector<2xf32> to vector<2x1xf32>
    %722 = vector.broadcast %721 : vector<2x1xf32> to vector<2x8xf32>
    %723 = arith.subf %719, %722 : vector<2x8xf32>
    %724 = math.exp %723 : vector<2x8xf32>
    %cst_144 = arith.constant dense<0.000000e+00> : vector<2xf32>
    %725 = vector.multi_reduction <add>, %724, %cst_144 [1] : vector<2x8xf32> to vector<2xf32>
    %726 = vector.shape_cast %725 : vector<2xf32> to vector<2x1xf32>
    %727 = vector.broadcast %726 : vector<2x1xf32> to vector<2x8xf32>
    %728 = arith.divf %724, %727 : vector<2x8xf32>
    %729 = vector.shape_cast %728 : vector<2x8xf32> to vector<2x8x1xf32>
    %730 = vector.broadcast %729 : vector<2x8x1xf32> to vector<2x8x32xf32>
    %731 = arith.mulf %730, %0 : vector<2x8x32xf32>
    %cst_145 = arith.constant dense<0.000000e+00> : vector<2x32xf32>
    %732 = vector.multi_reduction <add>, %731, %cst_145 [1] : vector<2x8x32xf32> to vector<2x32xf32>
    %733 = tpu.concatenate %707, %732 in 1 : vector<2x16xf32>, vector<2x32xf32> -> vector<2x48xf32>
    %cst_146 = arith.constant dense<0.000000e+00> : vector<2x96xf32>
    %734 = tpu.matmul %733, %3, %cst_146 {dimension_numbers = #tpu.dot_dimension_numbers<[1], [0], [0], [1], [0, 0, 1, 1], [], []>} : vector<2x48xf32>, vector<48x96xf32>, vector<2x96xf32> -> vector<2x96xf32>
    %735 = vector.extract_strided_slice %734 {offsets = [0, 0], sizes = [2, 32], strides = [1, 1]} : vector<2x96xf32> to vector<2x32xf32>
    %736 = vector.extract_strided_slice %712 {offsets = [0, 0], sizes = [2, 32], strides = [1, 1]} : vector<2x96xf32> to vector<2x32xf32>
    %737 = arith.addf %735, %736 : vector<2x32xf32>
    %738 = arith.negf %737 : vector<2x32xf32>
    %739 = math.exp %738 : vector<2x32xf32>
    %cst_147 = arith.constant 1.000000e+00 : f32
    %740 = vector.broadcast %cst_147 : f32 to vector<2x32xf32>
    %741 = arith.addf %740, %739 : vector<2x32xf32>
    %742 = arith.divf %740, %741 : vector<2x32xf32>
    %743 = vector.extract_strided_slice %734 {offsets = [0, 32], sizes = [2, 32], strides = [1, 1]} : vector<2x96xf32> to vector<2x32xf32>
    %744 = vector.extract_strided_slice %712 {offsets = [0, 32], sizes = [2, 32], strides = [1, 1]} : vector<2x96xf32> to vector<2x32xf32>
    %745 = arith.addf %743, %744 : vector<2x32xf32>
    %746 = arith.negf %745 : vector<2x32xf32>
    %747 = math.exp %746 : vector<2x32xf32>
    %cst_148 = arith.constant 1.000000e+00 : f32
    %748 = vector.broadcast %cst_148 : f32 to vector<2x32xf32>
    %749 = arith.addf %748, %747 : vector<2x32xf32>
    %750 = arith.divf %748, %749 : vector<2x32xf32>
    %751 = vector.extract_strided_slice %734 {offsets = [0, 64], sizes = [2, 32], strides = [1, 1]} : vector<2x96xf32> to vector<2x32xf32>
    %752 = vector.extract_strided_slice %712 {offsets = [0, 64], sizes = [2, 32], strides = [1, 1]} : vector<2x96xf32> to vector<2x32xf32>
    %753 = arith.mulf %742, %752 : vector<2x32xf32>
    %754 = arith.addf %751, %753 : vector<2x32xf32>
    %755 = math.tanh %754 : vector<2x32xf32>
    %cst_149 = arith.constant 1.000000e+00 : f32
    %756 = vector.broadcast %cst_149 : f32 to vector<2x32xf32>
    %757 = arith.subf %756, %750 : vector<2x32xf32>
    %758 = arith.mulf %757, %755 : vector<2x32xf32>
    %759 = arith.mulf %750, %683 : vector<2x32xf32>
    %760 = arith.addf %758, %759 : vector<2x32xf32>
    %cst_150 = arith.constant dense<0.000000e+00> : vector<2x16xf32>
    %761 = tpu.matmul %760, %4, %cst_150 {dimension_numbers = #tpu.dot_dimension_numbers<[1], [0], [0], [1], [0, 0, 1, 1], [], []>} : vector<2x32xf32>, vector<32x16xf32>, vector<2x16xf32> -> vector<2x16xf32>
    %762 = vector.broadcast %6 : vector<1x16xf32> to vector<2x16xf32>
    %763 = arith.addf %761, %762 : vector<2x16xf32>
    %cst_151 = arith.constant dense<0xFF800000> : vector<2xf32>
    %764 = vector.multi_reduction <maximumf>, %763, %cst_151 [1] : vector<2x16xf32> to vector<2xf32>
    %765 = vector.shape_cast %764 : vector<2xf32> to vector<2x1xf32>
    %766 = vector.broadcast %765 : vector<2x1xf32> to vector<2x16xf32>
    %767 = arith.subf %763, %766 : vector<2x16xf32>
    %768 = math.exp %767 : vector<2x16xf32>
    %cst_152 = arith.constant dense<0.000000e+00> : vector<2xf32>
    %769 = vector.multi_reduction <add>, %768, %cst_152 [1] : vector<2x16xf32> to vector<2xf32>
    %770 = vector.shape_cast %769 : vector<2xf32> to vector<2x1xf32>
    %771 = math.log %770 : vector<2x1xf32>
    %772 = arith.addf %771, %765 : vector<2x1xf32>
    %773 = vector.broadcast %772 : vector<2x1xf32> to vector<2x16xf32>
    %774 = arith.subf %763, %773 : vector<2x16xf32>
    %775 = tpu.concatenate %81, %35, %158, %112, %235, %189, %312, %266, %389, %343, %466, %420, %543, %497, %620, %574 in 1 : vector<2x16xf32>, vector<2x8xf32>, vector<2x16xf32>, vector<2x8xf32>, vector<2x16xf32>, vector<2x8xf32>, vector<2x16xf32>, vector<2x8xf32>, vector<2x16xf32>, vector<2x8xf32>, vector<2x16xf32>, vector<2x8xf32>, vector<2x16xf32>, vector<2x8xf32>, vector<2x16xf32>, vector<2x8xf32> -> vector<2x192xf32>
    %776 = tpu.concatenate %697, %651, %774, %728 in 1 : vector<2x16xf32>, vector<2x8xf32>, vector<2x16xf32>, vector<2x8xf32> -> vector<2x48xf32>
    %777 = tpu.concatenate %775, %776 in 1 : vector<2x192xf32>, vector<2x48xf32> -> vector<2x240xf32>
    %c0_153 = arith.constant 0 : index
    %c0_154 = arith.constant 0 : index
    %778 = vector.load %arg8[%c0_153, %c0_154] : memref<2x240xf32, #tpu.memory_space<vmem>>, vector<2x240xf32>
    tpu.vector_store %arg8[%c0_153, %c0_154], %777 {strides = array<i32>} : memref<2x240xf32, #tpu.memory_space<vmem>>, vector<2x240xf32>,
    %c0_155 = arith.constant 0 : index
    %c0_156 = arith.constant 0 : index
    %779 = vector.load %arg9[%c0_155, %c0_156] : memref<2x32xf32, #tpu.memory_space<vmem>>, vector<2x32xf32>
    tpu.vector_store %arg9[%c0_155, %c0_156], %760 {strides = array<i32>} : memref<2x32xf32, #tpu.memory_space<vmem>>, vector<2x32xf32>,
    return
  }
  func.func @transform_0(%arg0: i32) -> (i32, i32, i32) {
    %c0_i32 = arith.constant 0 : i32
    %c0_i32_0 = arith.constant 0 : i32
    %c0_i32_1 = arith.constant 0 : i32
    return %arg0, %c0_i32, %c0_i32_0 : i32, i32, i32
  }
  func.func @transform_1(%arg0: i32) -> (i32, i32, i32) {
    %c0_i32 = arith.constant 0 : i32
    %c0_i32_0 = arith.constant 0 : i32
    %c0_i32_1 = arith.constant 0 : i32
    return %arg0, %c0_i32, %c0_i32_0 : i32, i32, i32
  }
  func.func @transform_2(%arg0: i32) -> (i32, i32) {
    %c0_i32 = arith.constant 0 : i32
    %c0_i32_0 = arith.constant 0 : i32
    return %arg0, %c0_i32 : i32, i32
  }
  func.func @transform_3(%arg0: i32) -> (i32, i32) {
    %c0_i32 = arith.constant 0 : i32
    %c0_i32_0 = arith.constant 0 : i32
    %c0_i32_1 = arith.constant 0 : i32
    return %c0_i32, %c0_i32_0 : i32, i32
  }
  func.func @transform_4(%arg0: i32) -> (i32, i32) {
    %c0_i32 = arith.constant 0 : i32
    %c0_i32_0 = arith.constant 0 : i32
    %c0_i32_1 = arith.constant 0 : i32
    return %c0_i32, %c0_i32_0 : i32, i32
  }
  func.func @transform_5(%arg0: i32) -> (i32, i32) {
    %c0_i32 = arith.constant 0 : i32
    %c0_i32_0 = arith.constant 0 : i32
    %c0_i32_1 = arith.constant 0 : i32
    return %c0_i32, %c0_i32_0 : i32, i32
  }
  func.func @transform_6(%arg0: i32) -> (i32, i32) {
    %c0_i32 = arith.constant 0 : i32
    %c0_i32_0 = arith.constant 0 : i32
    %c0_i32_1 = arith.constant 0 : i32
    return %c0_i32, %c0_i32_0 : i32, i32
  }
  func.func @transform_7(%arg0: i32) -> (i32, i32) {
    %c0_i32 = arith.constant 0 : i32
    %c0_i32_0 = arith.constant 0 : i32
    return %arg0, %c0_i32 : i32, i32
  }
  func.func @transform_8(%arg0: i32) -> (i32, i32) {
    %c0_i32 = arith.constant 0 : i32
    %c0_i32_0 = arith.constant 0 : i32
    return %arg0, %c0_i32 : i32, i32
  }
}

</mosaic_0001>

<bundles_post_ra>
// kernel: tpu_custom_call.1
= control target key start
LH: loop header
LB: loop body
LE: loop exit
PB: predicated region body
PF: predicated region fallthrough
CT: control target
= control target key end

     0   :  { %14 = vsyncpa [#allocation3], 0  ;;  %s7014_s0 = inlined_call_operand.hbm [shape: f32[2,8,32], index: 0, kind: input, shape index: {}]   ;;  %s7015_s1 = inlined_call_operand.hbm [shape: f32[2,8,32], index: 1, kind: input, shape index: {}]   ;;  %s7016_s2 = inlined_call_operand.vmem [shape: f32[2,32], index: 2, kind: input, shape index: {}]   ;;  %s7017_s3 = inlined_call_operand.hbm [shape: f32[32,128], index: 3, kind: input, shape index: {}]   ;;  %s7018_s4 = inlined_call_operand.vmem [shape: f32[48,96], index: 4, kind: input, shape index: {}]   ;;  %s7019_s5 = inlined_call_operand.vmem [shape: f32[32,16], index: 5, kind: input, shape index: {}]   ;;  %s7020_s6 = inlined_call_operand.vmem [shape: f32[1,384], index: 6, kind: input, shape index: {}]   ;;  %s7021_s7 = inlined_call_operand.hbm [shape: f32[2,240], index: 7, kind: output, shape index: {0}]   ;;  %s7022_s8 = inlined_call_operand.hbm [shape: f32[2,32], index: 8, kind: output, shape index: {1}]  }
   0x1   :  { %15 = vsyncpa [#allocation6], 0 }
   0x2   :  { %16 = vsyncpa [#allocation4], 0 }
   0x3   :  { %17 = vsyncpa [#allocation10], 0  ;;  %s5758_s27 = smov [#allocation5]   ;;  %s5759_s29 = smov [#allocation2]  }
   0x4   :  { %s35_s28 = sshll.u32 %s5758_s27, 4  ;;  %s23_s30 = sshll.u32 %s5759_s29, 4  ;;  %s36_s28 = int_to_ptr.vmem [resolvable:$true] %s35_s28  ;;  %s5825_s30 = int_to_ptr.vmem [resolvable:$true] %s23_s30 }
   0x5   :  { %s5640_s11 = scalar_lea.hbm %s7015_s1, 256 }
   0x6   :  { %p5641_p0 = scmp.ne.s32.totalorder %s7015_s1, %s5640_s11  ;;  %p5644_p1 = scmp.lt.u32.totalorder %s5640_s11, %s7015_s1 }
   0x8   :  { %p5646_p2 = pnand %p5644_p1, %p5641_p0 }
   0xa   :  { %5649 = shalt.err (!%p5646_p2)
}
   0xb   :  { %s5650_s16 = scalar_lea.vmem %s36_s28, 256  ;;  %p5655_p4 = scmp.lt.s32.totalorder %s36_s28, %s36_s28 }
   0xc   :  { %p5651_p3 = scmp.ne.s32.totalorder %s36_s28, %s5650_s16  ;;  %p5656_p5 = scmp.lt.s32.totalorder %s5650_s16, %s5650_s16 }
   0xe   :  { %p5657_p6 = por %p5656_p5, %p5655_p4 }
  0x10   :  { %p5658_p7 = pnand %p5657_p6, %p5651_p3 }
  0x12   :  { %5661 = shalt.err (!%p5658_p7)
}
  0x13   :  { %s5760_s17 = smov 128   ;;  %s5761_s18 = smov 8  }
  0x14   :  { %41 = dma.hbm_to_vmem [thread:$0]  %s7015_s1, 256, %s36_s28, [#allocation6], %s5760_s17, %s5760_s17, %s5761_s18  }
  0x15   :  { %s5662_s23 = scalar_lea.hbm %s7014_s0, 256 }
  0x16   :  { %p5663_p8 = scmp.ne.s32.totalorder %s7014_s0, %s5662_s23  ;;  %p5666_p9 = scmp.lt.u32.totalorder %s5662_s23, %s7014_s0 }
  0x18   :  { %p5668_p10 = pnand %p5666_p9, %p5663_p8 }
  0x1a   :  { %5671 = shalt.err (!%p5668_p10)
}
  0x1b   :  { %s5672_s29 = scalar_lea.vmem %s5825_s30, 256  ;;  %p5677_p12 = scmp.lt.s32.totalorder %s5825_s30, %s5825_s30 }
  0x1c   :  { %p5673_p11 = scmp.ne.s32.totalorder %s5825_s30, %s5672_s29  ;;  %p5678_p13 = scmp.lt.s32.totalorder %s5672_s29, %s5672_s29 }
  0x1e   :  { %p5679_p0 = por %p5678_p13, %p5677_p12 }
  0x20   :  { %p5680_p1 = pnand %p5679_p0, %p5673_p11 }
  0x22   :  { %5683 = shalt.err (!%p5680_p1)
}
  0x23   :  { %29 = dma.hbm_to_vmem [thread:$0]  %s7014_s0, 256, %s5825_s30, [#allocation3], %s5760_s17, %s5760_s17, %s5761_s18  }
  0x24   :  { %s5762_s9 = smov [#allocation7]   ;;  %s5684_s13 = scalar_lea.hbm %s7017_s3, 512 }
  0x25   :  { %s49_s10 = sshll.u32 %s5762_s9, 4  ;;  %p5685_p2 = scmp.ne.s32.totalorder %s7017_s3, %s5684_s13  ;;  %s50_s10 = int_to_ptr.vmem [resolvable:$true] %s49_s10 }
  0x26   :  { %p5688_p3 = scmp.lt.u32.totalorder %s5684_s13, %s7017_s3 }
  0x28   :  { %p5690_p4 = pnand %p5688_p3, %p5685_p2 }
  0x2a   :  { %5693 = shalt.err (!%p5690_p4)
}
  0x2b   :  { %s5694_s20 = scalar_lea.vmem %s50_s10, 512  ;;  %p5699_p6 = scmp.lt.s32.totalorder %s50_s10, %s50_s10 }
  0x2c   :  { %p5695_p5 = scmp.ne.s32.totalorder %s50_s10, %s5694_s20  ;;  %p5700_p7 = scmp.lt.s32.totalorder %s5694_s20, %s5694_s20 }
  0x2e   :  { %p5701_p8 = por %p5700_p7, %p5699_p6 }
  0x30   :  { %p5702_p9 = pnand %p5701_p8, %p5695_p5 }
  0x32   :  { %5705 = shalt.err (!%p5702_p9)
}
  0x33   :  { %55 = dma.hbm_to_vmem [thread:$0]  %s7017_s3, 512, %s50_s10, [#allocation6], %s5760_s17, %s5760_s17, %s5761_s18  }
  0x34   :  { %5750 = dma.done.wait [#allocation3], 256  }
  0x35   :  { %5751 = vsyncadd [#allocation3], 4294967040 }
  0x36   :  { %5752 = dma.done.wait [#allocation6], 768  }
  0x37   :  { %5753 = vsyncadd [#allocation6], 4294966528  ;;  %v7023_v0 = vmov 0.0|0.0   ;;  %vm5764_vm0 = vmmov 0   ;;  %v7025_v1 = vmov 0.0   ;;  %v75_v2 = vld [vmem:[#allocation7] sm:$0xff]  ;;  %v92_v9 = vlaneseq }
  0x38   :  { %5172 = vmatprep.subr.bf16.mxu0 %v7023_v0  ;;  %4810 = vmatprep.mubr.msk.f32.mxu0 %vm5764_vm0, %v7025_v1  ;;  %v76_v3 = vld [vmem:[#allocation7 + $0x8] sm:$0xff]  ;;  %v77_v4 = vld [vmem:[#allocation7 + $0x10] sm:$0xff]  ;;  %v78_v6 = vld [vmem:[#allocation7 + $0x18] sm:$0xff]  ;;  %vm104_vm1 = vcmask 261120   ;;  %v5766_v10 = vmov 1966171168  }
  0x39   :  { %5178 = vmatprep.subr.bf16.mxu1 %v7023_v0  ;;  %4825 = vmatprep.mubr.msk.f32.mxu1 %vm5764_vm0, %v7025_v1  ;;  %v5883_v5 = vpack.c.bf16 %v76_v3, %v75_v2  ;;  %v5886_v7 = vpack.c.bf16 %v78_v6, %v77_v4  ;;  %v5893_v8 = vld [vmem:[%s7016_s2] sm:$0x3]  ;;  %v180_v11 = vunpack.c.l.s4 %v5766_v10  ;;  %v5900_v13 = vshrl.u32 %v92_v9, 7  ;;  %v5919_v23 = vld [vmem:[#allocation5] sm:$0xff]  ;;  %v5923_v26 = vld [vmem:[#allocation5 + $0x8] sm:$0xff]  ;;  %s5768_s23 = smov 96  }
  0x3a   :  { %v5905_v14 = vld [vmem:[%s7020_s6] ss:$0 sm:$0xff]  ;;  %v5931_v30 = vld [vmem:[%s7020_s6 + $0x2] ss:$0 sm:$0xff]  ;;  %v5937_v37 = vand.u32 127, %v92_v9  ;;  %vm239_vm2 = vcmask 1041409  }
  0x3b   :  { %5174 = vmatpush3.bf16.msra.mxu0 %v5883_v5  ;;  %v181_v12 = vunpack.c.0.s8 %v180_v11  ;;  %v5916_v20 = vsub.s32 0, %v5900_v13  ;;  %vm242_vm3 = vcmask 58368   ;;  %v5767_v45 = vmov 0   ;;  %s5769_s24 = smov 32   ;;  %v79_v10 = vld [vmem:[%s7018_s4] sm:$0xff]  ;;  %v80_v11 = vld [vmem:[%s7018_s4 + $0x8] sm:$0xff] }
  0x3c   :  { %5175 = vmatprep.subr.bf16.mxu0 %v7023_v0  ;;  %v5941_v39 = vsub.s32 %v5937_v37, %v5900_v13  ;;  %5405 = vset.pattern.permute.xlu0 %v5767_v45  ;;  %v5948_v46 = vsub.s32 1, %v5900_v13  ;;  %vm95_vm4 = vcmp.eq.s32.totalorder %v5937_v37, 0  ;;  %vm331_vm5 = vcmask 130048   ;;  %s5771_s15 = smov 64   ;;  %s5775_s13 = smov 72  }
  0x3d   :  { %v5908_v15 = vsub.s32 %v181_v12, %v5900_v13  ;;  %5404 = vset.pattern.permute.xlu1 %v5767_v45  ;;  %v81_v12 = vld [vmem:[%s7018_s4 + $0x10] sm:$0xff]  ;;  %vm333_vm6 = vcmask 392192   ;;  %vm519_vm7 = vcmask 123904   ;;  %s5776_s14 = smov 40   ;;  %s5777_s16 = smov [#allocation9]  }
  0x3e   :  { %s4565_s19 = sshll.u32 %s5777_s16, 4  ;;  %s4566_s19 = int_to_ptr.vmem [resolvable:$true] %s4565_s19 }
  0x3f   :  { %5177 = vmatpush3.bf16.msra.mxu0 %v5886_v7  ;;  %s5706_s20 = scalar_lea.vmem %s4566_s19, 32  ;;  %p5711_p11 = scmp.lt.s32.totalorder %s4566_s19, %s4566_s19 }
  0x40   :  { %5187 = vmatprep.subr.bf16.mxu0 %v7023_v0  ;;  %p5707_p10 = scmp.ne.s32.totalorder %s4566_s19, %s5706_s20  ;;  %p5712_p12 = scmp.lt.s32.totalorder %s5706_s20, %s5706_s20 }
  0x42   :  { %4811 = vmatmul.mubr.msk.f32.vlgmr.msra.gmra.mrb[0].mxu0 %vm104_vm1, %v5893_v8  ;;  %p5713_p13 = por %p5712_p12, %p5711_p11 }
  0x43   :  { %4836 = vmatprep.mubr.msk.f32.mxu0 %vm5764_vm0, %v7025_v1 }
  0x44   :  { %p5714_p0 = pnand %p5713_p13, %p5707_p10 }
 0x115   :  { %v174_v16 = vpop.f32.mrb[0].mxu0 }
 0x116   :  { %v5911_v17 = vadd.f32 %v5905_v14, %v174_v16  ;;  %v4812_v18 = vpop.f32.mrb[1].mxu0  ;;  %v5971_v16 = vpack.c.bf16 %v80_v11, %v79_v10 }
 0x117   :  { %v82_v18 = vld [vmem:[%s7018_s4 + $0x18] sm:$0xff] }
 0x118   :  { %v185_v19 = vrot.slane %v5911_v17, %v5908_v15  ;;  %5180 = vmatpush3.bf16.msra.mxu1 %v5971_v16 }
 0x119   :  { %5181 = vmatprep.subr.bf16.mxu1 %v7023_v0 }
 0x11a   :  { %v186_v21 = vcombine.high %v185_v19, %v185_v19  ;;  %v193_v22 = vrot.slane %v185_v19, %v5908_v15  ;;  %v83_v19 = vld [vmem:[%s7018_s4 + $0x20] sm:$0xff] }
 0x11c   :  { %v200_v24 = vrot.slane %v186_v21, %v5908_v15  ;;  %v204_v25 = vrot.slane %v193_v22, %v5916_v20  ;;  %v84_v21 = vld [vmem:[%s7018_s4 + $0x28] sm:$0xff]  ;;  %s5770_s4 = smov 16  }
 0x11d   :  { %v5987_v22 = vpack.c.bf16 %v84_v21, %v83_v19 }
 0x11e   :  { %v208_v27 = vrot.slane %v200_v24, %v5916_v20  ;;  %v211_v28 = vadd.f32 %v204_v25, %v5919_v23  ;;  %v5992_v24 = vld [vmem:[#allocation2] sm:$0xff] }
 0x120   :  { %v212_v29 = vadd.f32 %v208_v27, %v5923_v26  ;;  %5406 = vtanh.f32 %v211_v28  ;;  %v5998_v28 = vld [vmem:[#allocation2 + $0x8] sm:$0xff] }
 0x122   :  { %5408 = vtanh.f32 %v212_v29 }
 0x12a   :  { %v5407_v31 = vpop.eup %5406 }
 0x12b   :  { %v221_v32 = vmul.f32 %v5407_v31, %v5931_v30 }
 0x12c   :  { %v5409_v33 = vpop.eup %5408 }
 0x12d   :  { %v223_v34 = vsel %vm104_vm1, %v221_v32, 0.0  ;;  %v222_v35 = vmul.f32 %v5409_v33, %v5931_v30 }
 0x12e   :  { %224 = vadd.xlane.f32.xlu0 %v223_v34 }
 0x12f   :  { %v226_v36 = vsel %vm104_vm1, %v222_v35, 0.0 }
 0x132   :  { %227 = vadd.xlane.f32.xlu0 %v226_v36 }
 0x1bb   :  { %v225_v38 = vpop.xlane.xlu0 %224 }
 0x1bc   :  { %v234_v41 = vrot.slane %v225_v38, %v5941_v39 }
 0x1bf   :  { %v228_v40 = vpop.xlane.xlu0 %227 }
 0x1c0   :  { %v238_v42 = vrot.slane %v228_v40, %v5941_v39 }
 0x1c2   :  { %v240_v43 = vsel %vm239_vm2, %v238_v42, %v234_v41 }
 0x1c3   :  { %v243_v44 = vsel %vm242_vm3, %v240_v43, -inf }
 0x1c4   :  { %244 = vmax.xlane.f32.xlu1 %v243_v44 }
 0x251   :  { %v245_v47 = vpop.xlane.xlu1 %244 }
 0x252   :  { %v250_v48 = vrot.slane %v245_v47, %v5916_v20  ;;  %v254_v49 = vrot.slane %v245_v47, %v5948_v46 }
 0x254   :  { %v257_v50 = vsub.f32 %v225_v38, %v250_v48  ;;  %v258_v51 = vsub.f32 %v228_v40, %v254_v49 }
 0x256   :  { %v259_v52 = vmul.f32 1.442695, %v257_v50  ;;  %v261_v53 = vmul.f32 1.442695, %v258_v51  ;;  %v4579_v50 = vsel %vm95_vm4, 1.0, %v7025_v1 }
 0x258   :  { %5410 = vpow2.f32 %v259_v52 }
 0x259   :  { %5412 = vpow2.f32 %v261_v53 }
 0x262   :  { %v5411_v54 = vpop.eup %5410 }
 0x263   :  { %v5413_v55 = vpop.eup %5412  ;;  %266 = vperm.xlu1 %5404, %v5411_v54  }
 0x264   :  { %269 = vperm.xlu0 %5405, %v5413_v55  }
 0x2e2   :  { %v267_v56 = vpop.permute.xlu1 %266 }
 0x2e3   :  { %v270_v57 = vpop.permute.xlu0 %269  ;;  %v274_v58 = vrot.slane %v267_v56, %v5941_v39 }
 0x2e4   :  { %v278_v59 = vrot.slane %v270_v57, %v5941_v39 }
 0x2e6   :  { %v279_v60 = vsel %vm239_vm2, %v278_v59, %v274_v58 }
 0x2e7   :  { %v281_v61 = vsel %vm242_vm3, %v279_v60, 0.0 }
 0x2e8   :  { %282 = vadd.xlane.f32.xlu1 %v281_v61 }
 0x375   :  { %v283_v62 = vpop.xlane.xlu1 %282 }
 0x376   :  { %v288_v63 = vrot.slane %v283_v62, %v5916_v20  ;;  %v292_v2 = vrot.slane %v283_v62, %v5948_v46 }
 0x378   :  { %5414 = vrcp.f32 %v288_v63 }
 0x379   :  { %5416 = vrcp.f32 %v292_v2  ;;  %v85_v2 = vld [vmem:[%s7019_s5] sm:$0xff] }
 0x382   :  { %v5415_v3 = vpop.eup %5414 }
 0x383   :  { %v296_v4 = vmul.f32 %v5415_v3, %v5411_v54  ;;  %v5417_v6 = vpop.eup %5416  ;;  %v86_v3 = vld [vmem:[%s7019_s5 + $0x8] sm:$0xff] }
 0x384   :  { %v298_v9 = vmul.f32 %v5417_v6, %v5413_v55  ;;  %v6030_v6 = vpack.c.bf16 %v86_v3, %v85_v2 }
 0x385   :  { %301 = vperm.xlu0 %5405, %v296_v4   ;;  %v87_v4 = vld [vmem:[%s7019_s5 + $0x10] sm:$0xff] }
 0x386   :  { %5189 = vmatpush3.bf16.msra.mxu0 %v6030_v6 }
 0x387   :  { %5190 = vmatprep.subr.bf16.mxu0 %v7023_v0 }
 0x389   :  { %306 = vperm.xlu0 %5405, %v298_v9   ;;  %v88_v9 = vld [vmem:[%s7019_s5 + $0x18] sm:$0xff] }
 0x38a   :  { %v6036_v10 = vpack.c.bf16 %v88_v9, %v87_v4 }
 0x38c   :  { %5192 = vmatpush3.bf16.msra.mxu0 %v6036_v10 }
 0x38d   :  { %407 = vrot.lane.b32.xlu0 %v5911_v17, %s5768_s23  ;;  %5199 = vmatprep.subr.bf16.mxu0 %v7023_v0 }
 0x391   :  { %417 = vrot.lane.b32.xlu0 %v5911_v17, %s5769_s24  ;;  %v5977_v17 = vpack.c.bf16 %v82_v18, %v81_v12 }
 0x393   :  { %5183 = vmatpush3.bf16.msra.mxu1 %v5977_v17 }
 0x394   :  { %5184 = vmatprep.subr.bf16.mxu1 %v7023_v0 }
 0x397   :  { %5186 = vmatpush3.bf16.msra.mxu1 %v5987_v22 }
 0x398   :  { %5193 = vmatprep.subr.bf16.mxu1 %v7023_v0 }
 0x404   :  { %v5994_v25 = vpop.permute.xlu0 %301 }
 0x405   :  { %7036 = vst [vmem:[#allocation15_spill] sm:$0xff] %v5994_v25  ;;  %v309_v27 = vmul.f32 %v5994_v25, %v5992_v24 }
 0x407   :  { %v311_v29 = vsel %vm104_vm1, %v309_v27, 0.0 }
 0x408   :  { %v312_v31 = vrot.slane %v311_v29, 4  ;;  %v6001_v32 = vpop.permute.xlu0 %306 }
 0x409   :  { %v310_v33 = vmul.f32 %v6001_v32, %v5998_v28 }
 0x40a   :  { %v313_v34 = vadd.f32 %v312_v31, %v311_v29 }
 0x40b   :  { %v318_v35 = vsel %vm104_vm1, %v310_v33, 0.0 }
 0x40c   :  { %v314_v36 = vrot.slane %v313_v34, 2  ;;  %v319_v38 = vrot.slane %v318_v35, 4 }
 0x40e   :  { %v320_v40 = vadd.f32 %v319_v38, %v318_v35  ;;  %v315_v41 = vadd.f32 %v314_v36, %v313_v34 }
 0x410   :  { %v321_v42 = vrot.slane %v320_v40, 2  ;;  %v316_v43 = vrot.slane %v315_v41, 1 }
 0x412   :  { %v322_v44 = vadd.f32 %v321_v42, %v320_v40  ;;  %v317_v47 = vadd.f32 %v316_v43, %v315_v41 }
 0x414   :  { %v323_v45 = vrot.slane %v322_v44, 1 }
 0x416   :  { %v324_v48 = vadd.f32 %v323_v45, %v322_v44 }
 0x418   :  { %v327_v49 = vsel %vm239_vm2, %v324_v48, %v317_v47 }
 0x419   :  { %328 = vrot.lane.b32.xlu1 %v327_v49, %s5770_s4 }
 0x41d   :  { %433 = vrot.lane.b32.xlu1 %v5893_v8, %s5769_s24  ;;  %v408_v8 = vpop.permute.xlu0 %407 }
 0x421   :  { %v418_v60 = vpop.permute.xlu0 %417 }
 0x48b   :  { %v329_v51 = vpop.permute.xlu1 %328 }
 0x48c   :  { %v332_v52 = vsel %vm331_vm5, %v4579_v50, %v329_v51 }
 0x48d   :  { %4826 = vmatmul.mubr.msk.f32.vlgmr.msra.gmra.mrb[0].mxu1 %vm333_vm6, %v332_v52 }
 0x48e   :  { %5195 = vmatpush3.bf16.msra.mxu1 %v5883_v5  ;;  %4847 = vmatprep.mubr.msk.f32.mxu1 %vm5764_vm0, %v7025_v1 }
 0x48f   :  { %5196 = vmatprep.subr.bf16.mxu1 %v7023_v0  ;;  %v434_v12 = vpop.permute.xlu1 %433 }
 0x492   :  { %5198 = vmatpush3.bf16.msra.mxu1 %v5886_v7 }
 0x493   :  { %5208 = vmatprep.subr.bf16.mxu1 %v7023_v0 }
 0x560   :  { %v403_v53 = vpop.f32.mrb[0].mxu1 }
 0x561   :  { %v410_v54 = vadd.f32 %v408_v8, %v403_v53  ;;  %v4827_v55 = vpop.f32.mrb[1].mxu1 }
 0x563   :  { %v4584_v56 = vmul.f32 -1.442695, %v410_v54 }
 0x565   :  { %5418 = vpow2.f32 %v4584_v56 }
 0x56f   :  { %v5419_v57 = vpop.eup %5418 }
 0x570   :  { %v414_v58 = vadd.f32 1.0, %v5419_v57 }
 0x572   :  { %5420 = vrcp.f32 %v414_v58 }
 0x57c   :  { %v5421_v59 = vpop.eup %5420 }
 0x57d   :  { %v420_v61 = vmul.f32 %v5421_v59, %v418_v60  ;;  %v427_v18 = vsub.f32 1.0, %v5421_v59  ;;  %v436_v21 = vmul.f32 %v5421_v59, %v434_v12  ;;  %v6086_v12 = vld [vmem:[%s7020_s6 + $0x1] ss:$0 sm:$0xff] }
 0x57f   :  { %422 = vrot.lane.b32.xlu0 %v420_v61, %s5771_s15 }
 0x5f1   :  { %v423_v62 = vpop.permute.xlu0 %422 }
 0x5f2   :  { %v425_v63 = vadd.f32 %v423_v62, %v403_v53 }
 0x5f4   :  { %5422 = vtanh.f32 %v425_v63 }
 0x5fe   :  { %v5423_v11 = vpop.eup %5422 }
 0x5ff   :  { %429 = vrot.lane.b32.xlu0 %v5423_v11, %s5768_s23 }
 0x671   :  { %v430_v19 = vpop.permute.xlu0 %429 }
 0x672   :  { %v432_v27 = vmul.f32 %v430_v19, %v427_v18 }
 0x674   :  { %v6042_v29 = vadd.f32 %v436_v21, %v432_v27 }
 0x676   :  { %445 = vrot.lane.b32.xlu0 %v6042_v29, %s5768_s23 }
 0x6e8   :  { %v446_v31 = vpop.permute.xlu0 %445 }
 0x6e9   :  { %4837 = vmatmul.mubr.msk.f32.vlgmr.msra.gmra.mrb[2].mxu0 %vm104_vm1, %v446_v31  ;;  %4848 = vmatmul.mubr.msk.f32.vlgmr.msra.gmra.mrb[2].mxu1 %vm104_vm1, %v446_v31 }
 0x6ea   :  { %5201 = vmatpush3.bf16.msra.mxu0 %v5971_v16  ;;  %4862 = vmatprep.mubr.msk.f32.mxu0 %vm5764_vm0, %v7025_v1 }
 0x6eb   :  { %5202 = vmatprep.subr.bf16.mxu0 %v7023_v0  ;;  %5210 = vmatpush3.bf16.msra.mxu1 %v6030_v6 }
 0x6ec   :  { %5211 = vmatprep.subr.bf16.mxu1 %v7023_v0  ;;  %4873 = vmatprep.mubr.msk.f32.mxu1 %vm5764_vm0, %v7025_v1 }
 0x6ee   :  { %5204 = vmatpush3.bf16.msra.mxu0 %v5977_v17 }
 0x6ef   :  { %5205 = vmatprep.subr.bf16.mxu0 %v7023_v0  ;;  %5213 = vmatpush3.bf16.msra.mxu1 %v6036_v10 }
 0x6f0   :  { %5220 = vmatprep.subr.bf16.mxu1 %v7023_v0 }
 0x6f2   :  { %5207 = vmatpush3.bf16.msra.mxu0 %v5987_v22 }
 0x6f3   :  { %5214 = vmatprep.subr.bf16.mxu0 %v7023_v0 }
 0x7bc   :  { %v515_v33 = vpop.f32.mrb[2].mxu0  ;;  %v619_v34 = vpop.f32.mrb[2].mxu1 }
 0x7bd   :  { %v6063_v35 = vadd.f32 %v5905_v14, %v619_v34  ;;  %v4838_v36 = vpop.f32.mrb[3].mxu0  ;;  %v4849_v38 = vpop.f32.mrb[3].mxu1  ;;  %v6089_v18 = vadd.f32 %v6086_v12, %v515_v33 }
 0x7bf   :  { %v630_v40 = vrot.slane %v6063_v35, %v5908_v15  ;;  %v520_v19 = vsel %vm519_vm7, %v6089_v18, -inf }
 0x7c1   :  { %v631_v41 = vcombine.high %v630_v40, %v630_v40  ;;  %v638_v42 = vrot.slane %v630_v40, %v5908_v15 }
 0x7c3   :  { %v645_v43 = vrot.slane %v631_v41, %v5908_v15  ;;  %v649_v44 = vrot.slane %v638_v42, %v5916_v20 }
 0x7c5   :  { %v653_v45 = vrot.slane %v645_v43, %v5916_v20  ;;  %v656_v47 = vadd.f32 %v649_v44, %v5919_v23 }
 0x7c7   :  { %v657_v48 = vadd.f32 %v653_v45, %v5923_v26  ;;  %5424 = vtanh.f32 %v656_v47 }
 0x7c9   :  { %5426 = vtanh.f32 %v657_v48 }
 0x7d1   :  { %v5425_v49 = vpop.eup %5424 }
 0x7d2   :  { %v660_v50 = vmul.f32 %v5425_v49, %v5931_v30 }
 0x7d3   :  { %v5427_v51 = vpop.eup %5426 }
 0x7d4   :  { %v662_v52 = vsel %vm104_vm1, %v660_v50, 0.0  ;;  %v661_v8 = vmul.f32 %v5427_v51, %v5931_v30 }
 0x7d5   :  { %663 = vadd.xlane.f32.xlu1 %v662_v52 }
 0x7d6   :  { %v665_v53 = vsel %vm104_vm1, %v661_v8, 0.0 }
 0x7d7   :  { %666 = vadd.xlane.f32.xlu0 %v665_v53 }
 0x862   :  { %v664_v54 = vpop.xlane.xlu1 %663 }
 0x863   :  { %v673_v56 = vrot.slane %v664_v54, %v5941_v39 }
 0x864   :  { %v667_v55 = vpop.xlane.xlu0 %666 }
 0x865   :  { %v677_v57 = vrot.slane %v667_v55, %v5941_v39 }
 0x867   :  { %v678_v58 = vsel %vm239_vm2, %v677_v57, %v673_v56 }
 0x868   :  { %v680_v59 = vsel %vm242_vm3, %v678_v58, -inf }
 0x869   :  { %681 = vmax.xlane.f32.xlu0 %v680_v59 }
 0x8f6   :  { %v682_v60 = vpop.xlane.xlu0 %681 }
 0x8f7   :  { %v687_v61 = vrot.slane %v682_v60, %v5916_v20  ;;  %v691_v62 = vrot.slane %v682_v60, %v5948_v46 }
 0x8f9   :  { %v694_v63 = vsub.f32 %v664_v54, %v687_v61  ;;  %v695_v2 = vsub.f32 %v667_v55, %v691_v62 }
 0x8fb   :  { %v696_v3 = vmul.f32 1.442695, %v694_v63  ;;  %v698_v4 = vmul.f32 1.442695, %v695_v2 }
 0x8fd   :  { %5428 = vpow2.f32 %v696_v3 }
 0x8fe   :  { %5430 = vpow2.f32 %v698_v4 }
 0x907   :  { %v5429_v9 = vpop.eup %5428 }
 0x908   :  { %v5431_v11 = vpop.eup %5430  ;;  %703 = vperm.xlu1 %5404, %v5429_v9  }
 0x909   :  { %706 = vperm.xlu0 %5405, %v5431_v11  }
 0x92c   :  { %521 = vmax.xlane.f32.xlu1 %v520_v19 }
 0x987   :  { %v704_v21 = vpop.permute.xlu1 %703 }
 0x988   :  { %v707_v27 = vpop.permute.xlu0 %706  ;;  %v711_v31 = vrot.slane %v704_v21, %v5941_v39 }
 0x989   :  { %v715_v34 = vrot.slane %v707_v27, %v5941_v39 }
 0x98b   :  { %v716_v36 = vsel %vm239_vm2, %v715_v34, %v711_v31 }
 0x98c   :  { %v718_v38 = vsel %vm242_vm3, %v716_v36, 0.0 }
 0x98d   :  { %719 = vadd.xlane.f32.xlu0 %v718_v38 }
 0x9b9   :  { %v6097_v40 = vpop.xlane.xlu1 %521 }
 0x9ba   :  { %vm533_vm8 = vcmp.eq.f32.partialorder %v6089_v18, %v6097_v40 }
 0x9bb   :  { %v534_v33 = vsel %vm533_vm8, %v5937_v37, 16 }
 0x9bc   :  { %v535_v41 = vsel %vm519_vm7, %v534_v33, 2147483647 }
 0x9bd   :  { %v537_v42 = vshra.s32 %v535_v41, 16  ;;  %v536_v52 = vand.u32 65535, %v535_v41 }
 0x9bf   :  { %v539_v43 = vcvt.s32.f32 %v537_v42  ;;  %v538_v53 = vcvt.s32.f32 %v536_v52 }
 0x9c1   :  { %540 = vmin.xlane.f32.xlu1 %v539_v43 }
 0xa1a   :  { %v720_v44 = vpop.xlane.xlu0 %719 }
 0xa1b   :  { %v725_v45 = vrot.slane %v720_v44, %v5916_v20  ;;  %v729_v47 = vrot.slane %v720_v44, %v5948_v46 }
 0xa1d   :  { %5432 = vrcp.f32 %v725_v45 }
 0xa1e   :  { %5434 = vrcp.f32 %v729_v47 }
 0xa27   :  { %v5433_v48 = vpop.eup %5432 }
 0xa28   :  { %v5435_v49 = vpop.eup %5434  ;;  %v733_v50 = vmul.f32 %v5433_v48, %v5429_v9 }
 0xa29   :  { %v735_v51 = vmul.f32 %v5435_v49, %v5431_v11 }
 0xa2a   :  { %738 = vperm.xlu0 %5405, %v733_v50  }
 0xa2b   :  { %743 = vperm.xlu1 %5404, %v735_v51  }
 0xa4e   :  { %v541_v8 = vpop.xlane.xlu1 %540 }
 0xa4f   :  { %vm542_vm9 = vcmp.eq.f32.partialorder %v539_v43, %v541_v8  ;;  %v547_v38 = vcvt.f32.s32 %v541_v8 }
 0xa50   :  { %v543_v54 = vsel %vm542_vm9, %v538_v53, inf }
 0xa51   :  { %544 = vmin.xlane.f32.xlu1 %v543_v54  ;;  %v548_v41 = vshll.u32 %v547_v38, 16 }
 0xaa9   :  { %v6105_v55 = vpop.permute.xlu0 %738 }
 0xaaa   :  { %7037 = vst [vmem:[#allocation16_spill] sm:$0xff] %v6105_v55  ;;  %v746_v56 = vmul.f32 %v6105_v55, %v5992_v24  ;;  %v6109_v57 = vpop.permute.xlu1 %743 }
 0xaab   :  { %7038 = vst [vmem:[#allocation17_spill] sm:$0xff] %v6109_v57  ;;  %v747_v58 = vmul.f32 %v6109_v57, %v5998_v28 }
 0xaac   :  { %v748_v59 = vsel %vm104_vm1, %v746_v56, 0.0 }
 0xaad   :  { %v749_v60 = vrot.slane %v748_v59, 4  ;;  %v755_v61 = vsel %vm104_vm1, %v747_v58, 0.0 }
 0xaae   :  { %v756_v62 = vrot.slane %v755_v61, 4 }
 0xaaf   :  { %v750_v63 = vadd.f32 %v749_v60, %v748_v59 }
 0xab0   :  { %v757_v2 = vadd.f32 %v756_v62, %v755_v61 }
 0xab1   :  { %v751_v3 = vrot.slane %v750_v63, 2 }
 0xab2   :  { %v758_v4 = vrot.slane %v757_v2, 2 }
 0xab3   :  { %v752_v9 = vadd.f32 %v751_v3, %v750_v63 }
 0xab4   :  { %v759_v11 = vadd.f32 %v758_v4, %v757_v2 }
 0xab5   :  { %v753_v19 = vrot.slane %v752_v9, 1 }
 0xab6   :  { %v760_v21 = vrot.slane %v759_v11, 1 }
 0xab7   :  { %v754_v27 = vadd.f32 %v753_v19, %v752_v9 }
 0xab8   :  { %v761_v31 = vadd.f32 %v760_v21, %v759_v11 }
 0xaba   :  { %v764_v34 = vsel %vm239_vm2, %v761_v31, %v754_v27 }
 0xabb   :  { %765 = vrot.lane.b32.xlu0 %v764_v34, %s5770_s4 }
 0xabf   :  { %842 = vrot.lane.b32.xlu0 %v6063_v35, %s5768_s23 }
 0xac3   :  { %852 = vrot.lane.b32.xlu0 %v6063_v35, %s5769_s24 }
 0xade   :  { %v545_v36 = vpop.xlane.xlu1 %544 }
 0xadf   :  { %v546_v33 = vcvt.f32.s32 %v545_v36 }
 0xae1   :  { %v549_v42 = vadd.s32 %v548_v41, %v546_v33 }
 0xae3   :  { %vm550_vm10 = vcmp.eq.s32.totalorder %v5937_v37, %v549_v42 }
 0xae4   :  { %v4587_v44 = vsel %vm550_vm10, 1.0, %v7025_v1 }
 0xb2d   :  { %v766_v43 = vpop.permute.xlu0 %765 }
 0xb2e   :  { %v768_v45 = vsel %vm331_vm5, %v4587_v44, %v766_v43 }
 0xb2f   :  { %4863 = vmatmul.mubr.msk.f32.vlgmr.msra.gmra.mrb[4].mxu0 %vm333_vm6, %v768_v45 }
 0xb30   :  { %5216 = vmatpush3.bf16.msra.mxu0 %v5883_v5  ;;  %4884 = vmatprep.mubr.msk.f32.mxu0 %vm5764_vm0, %v7025_v1 }
 0xb31   :  { %5217 = vmatprep.subr.bf16.mxu0 %v7023_v0  ;;  %v843_v35 = vpop.permute.xlu0 %842 }
 0xb34   :  { %5219 = vmatpush3.bf16.msra.mxu0 %v5886_v7 }
 0xb35   :  { %5229 = vmatprep.subr.bf16.mxu0 %v7023_v0  ;;  %v853_v53 = vpop.permute.xlu0 %852 }
 0xc02   :  { %v838_v47 = vpop.f32.mrb[4].mxu0 }
 0xc03   :  { %v845_v48 = vadd.f32 %v843_v35, %v838_v47  ;;  %v4864_v49 = vpop.f32.mrb[5].mxu0 }
 0xc05   :  { %v4590_v50 = vmul.f32 -1.442695, %v845_v48 }
 0xc07   :  { %5436 = vpow2.f32 %v4590_v50 }
 0xc11   :  { %v5437_v51 = vpop.eup %5436 }
 0xc12   :  { %v849_v52 = vadd.f32 1.0, %v5437_v51 }
 0xc14   :  { %5438 = vrcp.f32 %v849_v52 }
 0xc1e   :  { %v5439_v8 = vpop.eup %5438 }
 0xc1f   :  { %v855_v54 = vmul.f32 %v5439_v8, %v853_v53  ;;  %v862_v60 = vsub.f32 1.0, %v5439_v8  ;;  %v868_v62 = vmul.f32 %v5439_v8, %v6042_v29 }
 0xc21   :  { %857 = vrot.lane.b32.xlu0 %v855_v54, %s5771_s15 }
 0xc93   :  { %v858_v56 = vpop.permute.xlu0 %857 }
 0xc94   :  { %v860_v58 = vadd.f32 %v858_v56, %v838_v47 }
 0xc96   :  { %5440 = vtanh.f32 %v860_v58 }
 0xca0   :  { %v5441_v59 = vpop.eup %5440 }
 0xca1   :  { %864 = vrot.lane.b32.xlu0 %v5441_v59, %s5768_s23 }
 0xd13   :  { %v865_v61 = vpop.permute.xlu0 %864 }
 0xd14   :  { %v867_v63 = vmul.f32 %v865_v61, %v862_v60 }
 0xd16   :  { %v6134_v2 = vadd.f32 %v868_v62, %v867_v63 }
 0xd18   :  { %871 = vrot.lane.b32.xlu0 %v6134_v2, %s5768_s23 }
 0xd8a   :  { %v872_v3 = vpop.permute.xlu0 %871 }
 0xd8b   :  { %4874 = vmatmul.mubr.msk.f32.vlgmr.msra.gmra.mrb[4].mxu1 %vm104_vm1, %v872_v3  ;;  %4885 = vmatmul.mubr.msk.f32.vlgmr.msra.gmra.mrb[6].mxu0 %vm104_vm1, %v872_v3 }
 0xd8c   :  { %5222 = vmatpush3.bf16.msra.mxu1 %v5971_v16  ;;  %4899 = vmatprep.mubr.msk.f32.mxu1 %vm5764_vm0, %v7025_v1 }
 0xd8d   :  { %5223 = vmatprep.subr.bf16.mxu1 %v7023_v0  ;;  %5231 = vmatpush3.bf16.msra.mxu0 %v6030_v6 }
 0xd8e   :  { %5232 = vmatprep.subr.bf16.mxu0 %v7023_v0  ;;  %4910 = vmatprep.mubr.msk.f32.mxu0 %vm5764_vm0, %v7025_v1 }
 0xd90   :  { %5225 = vmatpush3.bf16.msra.mxu1 %v5977_v17 }
 0xd91   :  { %5226 = vmatprep.subr.bf16.mxu1 %v7023_v0  ;;  %5234 = vmatpush3.bf16.msra.mxu0 %v6036_v10 }
 0xd92   :  { %5241 = vmatprep.subr.bf16.mxu0 %v7023_v0 }
 0xd94   :  { %5228 = vmatpush3.bf16.msra.mxu1 %v5987_v22 }
 0xd95   :  { %5235 = vmatprep.subr.bf16.mxu1 %v7023_v0 }
 0xe5e   :  { %v941_v29 = vpop.f32.mrb[4].mxu1  ;;  %v1044_v4 = vpop.f32.mrb[6].mxu0 }
 0xe5f   :  { %v6155_v9 = vadd.f32 %v5905_v14, %v1044_v4  ;;  %v4875_v11 = vpop.f32.mrb[5].mxu1  ;;  %v4886_v19 = vpop.f32.mrb[7].mxu0  ;;  %v6176_v3 = vadd.f32 %v6086_v12, %v941_v29 }
 0xe61   :  { %v1055_v21 = vrot.slane %v6155_v9, %v5908_v15  ;;  %v945_v4 = vsel %vm519_vm7, %v6176_v3, -inf }
 0xe63   :  { %v1056_v27 = vcombine.high %v1055_v21, %v1055_v21  ;;  %v1063_v31 = vrot.slane %v1055_v21, %v5908_v15 }
 0xe65   :  { %v1070_v34 = vrot.slane %v1056_v27, %v5908_v15  ;;  %v1074_v36 = vrot.slane %v1063_v31, %v5916_v20 }
 0xe67   :  { %v1078_v38 = vrot.slane %v1070_v34, %v5916_v20  ;;  %v1081_v33 = vadd.f32 %v1074_v36, %v5919_v23 }
 0xe69   :  { %v1082_v41 = vadd.f32 %v1078_v38, %v5923_v26  ;;  %5442 = vtanh.f32 %v1081_v33 }
 0xe6b   :  { %5444 = vtanh.f32 %v1082_v41 }
 0xe73   :  { %v5443_v42 = vpop.eup %5442 }
 0xe74   :  { %v1085_v43 = vmul.f32 %v5443_v42, %v5931_v30 }
 0xe75   :  { %v5445_v44 = vpop.eup %5444 }
 0xe76   :  { %v1087_v45 = vsel %vm104_vm1, %v1085_v43, 0.0  ;;  %v1086_v35 = vmul.f32 %v5445_v44, %v5931_v30 }
 0xe77   :  { %1088 = vadd.xlane.f32.xlu0 %v1087_v45 }
 0xe78   :  { %v1090_v47 = vsel %vm104_vm1, %v1086_v35, 0.0 }
 0xe79   :  { %1091 = vadd.xlane.f32.xlu1 %v1090_v47 }
 0xf04   :  { %v1089_v48 = vpop.xlane.xlu0 %1088 }
 0xf05   :  { %v1098_v50 = vrot.slane %v1089_v48, %v5941_v39 }
 0xf06   :  { %v1092_v49 = vpop.xlane.xlu1 %1091 }
 0xf07   :  { %v1102_v51 = vrot.slane %v1092_v49, %v5941_v39 }
 0xf09   :  { %v1103_v52 = vsel %vm239_vm2, %v1102_v51, %v1098_v50 }
 0xf0a   :  { %v1105_v8 = vsel %vm242_vm3, %v1103_v52, -inf }
 0xf0b   :  { %1106 = vmax.xlane.f32.xlu1 %v1105_v8 }
 0xf98   :  { %v1107_v53 = vpop.xlane.xlu1 %1106 }
 0xf99   :  { %v1112_v54 = vrot.slane %v1107_v53, %v5916_v20  ;;  %v1116_v56 = vrot.slane %v1107_v53, %v5948_v46 }
 0xf9b   :  { %v1119_v58 = vsub.f32 %v1089_v48, %v1112_v54  ;;  %v1120_v59 = vsub.f32 %v1092_v49, %v1116_v56 }
 0xf9d   :  { %v1121_v60 = vmul.f32 1.442695, %v1119_v58  ;;  %v1123_v61 = vmul.f32 1.442695, %v1120_v59 }
 0xf9f   :  { %5446 = vpow2.f32 %v1121_v60 }
 0xfa0   :  { %5448 = vpow2.f32 %v1123_v61 }
 0xfa9   :  { %v5447_v62 = vpop.eup %5446 }
 0xfaa   :  { %v5449_v63 = vpop.eup %5448  ;;  %1128 = vperm.xlu1 %5404, %v5447_v62  }
 0xfab   :  { %1131 = vperm.xlu0 %5405, %v5449_v63  }
 0xfce   :  { %946 = vmax.xlane.f32.xlu1 %v945_v4 }
0x1029   :  { %v1129_v11 = vpop.permute.xlu1 %1128 }
0x102a   :  { %v1132_v19 = vpop.permute.xlu0 %1131  ;;  %v1136_v21 = vrot.slane %v1129_v11, %v5941_v39 }
0x102b   :  { %v1140_v27 = vrot.slane %v1132_v19, %v5941_v39 }
0x102d   :  { %v1141_v31 = vsel %vm239_vm2, %v1140_v27, %v1136_v21 }
0x102e   :  { %v1143_v34 = vsel %vm242_vm3, %v1141_v31, 0.0 }
0x102f   :  { %1144 = vadd.xlane.f32.xlu0 %v1143_v34 }
0x105b   :  { %v6184_v36 = vpop.xlane.xlu1 %946 }
0x105c   :  { %vm958_vm11 = vcmp.eq.f32.partialorder %v6176_v3, %v6184_v36 }
0x105d   :  { %v959_v29 = vsel %vm958_vm11, %v5937_v37, 16 }
0x105e   :  { %v960_v38 = vsel %vm519_vm7, %v959_v29, 2147483647 }
0x105f   :  { %v962_v33 = vshra.s32 %v960_v38, 16  ;;  %v961_v49 = vand.u32 65535, %v960_v38 }
0x1061   :  { %v964_v41 = vcvt.s32.f32 %v962_v33  ;;  %v963_v51 = vcvt.s32.f32 %v961_v49 }
0x1063   :  { %965 = vmin.xlane.f32.xlu1 %v964_v41 }
0x10bc   :  { %v1145_v42 = vpop.xlane.xlu0 %1144 }
0x10bd   :  { %v1150_v43 = vrot.slane %v1145_v42, %v5916_v20  ;;  %v1154_v44 = vrot.slane %v1145_v42, %v5948_v46 }
0x10bf   :  { %5450 = vrcp.f32 %v1150_v43 }
0x10c0   :  { %5452 = vrcp.f32 %v1154_v44 }
0x10c9   :  { %v5451_v45 = vpop.eup %5450 }
0x10ca   :  { %v5453_v35 = vpop.eup %5452  ;;  %v1158_v47 = vmul.f32 %v5451_v45, %v5447_v62 }
0x10cb   :  { %v1160_v48 = vmul.f32 %v5453_v35, %v5449_v63 }
0x10cc   :  { %1163 = vperm.xlu1 %5404, %v1158_v47  }
0x10cd   :  { %1168 = vperm.xlu0 %5405, %v1160_v48  }
0x10f0   :  { %v966_v50 = vpop.xlane.xlu1 %965 }
0x10f1   :  { %vm967_vm12 = vcmp.eq.f32.partialorder %v964_v41, %v966_v50  ;;  %v972_v41 = vcvt.f32.s32 %v966_v50 }
0x10f2   :  { %v968_v52 = vsel %vm967_vm12, %v963_v51, inf }
0x10f3   :  { %969 = vmin.xlane.f32.xlu1 %v968_v52  ;;  %v973_v43 = vshll.u32 %v972_v41, 16 }
0x114b   :  { %v6192_v8 = vpop.permute.xlu1 %1163 }
0x114c   :  { %7039 = vst [vmem:[#allocation18_spill] sm:$0xff] %v6192_v8  ;;  %v6194_v53 = vpop.permute.xlu0 %1168  ;;  %v1171_v54 = vmul.f32 %v6192_v8, %v5992_v24  ;;  %v6753_v8 = vld [vmem:[#allocation2] sm:$0xff] }
0x114d   :  { %7040 = vst [vmem:[#allocation19_spill] sm:$0xff] %v6194_v53  ;;  %v1172_v56 = vmul.f32 %v6194_v53, %v5998_v28 }
0x114e   :  { %v1173_v58 = vsel %vm104_vm1, %v1171_v54, 0.0 }
0x114f   :  { %v1180_v59 = vsel %vm104_vm1, %v1172_v56, 0.0  ;;  %v1174_v60 = vrot.slane %v1173_v58, 4 }
0x1150   :  { %v1181_v61 = vrot.slane %v1180_v59, 4 }
0x1151   :  { %v1175_v62 = vadd.f32 %v1174_v60, %v1173_v58 }
0x1152   :  { %v1182_v63 = vadd.f32 %v1181_v61, %v1180_v59 }
0x1153   :  { %v1176_v4 = vrot.slane %v1175_v62, 2 }
0x1154   :  { %v1183_v11 = vrot.slane %v1182_v63, 2 }
0x1155   :  { %v1177_v19 = vadd.f32 %v1176_v4, %v1175_v62 }
0x1156   :  { %v1184_v21 = vadd.f32 %v1183_v11, %v1182_v63 }
0x1157   :  { %v1178_v27 = vrot.slane %v1177_v19, 1 }
0x1158   :  { %v1185_v31 = vrot.slane %v1184_v21, 1 }
0x1159   :  { %v1179_v34 = vadd.f32 %v1178_v27, %v1177_v19 }
0x115a   :  { %v1186_v29 = vadd.f32 %v1185_v31, %v1184_v21 }
0x115c   :  { %v1189_v38 = vsel %vm239_vm2, %v1186_v29, %v1179_v34 }
0x115d   :  { %1190 = vrot.lane.b32.xlu0 %v1189_v38, %s5770_s4 }
0x1161   :  { %1267 = vrot.lane.b32.xlu0 %v6155_v9, %s5768_s23 }
0x1165   :  { %1277 = vrot.lane.b32.xlu0 %v6155_v9, %s5769_s24 }
0x1180   :  { %v970_v33 = vpop.xlane.xlu1 %969 }
0x1181   :  { %v971_v42 = vcvt.f32.s32 %v970_v33 }
0x1183   :  { %v974_v44 = vadd.s32 %v973_v43, %v971_v42 }
0x1185   :  { %vm975_vm13 = vcmp.eq.s32.totalorder %v5937_v37, %v974_v44 }
0x1186   :  { %v4592_v35 = vsel %vm975_vm13, 1.0, %v7025_v1 }
0x11cf   :  { %v1191_v45 = vpop.permute.xlu0 %1190 }
0x11d0   :  { %v1193_v47 = vsel %vm331_vm5, %v4592_v35, %v1191_v45 }
0x11d1   :  { %4900 = vmatmul.mubr.msk.f32.vlgmr.msra.gmra.mrb[6].mxu1 %vm333_vm6, %v1193_v47 }
0x11d2   :  { %5237 = vmatpush3.bf16.msra.mxu1 %v5883_v5  ;;  %4921 = vmatprep.mubr.msk.f32.mxu1 %vm5764_vm0, %v7025_v1 }
0x11d3   :  { %5238 = vmatprep.subr.bf16.mxu1 %v7023_v0  ;;  %v1268_v9 = vpop.permute.xlu0 %1267 }
0x11d6   :  { %5240 = vmatpush3.bf16.msra.mxu1 %v5886_v7 }
0x11d7   :  { %5250 = vmatprep.subr.bf16.mxu1 %v7023_v0  ;;  %v1278_v58 = vpop.permute.xlu0 %1277 }
0x12a4   :  { %v1263_v48 = vpop.f32.mrb[6].mxu1 }
0x12a5   :  { %v1270_v49 = vadd.f32 %v1268_v9, %v1263_v48  ;;  %v4901_v50 = vpop.f32.mrb[7].mxu1 }
0x12a7   :  { %v4595_v51 = vmul.f32 -1.442695, %v1270_v49 }
0x12a9   :  { %5454 = vpow2.f32 %v4595_v51 }
0x12b3   :  { %v5455_v52 = vpop.eup %5454 }
0x12b4   :  { %v1274_v54 = vadd.f32 1.0, %v5455_v52 }
0x12b6   :  { %5456 = vrcp.f32 %v1274_v54 }
0x12c0   :  { %v5457_v56 = vpop.eup %5456 }
0x12c1   :  { %v1280_v59 = vmul.f32 %v5457_v56, %v1278_v58  ;;  %v1287_v63 = vsub.f32 1.0, %v5457_v56  ;;  %v1293_v11 = vmul.f32 %v5457_v56, %v6134_v2 }
0x12c3   :  { %1282 = vrot.lane.b32.xlu0 %v1280_v59, %s5771_s15 }
0x1335   :  { %v1283_v60 = vpop.permute.xlu0 %1282 }
0x1336   :  { %v1285_v61 = vadd.f32 %v1283_v60, %v1263_v48 }
0x1338   :  { %5458 = vtanh.f32 %v1285_v61 }
0x1342   :  { %v5459_v62 = vpop.eup %5458 }
0x1343   :  { %1289 = vrot.lane.b32.xlu0 %v5459_v62, %s5768_s23 }
0x13b5   :  { %v1290_v4 = vpop.permute.xlu0 %1289 }
0x13b6   :  { %v1292_v19 = vmul.f32 %v1290_v4, %v1287_v63 }
0x13b8   :  { %v6221_v21 = vadd.f32 %v1293_v11, %v1292_v19 }
0x13ba   :  { %1296 = vrot.lane.b32.xlu0 %v6221_v21, %s5768_s23 }
0x142c   :  { %v1297_v27 = vpop.permute.xlu0 %1296 }
0x142d   :  { %4911 = vmatmul.mubr.msk.f32.vlgmr.msra.gmra.mrb[8].mxu0 %vm104_vm1, %v1297_v27  ;;  %4922 = vmatmul.mubr.msk.f32.vlgmr.msra.gmra.mrb[8].mxu1 %vm104_vm1, %v1297_v27 }
0x142e   :  { %5243 = vmatpush3.bf16.msra.mxu0 %v5971_v16  ;;  %4936 = vmatprep.mubr.msk.f32.mxu0 %vm5764_vm0, %v7025_v1 }
0x142f   :  { %5244 = vmatprep.subr.bf16.mxu0 %v7023_v0  ;;  %5252 = vmatpush3.bf16.msra.mxu1 %v6030_v6 }
0x1430   :  { %5253 = vmatprep.subr.bf16.mxu1 %v7023_v0  ;;  %4947 = vmatprep.mubr.msk.f32.mxu1 %vm5764_vm0, %v7025_v1 }
0x1432   :  { %5246 = vmatpush3.bf16.msra.mxu0 %v5977_v17 }
0x1433   :  { %5247 = vmatprep.subr.bf16.mxu0 %v7023_v0  ;;  %5255 = vmatpush3.bf16.msra.mxu1 %v6036_v10 }
0x1434   :  { %5262 = vmatprep.subr.bf16.mxu1 %v7023_v0 }
0x1436   :  { %5249 = vmatpush3.bf16.msra.mxu0 %v5987_v22 }
0x1437   :  { %5256 = vmatprep.subr.bf16.mxu0 %v7023_v0 }
0x1500   :  { %v1366_v2 = vpop.f32.mrb[8].mxu0  ;;  %v1469_v31 = vpop.f32.mrb[8].mxu1 }
0x1501   :  { %v6242_v34 = vadd.f32 %v5905_v14, %v1469_v31  ;;  %v4912_v29 = vpop.f32.mrb[9].mxu0  ;;  %v4923_v38 = vpop.f32.mrb[9].mxu1  ;;  %v6263_v27 = vadd.f32 %v6086_v12, %v1366_v2 }
0x1503   :  { %v1480_v33 = vrot.slane %v6242_v34, %v5908_v15  ;;  %v1370_v31 = vsel %vm519_vm7, %v6263_v27, -inf }
0x1505   :  { %v1481_v41 = vcombine.high %v1480_v33, %v1480_v33  ;;  %v1488_v42 = vrot.slane %v1480_v33, %v5908_v15 }
0x1507   :  { %v1495_v43 = vrot.slane %v1481_v41, %v5908_v15  ;;  %v1499_v44 = vrot.slane %v1488_v42, %v5916_v20 }
0x1509   :  { %v1503_v45 = vrot.slane %v1495_v43, %v5916_v20  ;;  %v1506_v35 = vadd.f32 %v1499_v44, %v5919_v23 }
0x150b   :  { %v1507_v47 = vadd.f32 %v1503_v45, %v5923_v26  ;;  %5460 = vtanh.f32 %v1506_v35 }
0x150d   :  { %5462 = vtanh.f32 %v1507_v47 }
0x1515   :  { %v5461_v14 = vpop.eup %5460 }
0x1516   :  { %v1510_v9 = vmul.f32 %v5461_v14, %v5931_v30 }
0x1517   :  { %v5463_v48 = vpop.eup %5462 }
0x1518   :  { %v1512_v49 = vsel %vm104_vm1, %v1510_v9, 0.0  ;;  %v1511_v50 = vmul.f32 %v5463_v48, %v5931_v30 }
0x1519   :  { %1513 = vadd.xlane.f32.xlu1 %v1512_v49 }
0x151a   :  { %v1515_v51 = vsel %vm104_vm1, %v1511_v50, 0.0 }
0x151b   :  { %1516 = vadd.xlane.f32.xlu0 %v1515_v51 }
0x15a6   :  { %v1514_v52 = vpop.xlane.xlu1 %1513 }
0x15a7   :  { %v1523_v23 = vrot.slane %v1514_v52, %v5941_v39 }
0x15a8   :  { %v1517_v54 = vpop.xlane.xlu0 %1516 }
0x15a9   :  { %v1527_v26 = vrot.slane %v1517_v54, %v5941_v39 }
0x15ab   :  { %v1528_v56 = vsel %vm239_vm2, %v1527_v26, %v1523_v23 }
0x15ac   :  { %v1530_v58 = vsel %vm242_vm3, %v1528_v56, -inf }
0x15ad   :  { %1531 = vmax.xlane.f32.xlu1 %v1530_v58 }
0x163a   :  { %v1532_v59 = vpop.xlane.xlu1 %1531 }
0x163b   :  { %v1537_v60 = vrot.slane %v1532_v59, %v5916_v20  ;;  %v1541_v30 = vrot.slane %v1532_v59, %v5948_v46 }
0x163d   :  { %v1544_v61 = vsub.f32 %v1514_v52, %v1537_v60  ;;  %v1545_v62 = vsub.f32 %v1517_v54, %v1541_v30 }
0x163f   :  { %v1546_v63 = vmul.f32 1.442695, %v1544_v61  ;;  %v1548_v4 = vmul.f32 1.442695, %v1545_v62 }
0x1641   :  { %5464 = vpow2.f32 %v1546_v63 }
0x1642   :  { %5466 = vpow2.f32 %v1548_v4 }
0x164b   :  { %v5465_v11 = vpop.eup %5464 }
0x164c   :  { %1553 = vperm.xlu1 %5404, %v5465_v11   ;;  %v5467_v19 = vpop.eup %5466 }
0x1650   :  { %1556 = vperm.xlu1 %5404, %v5467_v19  }
0x1674   :  { %1371 = vmax.xlane.f32.xlu1 %v1370_v31 }
0x16cb   :  { %v1554_v29 = vpop.permute.xlu1 %1553 }
0x16cc   :  { %v1561_v33 = vrot.slane %v1554_v29, %v5941_v39 }
0x16cf   :  { %v1557_v38 = vpop.permute.xlu1 %1556 }
0x16d0   :  { %v1565_v41 = vrot.slane %v1557_v38, %v5941_v39 }
0x16d2   :  { %v1566_v42 = vsel %vm239_vm2, %v1565_v41, %v1561_v33 }
0x16d3   :  { %v1568_v43 = vsel %vm242_vm3, %v1566_v42, 0.0 }
0x16d4   :  { %1569 = vadd.xlane.f32.xlu0 %v1568_v43 }
0x1701   :  { %v6271_v44 = vpop.xlane.xlu1 %1371 }
0x1702   :  { %vm1383_vm14 = vcmp.eq.f32.partialorder %v6263_v27, %v6271_v44 }
0x1703   :  { %v1384_v2 = vsel %vm1383_vm14, %v5937_v37, 16 }
0x1704   :  { %v1385_v45 = vsel %vm519_vm7, %v1384_v2, 2147483647 }
0x1705   :  { %v1387_v35 = vshra.s32 %v1385_v45, 16  ;;  %v1386_v54 = vand.u32 65535, %v1385_v45 }
0x1707   :  { %v1389_v47 = vcvt.s32.f32 %v1387_v35  ;;  %v1388_v26 = vcvt.s32.f32 %v1386_v54 }
0x1709   :  { %1390 = vmin.xlane.f32.xlu0 %v1389_v47 }
0x1761   :  { %v1570_v14 = vpop.xlane.xlu0 %1569 }
0x1762   :  { %v1575_v9 = vrot.slane %v1570_v14, %v5916_v20  ;;  %v1579_v48 = vrot.slane %v1570_v14, %v5948_v46 }
0x1764   :  { %5468 = vrcp.f32 %v1575_v9 }
0x1765   :  { %5470 = vrcp.f32 %v1579_v48 }
0x176e   :  { %v5469_v49 = vpop.eup %5468 }
0x176f   :  { %v1583_v50 = vmul.f32 %v5469_v49, %v5465_v11  ;;  %v5471_v51 = vpop.eup %5470 }
0x1770   :  { %v1585_v52 = vmul.f32 %v5471_v51, %v5467_v19 }
0x1771   :  { %1588 = vperm.xlu0 %5405, %v1583_v50  }
0x1775   :  { %1593 = vperm.xlu0 %5405, %v1585_v52  }
0x1796   :  { %v1391_v23 = vpop.xlane.xlu0 %1390 }
0x1797   :  { %vm1392_vm15 = vcmp.eq.f32.partialorder %v1389_v47, %v1391_v23  ;;  %v1397_v45 = vcvt.f32.s32 %v1391_v23 }
0x1798   :  { %v1393_v56 = vsel %vm1392_vm15, %v1388_v26, inf }
0x1799   :  { %1394 = vmin.xlane.f32.xlu1 %v1393_v56  ;;  %v1398_v47 = vshll.u32 %v1397_v45, 16 }
0x17aa   :  { %1692 = vrot.lane.b32.xlu1 %v6242_v34, %s5768_s23 }
0x17f0   :  { %v6281_v58 = vpop.permute.xlu0 %1588 }
0x17f1   :  { %7041 = vst [vmem:[#allocation20_spill] sm:$0xff] %v6281_v58  ;;  %v1596_v59 = vmul.f32 %v6281_v58, %v5992_v24 }
0x17f3   :  { %v1598_v60 = vsel %vm104_vm1, %v1596_v59, 0.0 }
0x17f4   :  { %v1599_v30 = vrot.slane %v1598_v60, 4  ;;  %v6286_v61 = vpop.permute.xlu0 %1593 }
0x17f5   :  { %7042 = vst [vmem:[#allocation21_spill] sm:$0xff] %v6286_v61  ;;  %v1597_v62 = vmul.f32 %v6286_v61, %v5998_v28 }
0x17f6   :  { %v1600_v63 = vadd.f32 %v1599_v30, %v1598_v60 }
0x17f7   :  { %v1605_v4 = vsel %vm104_vm1, %v1597_v62, 0.0 }
0x17f8   :  { %v1601_v11 = vrot.slane %v1600_v63, 2  ;;  %v1606_v19 = vrot.slane %v1605_v4, 4 }
0x17fa   :  { %v1607_v31 = vadd.f32 %v1606_v19, %v1605_v4  ;;  %v1602_v29 = vadd.f32 %v1601_v11, %v1600_v63 }
0x17fc   :  { %v1608_v38 = vrot.slane %v1607_v31, 2  ;;  %v1603_v33 = vrot.slane %v1602_v29, 1 }
0x17fe   :  { %v1609_v41 = vadd.f32 %v1608_v38, %v1607_v31  ;;  %v1604_v24 = vadd.f32 %v1603_v33, %v1602_v29 }
0x1800   :  { %v1610_v42 = vrot.slane %v1609_v41, 1 }
0x1802   :  { %v1611_v43 = vadd.f32 %v1610_v42, %v1609_v41  ;;  %v6331_v41 = vld [vmem:[%s7020_s6] ss:$0 sm:$0xff] }
0x1804   :  { %v1614_v2 = vsel %vm239_vm2, %v1611_v43, %v1604_v24 }
0x1805   :  { %1615 = vrot.lane.b32.xlu0 %v1614_v2, %s5770_s4 }
0x1809   :  { %1702 = vrot.lane.b32.xlu0 %v6242_v34, %s5769_s24 }
0x1826   :  { %v1395_v28 = vpop.xlane.xlu1 %1394 }
0x1827   :  { %v1396_v35 = vcvt.f32.s32 %v1395_v28 }
0x1829   :  { %v1399_v14 = vadd.s32 %v1398_v47, %v1396_v35 }
0x182a   :  { %v1693_v34 = vpop.permute.xlu1 %1692 }
0x182b   :  { %vm1400_vm4 = vcmp.eq.s32.totalorder %v5937_v37, %v1399_v14 }
0x182c   :  { %v4597_v48 = vsel %vm1400_vm4, 1.0, %v7025_v1 }
0x1877   :  { %v1616_v9 = vpop.permute.xlu0 %1615 }
0x1878   :  { %v1618_v49 = vsel %vm331_vm5, %v4597_v48, %v1616_v9  ;;  %v6342_v9 = vld [vmem:[#allocation5] sm:$0xff] }
0x1879   :  { %4937 = vmatmul.mubr.msk.f32.vlgmr.msra.gmra.mrb[10].mxu0 %vm333_vm6, %v1618_v49  ;;  %v6345_v49 = vld [vmem:[#allocation5 + $0x8] sm:$0xff] }
0x187a   :  { %5258 = vmatpush3.bf16.msra.mxu0 %v5883_v5  ;;  %4958 = vmatprep.mubr.msk.f32.mxu0 %vm5764_vm0, %v7025_v1 }
0x187b   :  { %5259 = vmatprep.subr.bf16.mxu0 %v7023_v0  ;;  %v1703_v59 = vpop.permute.xlu0 %1702 }
0x187e   :  { %5261 = vmatpush3.bf16.msra.mxu0 %v5886_v7 }
0x187f   :  { %5271 = vmatprep.subr.bf16.mxu0 %v7023_v0 }
0x194c   :  { %v1688_v50 = vpop.f32.mrb[10].mxu0 }
0x194d   :  { %v1695_v51 = vadd.f32 %v1693_v34, %v1688_v50  ;;  %v4938_v52 = vpop.f32.mrb[11].mxu0 }
0x194f   :  { %v4600_v54 = vmul.f32 -1.442695, %v1695_v51  ;;  %v6351_v51 = vld [vmem:[%s7020_s6 + $0x2] ss:$0 sm:$0xff] }
0x1951   :  { %5472 = vpow2.f32 %v4600_v54 }
0x195b   :  { %v5473_v23 = vpop.eup %5472 }
0x195c   :  { %v1699_v26 = vadd.f32 1.0, %v5473_v23 }
0x195e   :  { %5474 = vrcp.f32 %v1699_v26 }
0x1968   :  { %v5475_v56 = vpop.eup %5474 }
0x1969   :  { %v1705_v60 = vmul.f32 %v5475_v56, %v1703_v59  ;;  %v1712_v4 = vsub.f32 1.0, %v5475_v56  ;;  %v1718_v19 = vmul.f32 %v5475_v56, %v6221_v21 }
0x196b   :  { %1707 = vrot.lane.b32.xlu0 %v1705_v60, %s5771_s15 }
0x19dd   :  { %v1708_v30 = vpop.permute.xlu0 %1707 }
0x19de   :  { %v1710_v62 = vadd.f32 %v1708_v30, %v1688_v50 }
0x19e0   :  { %5476 = vtanh.f32 %v1710_v62 }
0x19ea   :  { %v5477_v63 = vpop.eup %5476 }
0x19eb   :  { %1714 = vrot.lane.b32.xlu0 %v5477_v63, %s5768_s23 }
0x1a5d   :  { %v1715_v11 = vpop.permute.xlu0 %1714 }
0x1a5e   :  { %v1717_v31 = vmul.f32 %v1715_v11, %v1712_v4 }
0x1a60   :  { %v6308_v29 = vadd.f32 %v1718_v19, %v1717_v31 }
0x1a62   :  { %1721 = vrot.lane.b32.xlu0 %v6308_v29, %s5768_s23 }
0x1ad4   :  { %v1722_v38 = vpop.permute.xlu0 %1721 }
0x1ad5   :  { %4948 = vmatmul.mubr.msk.f32.vlgmr.msra.gmra.mrb[10].mxu1 %vm104_vm1, %v1722_v38  ;;  %4959 = vmatmul.mubr.msk.f32.vlgmr.msra.gmra.mrb[12].mxu0 %vm104_vm1, %v1722_v38 }
0x1ad6   :  { %5264 = vmatpush3.bf16.msra.mxu1 %v5971_v16  ;;  %4973 = vmatprep.mubr.msk.f32.mxu1 %vm5764_vm0, %v7025_v1 }
0x1ad7   :  { %5265 = vmatprep.subr.bf16.mxu1 %v7023_v0  ;;  %5273 = vmatpush3.bf16.msra.mxu0 %v6030_v6 }
0x1ad8   :  { %5274 = vmatprep.subr.bf16.mxu0 %v7023_v0  ;;  %4984 = vmatprep.mubr.msk.f32.mxu0 %vm5764_vm0, %v7025_v1 }
0x1ada   :  { %5267 = vmatpush3.bf16.msra.mxu1 %v5977_v17 }
0x1adb   :  { %5268 = vmatprep.subr.bf16.mxu1 %v7023_v0  ;;  %5276 = vmatpush3.bf16.msra.mxu0 %v6036_v10 }
0x1adc   :  { %5283 = vmatprep.subr.bf16.mxu0 %v7023_v0 }
0x1ade   :  { %5270 = vmatpush3.bf16.msra.mxu1 %v5987_v22 }
0x1adf   :  { %5277 = vmatprep.subr.bf16.mxu1 %v7023_v0 }
0x1ba8   :  { %v1791_v21 = vpop.f32.mrb[10].mxu1  ;;  %v1894_v33 = vpop.f32.mrb[12].mxu0 }
0x1ba9   :  { %v6334_v42 = vadd.f32 %v6331_v41, %v1894_v33  ;;  %v4949_v24 = vpop.f32.mrb[11].mxu1  ;;  %v4960_v43 = vpop.f32.mrb[13].mxu0 }
0x1bab   :  { %v1905_v2 = vrot.slane %v6334_v42, %v5908_v15 }
0x1bad   :  { %v1906_v28 = vcombine.high %v1905_v2, %v1905_v2  ;;  %v1913_v45 = vrot.slane %v1905_v2, %v5908_v15 }
0x1baf   :  { %v1920_v35 = vrot.slane %v1906_v28, %v5908_v15  ;;  %v1924_v47 = vrot.slane %v1913_v45, %v5916_v20  ;;  %v6364_v45 = vadd.f32 %v6086_v12, %v1791_v21 }
0x1bb1   :  { %v1928_v14 = vrot.slane %v1920_v35, %v5916_v20  ;;  %v1931_v48 = vadd.f32 %v6342_v9, %v1924_v47  ;;  %v1795_v35 = vsel %vm519_vm7, %v6364_v45, -inf }
0x1bb3   :  { %v1932_v34 = vadd.f32 %v6345_v49, %v1928_v14  ;;  %5478 = vtanh.f32 %v1931_v48 }
0x1bb5   :  { %5480 = vtanh.f32 %v1932_v34 }
0x1bbd   :  { %v5479_v50 = vpop.eup %5478 }
0x1bbe   :  { %v1935_v52 = vmul.f32 %v6351_v51, %v5479_v50 }
0x1bbf   :  { %v5481_v54 = vpop.eup %5480 }
0x1bc0   :  { %v1937_v23 = vsel %vm104_vm1, %v1935_v52, 0.0  ;;  %v1936_v26 = vmul.f32 %v6351_v51, %v5481_v54 }
0x1bc1   :  { %1938 = vadd.xlane.f32.xlu1 %v1937_v23 }
0x1bc2   :  { %v1940_v56 = vsel %vm104_vm1, %v1936_v26, 0.0 }
0x1bc3   :  { %1941 = vadd.xlane.f32.xlu0 %v1940_v56 }
0x1c4e   :  { %v1939_v59 = vpop.xlane.xlu1 %1938 }
0x1c4f   :  { %v1948_v30 = vrot.slane %v1939_v59, %v5941_v39 }
0x1c50   :  { %v1942_v60 = vpop.xlane.xlu0 %1941 }
0x1c51   :  { %v1952_v62 = vrot.slane %v1942_v60, %v5941_v39 }
0x1c53   :  { %v1953_v63 = vsel %vm239_vm2, %v1952_v62, %v1948_v30 }
0x1c54   :  { %v1955_v4 = vsel %vm242_vm3, %v1953_v63, -inf }
0x1c55   :  { %1956 = vmax.xlane.f32.xlu0 %v1955_v4 }
0x1ce2   :  { %v1957_v11 = vpop.xlane.xlu0 %1956 }
0x1ce3   :  { %v1962_v19 = vrot.slane %v1957_v11, %v5916_v20  ;;  %v1966_v31 = vrot.slane %v1957_v11, %v5948_v46 }
0x1ce5   :  { %v1969_v38 = vsub.f32 %v1939_v59, %v1962_v19  ;;  %v1970_v33 = vsub.f32 %v1942_v60, %v1966_v31 }
0x1ce7   :  { %v1971_v24 = vmul.f32 1.442695, %v1969_v38  ;;  %v1973_v43 = vmul.f32 1.442695, %v1970_v33 }
0x1ce9   :  { %5482 = vpow2.f32 %v1971_v24  ;;  %v6382_v24 = vld [vmem:[#allocation2] sm:$0xff] }
0x1cea   :  { %5484 = vpow2.f32 %v1973_v43 }
0x1cf3   :  { %v5483_v2 = vpop.eup %5482 }
0x1cf4   :  { %v5485_v28 = vpop.eup %5484  ;;  %1978 = vperm.xlu0 %5405, %v5483_v2  }
0x1cf5   :  { %1981 = vperm.xlu1 %5404, %v5485_v28  }
0x1d19   :  { %1796 = vmax.xlane.f32.xlu1 %v1795_v35 }
0x1d73   :  { %v1979_v47 = vpop.permute.xlu0 %1978 }
0x1d74   :  { %v1982_v14 = vpop.permute.xlu1 %1981  ;;  %v1986_v48 = vrot.slane %v1979_v47, %v5941_v39  ;;  %v6388_v47 = vld [vmem:[#allocation2 + $0x8] sm:$0xff] }
0x1d75   :  { %v1990_v34 = vrot.slane %v1982_v14, %v5941_v39 }
0x1d77   :  { %v1991_v50 = vsel %vm239_vm2, %v1990_v34, %v1986_v48 }
0x1d78   :  { %v1993_v52 = vsel %vm242_vm3, %v1991_v50, 0.0 }
0x1d79   :  { %1994 = vadd.xlane.f32.xlu0 %v1993_v52 }
0x1da6   :  { %v6372_v54 = vpop.xlane.xlu1 %1796 }
0x1da7   :  { %vm1808_vm8 = vcmp.eq.f32.partialorder %v6364_v45, %v6372_v54 }
0x1da8   :  { %v1809_v12 = vsel %vm1808_vm8, %v5937_v37, 16 }
0x1da9   :  { %v1810_v21 = vsel %vm519_vm7, %v1809_v12, 2147483647 }
0x1daa   :  { %v1812_v23 = vshra.s32 %v1810_v21, 16  ;;  %v1811_v11 = vand.u32 65535, %v1810_v21 }
0x1dac   :  { %v1814_v26 = vcvt.s32.f32 %v1812_v23  ;;  %v1813_v31 = vcvt.s32.f32 %v1811_v11 }
0x1dae   :  { %1815 = vmin.xlane.f32.xlu0 %v1814_v26 }
0x1e06   :  { %v1995_v56 = vpop.xlane.xlu0 %1994 }
0x1e07   :  { %v2000_v59 = vrot.slane %v1995_v56, %v5916_v20  ;;  %v2004_v60 = vrot.slane %v1995_v56, %v5948_v46 }
0x1e09   :  { %5486 = vrcp.f32 %v2000_v59 }
0x1e0a   :  { %5488 = vrcp.f32 %v2004_v60 }
0x1e13   :  { %v5487_v30 = vpop.eup %5486 }
0x1e14   :  { %v5489_v62 = vpop.eup %5488  ;;  %v2008_v63 = vmul.f32 %v5487_v30, %v5483_v2 }
0x1e15   :  { %v2010_v4 = vmul.f32 %v5489_v62, %v5485_v28 }
0x1e16   :  { %2013 = vperm.xlu1 %5404, %v2008_v63  }
0x1e17   :  { %2018 = vperm.xlu0 %5405, %v2010_v4  }
0x1e3b   :  { %v1816_v19 = vpop.xlane.xlu0 %1815 }
0x1e3c   :  { %vm1817_vm9 = vcmp.eq.f32.partialorder %v1814_v26, %v1816_v19  ;;  %v1822_v4 = vcvt.f32.s32 %v1816_v19 }
0x1e3d   :  { %v1818_v38 = vsel %vm1817_vm9, %v1813_v31, inf }
0x1e3e   :  { %1819 = vmin.xlane.f32.xlu1 %v1818_v38  ;;  %v1823_v31 = vshll.u32 %v1822_v4, 16 }
0x1e95   :  { %v6380_v33 = vpop.permute.xlu1 %2013 }
0x1e96   :  { %7043 = vst [vmem:[#allocation22_spill] sm:$0xff] %v6380_v33  ;;  %v2021_v43 = vmul.f32 %v6382_v24, %v6380_v33  ;;  %v6386_v35 = vpop.permute.xlu0 %2018 }
0x1e97   :  { %7044 = vst [vmem:[#allocation23_spill] sm:$0xff] %v6386_v35  ;;  %v2022_v2 = vmul.f32 %v6388_v47, %v6386_v35 }
0x1e98   :  { %v2023_v28 = vsel %vm104_vm1, %v2021_v43, 0.0 }
0x1e99   :  { %v2024_v14 = vrot.slane %v2023_v28, 4  ;;  %v2030_v48 = vsel %vm104_vm1, %v2022_v2, 0.0 }
0x1e9a   :  { %v2031_v34 = vrot.slane %v2030_v48, 4 }
0x1e9b   :  { %v2025_v50 = vadd.f32 %v2024_v14, %v2023_v28 }
0x1e9c   :  { %v2032_v52 = vadd.f32 %v2031_v34, %v2030_v48 }
0x1e9d   :  { %v2026_v12 = vrot.slane %v2025_v50, 2 }
0x1e9e   :  { %v2033_v21 = vrot.slane %v2032_v52, 2 }
0x1e9f   :  { %v2027_v23 = vadd.f32 %v2026_v12, %v2025_v50 }
0x1ea0   :  { %v2034_v26 = vadd.f32 %v2033_v21, %v2032_v52 }
0x1ea1   :  { %v2028_v56 = vrot.slane %v2027_v23, 1 }
0x1ea2   :  { %v2035_v59 = vrot.slane %v2034_v26, 1 }
0x1ea3   :  { %v2029_v60 = vadd.f32 %v2028_v56, %v2027_v23 }
0x1ea4   :  { %v2036_v30 = vadd.f32 %v2035_v59, %v2034_v26 }
0x1ea6   :  { %v2039_v62 = vsel %vm239_vm2, %v2036_v30, %v2029_v60 }
0x1ea7   :  { %2040 = vrot.lane.b32.xlu0 %v2039_v62, %s5770_s4 }
0x1eab   :  { %2117 = vrot.lane.b32.xlu0 %v6334_v42, %s5768_s23 }
0x1eaf   :  { %2127 = vrot.lane.b32.xlu0 %v6334_v42, %s5769_s24 }
0x1ecb   :  { %v1820_v63 = vpop.xlane.xlu1 %1819 }
0x1ecc   :  { %v1821_v11 = vcvt.f32.s32 %v1820_v63 }
0x1ece   :  { %v1824_v38 = vadd.s32 %v1823_v31, %v1821_v11 }
0x1ed0   :  { %vm1825_vm10 = vcmp.eq.s32.totalorder %v5937_v37, %v1824_v38 }
0x1ed1   :  { %v4602_v43 = vsel %vm1825_vm10, 1.0, %v7025_v1 }
0x1f19   :  { %v2041_v2 = vpop.permute.xlu0 %2040 }
0x1f1a   :  { %v2043_v28 = vsel %vm331_vm5, %v4602_v43, %v2041_v2 }
0x1f1b   :  { %4974 = vmatmul.mubr.msk.f32.vlgmr.msra.gmra.mrb[12].mxu1 %vm333_vm6, %v2043_v28 }
0x1f1c   :  { %5279 = vmatpush3.bf16.msra.mxu1 %v5883_v5  ;;  %4995 = vmatprep.mubr.msk.f32.mxu1 %vm5764_vm0, %v7025_v1 }
0x1f1d   :  { %5280 = vmatprep.subr.bf16.mxu1 %v7023_v0  ;;  %v2118_v42 = vpop.permute.xlu0 %2117 }
0x1f20   :  { %5282 = vmatpush3.bf16.msra.mxu1 %v5886_v7 }
0x1f21   :  { %5292 = vmatprep.subr.bf16.mxu1 %v7023_v0  ;;  %v2128_v21 = vpop.permute.xlu0 %2127 }
0x1fee   :  { %v2113_v19 = vpop.f32.mrb[12].mxu1 }
0x1fef   :  { %v2120_v14 = vadd.f32 %v2118_v42, %v2113_v19  ;;  %v4975_v48 = vpop.f32.mrb[13].mxu1 }
0x1ff1   :  { %v4605_v34 = vmul.f32 -1.442695, %v2120_v14 }
0x1ff3   :  { %5490 = vpow2.f32 %v4605_v34 }
0x1ffd   :  { %v5491_v50 = vpop.eup %5490 }
0x1ffe   :  { %v2124_v52 = vadd.f32 1.0, %v5491_v50 }
0x2000   :  { %5492 = vrcp.f32 %v2124_v52 }
0x200a   :  { %v5493_v12 = vpop.eup %5492 }
0x200b   :  { %v2130_v23 = vmul.f32 %v5493_v12, %v2128_v21  ;;  %v2137_v60 = vsub.f32 1.0, %v5493_v12  ;;  %v2143_v62 = vmul.f32 %v5493_v12, %v6308_v29 }
0x200d   :  { %2132 = vrot.lane.b32.xlu0 %v2130_v23, %s5771_s15 }
0x207f   :  { %v2133_v26 = vpop.permute.xlu0 %2132 }
0x2080   :  { %v2135_v56 = vadd.f32 %v2133_v26, %v2113_v19  ;;  %v6448_v26 = vld [vmem:[%s7020_s6 + $0x1] ss:$0 sm:$0xff] }
0x2082   :  { %5494 = vtanh.f32 %v2135_v56 }
0x208c   :  { %v5495_v59 = vpop.eup %5494 }
0x208d   :  { %2139 = vrot.lane.b32.xlu0 %v5495_v59, %s5768_s23 }
0x20ff   :  { %v2140_v30 = vpop.permute.xlu0 %2139 }
0x2100   :  { %v2142_v63 = vmul.f32 %v2140_v30, %v2137_v60 }
0x2102   :  { %v6413_v4 = vadd.f32 %v2143_v62, %v2142_v63 }
0x2104   :  { %2146 = vrot.lane.b32.xlu0 %v6413_v4, %s5768_s23 }
0x2176   :  { %v2147_v11 = vpop.permute.xlu0 %2146 }
0x2177   :  { %4985 = vmatmul.mubr.msk.f32.vlgmr.msra.gmra.mrb[14].mxu0 %vm104_vm1, %v2147_v11  ;;  %4996 = vmatmul.mubr.msk.f32.vlgmr.msra.gmra.mrb[14].mxu1 %vm104_vm1, %v2147_v11 }
0x2178   :  { %5285 = vmatpush3.bf16.msra.mxu0 %v5971_v16  ;;  %5010 = vmatprep.mubr.msk.f32.mxu0 %vm5764_vm0, %v7025_v1 }
0x2179   :  { %5286 = vmatprep.subr.bf16.mxu0 %v7023_v0  ;;  %5294 = vmatpush3.bf16.msra.mxu1 %v6030_v6 }
0x217a   :  { %5295 = vmatprep.subr.bf16.mxu1 %v7023_v0  ;;  %5021 = vmatprep.mubr.msk.f32.mxu1 %vm5764_vm0, %v7025_v1 }
0x217c   :  { %5288 = vmatpush3.bf16.msra.mxu0 %v5977_v17 }
0x217d   :  { %5289 = vmatprep.subr.bf16.mxu0 %v7023_v0  ;;  %5297 = vmatpush3.bf16.msra.mxu1 %v6036_v10 }
0x217e   :  { %5304 = vmatprep.subr.bf16.mxu1 %v7023_v0 }
0x2180   :  { %5291 = vmatpush3.bf16.msra.mxu0 %v5987_v22 }
0x2181   :  { %5298 = vmatprep.subr.bf16.mxu0 %v7023_v0 }
0x224a   :  { %v2216_v29 = vpop.f32.mrb[14].mxu0  ;;  %v2319_v31 = vpop.f32.mrb[14].mxu1 }
0x224b   :  { %v6434_v38 = vadd.f32 %v6331_v41, %v2319_v31  ;;  %v4986_v43 = vpop.f32.mrb[15].mxu0  ;;  %v4997_v2 = vpop.f32.mrb[15].mxu1  ;;  %v6451_v56 = vadd.f32 %v6448_v26, %v2216_v29 }
0x224d   :  { %v2330_v28 = vrot.slane %v6434_v38, %v5908_v15  ;;  %v2220_v62 = vsel %vm519_vm7, %v6451_v56, -inf }
0x224f   :  { %v2331_v42 = vcombine.high %v2330_v28, %v2330_v28  ;;  %v2338_v19 = vrot.slane %v2330_v28, %v5908_v15 }
0x2251   :  { %v2345_v14 = vrot.slane %v2331_v42, %v5908_v15  ;;  %v2349_v48 = vrot.slane %v2338_v19, %v5916_v20 }
0x2253   :  { %v2353_v34 = vrot.slane %v2345_v14, %v5916_v20  ;;  %v2356_v50 = vadd.f32 %v6342_v9, %v2349_v48 }
0x2255   :  { %v2357_v52 = vadd.f32 %v6345_v49, %v2353_v34  ;;  %5496 = vtanh.f32 %v2356_v50 }
0x2257   :  { %5498 = vtanh.f32 %v2357_v52 }
0x225f   :  { %v5497_v12 = vpop.eup %5496 }
0x2260   :  { %v2360_v21 = vmul.f32 %v6351_v51, %v5497_v12 }
0x2261   :  { %v5499_v23 = vpop.eup %5498 }
0x2262   :  { %v2362_v59 = vsel %vm104_vm1, %v2360_v21, 0.0  ;;  %v2361_v60 = vmul.f32 %v6351_v51, %v5499_v23 }
0x2263   :  { %2363 = vadd.xlane.f32.xlu0 %v2362_v59 }
0x2264   :  { %v2365_v30 = vsel %vm104_vm1, %v2361_v60, 0.0 }
0x2265   :  { %2366 = vadd.xlane.f32.xlu1 %v2365_v30 }
0x2267   :  { %2221 = vmax.xlane.f32.xlu0 %v2220_v62 }
0x22f0   :  { %v2364_v63 = vpop.xlane.xlu0 %2363 }
0x22f1   :  { %v2373_v31 = vrot.slane %v2364_v63, %v5941_v39 }
0x22f2   :  { %v2367_v11 = vpop.xlane.xlu1 %2366 }
0x22f3   :  { %v2377_v43 = vrot.slane %v2367_v11, %v5941_v39 }
0x22f4   :  { %v6460_v29 = vpop.xlane.xlu0 %2221 }
0x22f5   :  { %vm2233_vm11 = vcmp.eq.f32.partialorder %v6451_v56, %v6460_v29  ;;  %v2378_v2 = vsel %vm239_vm2, %v2377_v43, %v2373_v31 }
0x22f6   :  { %v2234_v28 = vsel %vm2233_vm11, %v5937_v37, 16  ;;  %v2380_v42 = vsel %vm242_vm3, %v2378_v2, -inf }
0x22f7   :  { %2381 = vmax.xlane.f32.xlu1 %v2380_v42  ;;  %v2235_v19 = vsel %vm519_vm7, %v2234_v28, 2147483647 }
0x22f8   :  { %v2237_v14 = vshra.s32 %v2235_v19, 16 }
0x22fa   :  { %v2239_v48 = vcvt.s32.f32 %v2237_v14 }
0x22fc   :  { %2240 = vmin.xlane.f32.xlu0 %v2239_v48 }
0x2384   :  { %v2382_v34 = vpop.xlane.xlu1 %2381 }
0x2385   :  { %v2387_v50 = vrot.slane %v2382_v34, %v5916_v20  ;;  %v2391_v52 = vrot.slane %v2382_v34, %v5948_v46 }
0x2387   :  { %v2394_v12 = vsub.f32 %v2364_v63, %v2387_v50  ;;  %v2395_v21 = vsub.f32 %v2367_v11, %v2391_v52 }
0x2389   :  { %v2396_v23 = vmul.f32 1.442695, %v2394_v12  ;;  %v2398_v59 = vmul.f32 1.442695, %v2395_v21  ;;  %v2241_v21 = vpop.xlane.xlu0 %2240 }
0x238a   :  { %vm2242_vm12 = vcmp.eq.f32.partialorder %v2239_v48, %v2241_v21 }
0x238b   :  { %5500 = vpow2.f32 %v2396_v23  ;;  %v2236_v23 = vand.u32 65535, %v2235_v19 }
0x238c   :  { %5502 = vpow2.f32 %v2398_v59 }
0x238d   :  { %v2238_v59 = vcvt.s32.f32 %v2236_v23 }
0x2395   :  { %v5501_v60 = vpop.eup %5500 }
0x2396   :  { %2403 = vperm.xlu1 %5404, %v5501_v60   ;;  %v5503_v30 = vpop.eup %5502 }
0x239a   :  { %2406 = vperm.xlu1 %5404, %v5503_v30  }
0x2415   :  { %v2404_v62 = vpop.permute.xlu1 %2403 }
0x2416   :  { %v2411_v43 = vrot.slane %v2404_v62, %v5941_v39  ;;  %v2243_v62 = vsel %vm2242_vm12, %v2238_v59, inf }
0x2419   :  { %v2407_v31 = vpop.permute.xlu1 %2406 }
0x241a   :  { %v2415_v2 = vrot.slane %v2407_v31, %v5941_v39  ;;  %v4433_v31 = vadd.s32 4294967288, %v5937_v37 }
0x241c   :  { %v2416_v28 = vsel %vm239_vm2, %v2415_v2, %v2411_v43  ;;  %v4436_v2 = vsub.s32 %v4433_v31, %v5900_v13 }
0x241d   :  { %v2418_v42 = vsel %vm242_vm3, %v2416_v28, 0.0 }
0x241e   :  { %2419 = vadd.xlane.f32.xlu1 %v2418_v42 }
0x24ab   :  { %v2420_v63 = vpop.xlane.xlu1 %2419 }
0x24ac   :  { %v2425_v11 = vrot.slane %v2420_v63, %v5916_v20  ;;  %v2429_v14 = vrot.slane %v2420_v63, %v5948_v46 }
0x24ae   :  { %5504 = vrcp.f32 %v2425_v11 }
0x24af   :  { %5506 = vrcp.f32 %v2429_v14 }
0x24b8   :  { %v5505_v34 = vpop.eup %5504 }
0x24b9   :  { %v2433_v50 = vmul.f32 %v5505_v34, %v5501_v60  ;;  %v5507_v52 = vpop.eup %5506 }
0x24ba   :  { %v2435_v12 = vmul.f32 %v5507_v52, %v5503_v30 }
0x24bb   :  { %2438 = vperm.xlu0 %5405, %v2433_v50  }
0x24bf   :  { %2443 = vperm.xlu0 %5405, %v2435_v12  }
0x24de   :  { %2244 = vmin.xlane.f32.xlu0 %v2243_v62 }
0x253a   :  { %v2439_v43 = vpop.permute.xlu0 %2438 }
0x253b   :  { %v2446_v28 = vmul.f32 %v6382_v24, %v2439_v43  ;;  %v4437_v11 = vrot.slane %v2439_v43, %v4436_v2 }
0x253d   :  { %v2448_v42 = vsel %vm104_vm1, %v2446_v28, 0.0 }
0x253e   :  { %v2449_v60 = vrot.slane %v2448_v42, 4  ;;  %v2444_v63 = vpop.permute.xlu0 %2443 }
0x253f   :  { %v2447_v30 = vmul.f32 %v6388_v47, %v2444_v63  ;;  %v4441_v14 = vrot.slane %v2444_v63, %v4436_v2 }
0x2540   :  { %v2450_v19 = vadd.f32 %v2449_v60, %v2448_v42  ;;  %v2247_v42 = vcvt.f32.s32 %v2241_v21 }
0x2541   :  { %v2455_v48 = vsel %vm104_vm1, %v2447_v30, 0.0  ;;  %v6483_v34 = vsel %vm239_vm2, %v4441_v14, %v4437_v11  ;;  %v7045_v14 = vmov 0.0  }
0x2542   :  { %v2451_v50 = vrot.slane %v2450_v19, 2  ;;  %v2456_v52 = vrot.slane %v2455_v48, 4  ;;  %v2248_v63 = vshll.u32 %v2247_v42, 16 }
0x2544   :  { %v2452_v12 = vadd.f32 %v2451_v50, %v2450_v19  ;;  %v2457_v23 = vadd.f32 %v2456_v52, %v2455_v48 }
0x2546   :  { %v2458_v59 = vrot.slane %v2457_v23, 2  ;;  %v2453_v31 = vrot.slane %v2452_v12, 1 }
0x2548   :  { %v2459_v62 = vadd.f32 %v2458_v59, %v2457_v23  ;;  %v2454_v0 = vadd.f32 %v2453_v31, %v2452_v12 }
0x254a   :  { %v2460_v28 = vrot.slane %v2459_v62, 1 }
0x254c   :  { %v2461_v1 = vadd.f32 %v2460_v28, %v2459_v62 }
0x254e   :  { %v2464_v43 = vsel %vm239_vm2, %v2461_v1, %v2454_v0  ;;  %v7046_v1 = vmov 0.0|0.0  }
0x254f   :  { %2465 = vrot.lane.b32.xlu1 %v2464_v43, %s5770_s4 }
0x2553   :  { %2542 = vrot.lane.b32.xlu1 %v6434_v38, %s5768_s23 }
0x2557   :  { %2552 = vrot.lane.b32.xlu1 %v6434_v38, %s5769_s24 }
0x256b   :  { %v2245_v2 = vpop.xlane.xlu0 %2244 }
0x256c   :  { %v2246_v60 = vcvt.f32.s32 %v2245_v2 }
0x256e   :  { %v2249_v11 = vadd.s32 %v2248_v63, %v2246_v60 }
0x2570   :  { %vm2250_vm13 = vcmp.eq.s32.totalorder %v5937_v37, %v2249_v11 }
0x2571   :  { %v4607_v19 = vsel %vm2250_vm13, 1.0, %v7045_v14 }
0x25c1   :  { %v2466_v30 = vpop.permute.xlu1 %2465 }
0x25c2   :  { %v2468_v0 = vsel %vm331_vm5, %v4607_v19, %v2466_v30 }
0x25c3   :  { %5011 = vmatmul.mubr.msk.f32.vlgmr.msra.gmra.mrb[16].mxu0 %vm333_vm6, %v2468_v0 }
0x25c4   :  { %5300 = vmatpush3.bf16.msra.mxu0 %v5883_v5  ;;  %5032 = vmatprep.mubr.msk.f32.mxu0 %vm5764_vm0, %v7045_v14 }
0x25c5   :  { %5301 = vmatprep.subr.bf16.mxu0 %v7046_v1  ;;  %v2543_v38 = vpop.permute.xlu1 %2542 }
0x25c8   :  { %5303 = vmatpush3.bf16.msra.mxu0 %v5886_v7 }
0x25c9   :  { %5313 = vmatprep.subr.bf16.mxu0 %v7046_v1  ;;  %v2553_v62 = vpop.permute.xlu1 %2552 }
0x2696   :  { %v2538_v21 = vpop.f32.mrb[16].mxu0 }
0x2697   :  { %v2545_v48 = vadd.f32 %v2543_v38, %v2538_v21  ;;  %v5012_v50 = vpop.f32.mrb[17].mxu0 }
0x2699   :  { %v4610_v52 = vmul.f32 -1.442695, %v2545_v48 }
0x269b   :  { %5508 = vpow2.f32 %v4610_v52 }
0x26a5   :  { %v5509_v12 = vpop.eup %5508 }
0x26a6   :  { %v2549_v23 = vadd.f32 1.0, %v5509_v12 }
0x26a8   :  { %5510 = vrcp.f32 %v2549_v23 }
0x26b2   :  { %v5511_v59 = vpop.eup %5510 }
0x26b3   :  { %v2555_v31 = vmul.f32 %v5511_v59, %v2553_v62  ;;  %v2562_v42 = vsub.f32 1.0, %v5511_v59  ;;  %v2568_v63 = vmul.f32 %v5511_v59, %v6413_v4 }
0x26b5   :  { %2557 = vrot.lane.b32.xlu1 %v2555_v31, %s5771_s15 }
0x2727   :  { %v2558_v28 = vpop.permute.xlu1 %2557 }
0x2728   :  { %v2560_v43 = vadd.f32 %v2558_v28, %v2538_v21 }
0x272a   :  { %5512 = vtanh.f32 %v2560_v43 }
0x2734   :  { %v5513_v2 = vpop.eup %5512 }
0x2735   :  { %2564 = vrot.lane.b32.xlu0 %v5513_v2, %s5768_s23 }
0x27a7   :  { %v2565_v60 = vpop.permute.xlu0 %2564 }
0x27a8   :  { %v2567_v11 = vmul.f32 %v2565_v60, %v2562_v42 }
0x27aa   :  { %v6504_v30 = vadd.f32 %v2568_v63, %v2567_v11 }
0x27ac   :  { %2571 = vrot.lane.b32.xlu1 %v6504_v30, %s5768_s23 }
0x281e   :  { %v2572_v19 = vpop.permute.xlu1 %2571 }
0x281f   :  { %5022 = vmatmul.mubr.msk.f32.vlgmr.msra.gmra.mrb[16].mxu1 %vm104_vm1, %v2572_v19  ;;  %5033 = vmatmul.mubr.msk.f32.vlgmr.msra.gmra.mrb[18].mxu0 %vm104_vm1, %v2572_v19 }
0x2820   :  { %5306 = vmatpush3.bf16.msra.mxu1 %v5971_v16  ;;  %5047 = vmatprep.mubr.msk.f32.mxu1 %vm5764_vm0, %v7045_v14 }
0x2821   :  { %5307 = vmatprep.subr.bf16.mxu1 %v7046_v1  ;;  %5315 = vmatpush3.bf16.msra.mxu0 %v6030_v6 }
0x2822   :  { %5316 = vmatprep.subr.bf16.mxu0 %v7046_v1  ;;  %5058 = vmatprep.mubr.msk.f32.mxu0 %vm5764_vm0, %v7045_v14 }
0x2824   :  { %5309 = vmatpush3.bf16.msra.mxu1 %v5977_v17 }
0x2825   :  { %5310 = vmatprep.subr.bf16.mxu1 %v7046_v1  ;;  %5318 = vmatpush3.bf16.msra.mxu0 %v6036_v10 }
0x2826   :  { %5325 = vmatprep.subr.bf16.mxu0 %v7046_v1 }
0x2828   :  { %5312 = vmatpush3.bf16.msra.mxu1 %v5987_v22 }
0x2829   :  { %5319 = vmatprep.subr.bf16.mxu1 %v7046_v1 }
0x28f2   :  { %v2641_v4 = vpop.f32.mrb[16].mxu1  ;;  %v2744_v0 = vpop.f32.mrb[18].mxu0 }
0x28f3   :  { %v6525_v38 = vadd.f32 %v6331_v41, %v2744_v0  ;;  %v5023_v21 = vpop.f32.mrb[17].mxu1  ;;  %v5034_v48 = vpop.f32.mrb[19].mxu0 }
0x28f5   :  { %v2755_v50 = vrot.slane %v6525_v38, %v5908_v15 }
0x28f7   :  { %v2756_v52 = vcombine.high %v2755_v50, %v2755_v50  ;;  %v2763_v12 = vrot.slane %v2755_v50, %v5908_v15 }
0x28f9   :  { %v2770_v23 = vrot.slane %v2756_v52, %v5908_v15  ;;  %v2774_v59 = vrot.slane %v2763_v12, %v5916_v20 }
0x28fb   :  { %v2778_v62 = vrot.slane %v2770_v23, %v5916_v20  ;;  %v2781_v31 = vadd.f32 %v6342_v9, %v2774_v59 }
0x28fd   :  { %v2782_v28 = vadd.f32 %v6345_v49, %v2778_v62  ;;  %5514 = vtanh.f32 %v2781_v31 }
0x28ff   :  { %5516 = vtanh.f32 %v2782_v28 }
0x2907   :  { %v5515_v43 = vpop.eup %5514 }
0x2908   :  { %v2785_v2 = vmul.f32 %v6351_v51, %v5515_v43 }
0x2909   :  { %v5517_v42 = vpop.eup %5516 }
0x290a   :  { %v2787_v60 = vsel %vm104_vm1, %v2785_v2, 0.0  ;;  %v2786_v63 = vmul.f32 %v6351_v51, %v5517_v42 }
0x290b   :  { %2788 = vadd.xlane.f32.xlu1 %v2787_v60  ;;  %v6546_v60 = vadd.f32 %v6448_v26, %v2641_v4 }
0x290c   :  { %v2790_v11 = vsel %vm104_vm1, %v2786_v63, 0.0 }
0x290d   :  { %2791 = vadd.xlane.f32.xlu0 %v2790_v11  ;;  %v2645_v63 = vsel %vm519_vm7, %v6546_v60, -inf }
0x2998   :  { %v2789_v19 = vpop.xlane.xlu1 %2788 }
0x2999   :  { %v2798_v21 = vrot.slane %v2789_v19, %v5941_v39 }
0x299a   :  { %v2792_v0 = vpop.xlane.xlu0 %2791 }
0x299b   :  { %v2802_v48 = vrot.slane %v2792_v0, %v5941_v39 }
0x299d   :  { %v2803_v50 = vsel %vm239_vm2, %v2802_v48, %v2798_v21 }
0x299e   :  { %v2805_v52 = vsel %vm242_vm3, %v2803_v50, -inf }
0x299f   :  { %2806 = vmax.xlane.f32.xlu1 %v2805_v52 }
0x2a2c   :  { %v2807_v12 = vpop.xlane.xlu1 %2806 }
0x2a2d   :  { %v2812_v23 = vrot.slane %v2807_v12, %v5916_v20  ;;  %v2816_v59 = vrot.slane %v2807_v12, %v5948_v46 }
0x2a2f   :  { %v2819_v62 = vsub.f32 %v2789_v19, %v2812_v23  ;;  %v2820_v31 = vsub.f32 %v2792_v0, %v2816_v59 }
0x2a31   :  { %v2821_v28 = vmul.f32 1.442695, %v2819_v62  ;;  %v2823_v43 = vmul.f32 1.442695, %v2820_v31 }
0x2a33   :  { %5518 = vpow2.f32 %v2821_v28 }
0x2a34   :  { %5520 = vpow2.f32 %v2823_v43 }
0x2a3d   :  { %v5519_v2 = vpop.eup %5518 }
0x2a3e   :  { %v5521_v42 = vpop.eup %5520  ;;  %2828 = vperm.xlu1 %5404, %v5519_v2  }
0x2a3f   :  { %2831 = vperm.xlu0 %5405, %v5521_v42  }
0x2a62   :  { %2646 = vmax.xlane.f32.xlu1 %v2645_v63 }
0x2abd   :  { %v2829_v11 = vpop.permute.xlu1 %2828 }
0x2abe   :  { %v2832_v21 = vpop.permute.xlu0 %2831  ;;  %v2836_v19 = vrot.slane %v2829_v11, %v5941_v39 }
0x2abf   :  { %v2840_v0 = vrot.slane %v2832_v21, %v5941_v39 }
0x2ac1   :  { %v2841_v48 = vsel %vm239_vm2, %v2840_v0, %v2836_v19 }
0x2ac2   :  { %v2843_v50 = vsel %vm242_vm3, %v2841_v48, 0.0 }
0x2ac3   :  { %2844 = vadd.xlane.f32.xlu0 %v2843_v50 }
0x2aef   :  { %v6554_v52 = vpop.xlane.xlu1 %2646 }
0x2af0   :  { %vm2658_vm14 = vcmp.eq.f32.partialorder %v6546_v60, %v6554_v52 }
0x2af1   :  { %v2659_v4 = vsel %vm2658_vm14, %v5937_v37, 16 }
0x2af2   :  { %v2660_v12 = vsel %vm519_vm7, %v2659_v4, 2147483647 }
0x2af3   :  { %v2662_v23 = vshra.s32 %v2660_v12, 16  ;;  %v2661_v19 = vand.u32 65535, %v2660_v12 }
0x2af5   :  { %v2664_v59 = vcvt.s32.f32 %v2662_v23  ;;  %v2663_v48 = vcvt.s32.f32 %v2661_v19 }
0x2af7   :  { %2665 = vmin.xlane.f32.xlu1 %v2664_v59 }
0x2b50   :  { %v2845_v62 = vpop.xlane.xlu0 %2844 }
0x2b51   :  { %v2850_v31 = vrot.slane %v2845_v62, %v5916_v20  ;;  %v2854_v28 = vrot.slane %v2845_v62, %v5948_v46 }
0x2b53   :  { %5522 = vrcp.f32 %v2850_v31 }
0x2b54   :  { %5524 = vrcp.f32 %v2854_v28 }
0x2b5d   :  { %v5523_v43 = vpop.eup %5522 }
0x2b5e   :  { %v5525_v63 = vpop.eup %5524  ;;  %v2858_v11 = vmul.f32 %v5523_v43, %v5519_v2 }
0x2b5f   :  { %v2860_v21 = vmul.f32 %v5525_v63, %v5521_v42 }
0x2b60   :  { %2863 = vperm.xlu1 %5404, %v2858_v11  }
0x2b61   :  { %2868 = vperm.xlu0 %5405, %v2860_v21  }
0x2b84   :  { %v2666_v0 = vpop.xlane.xlu1 %2665 }
0x2b85   :  { %vm2667_vm15 = vcmp.eq.f32.partialorder %v2664_v59, %v2666_v0 }
0x2b86   :  { %v2668_v50 = vsel %vm2667_vm15, %v2663_v48, inf  ;;  %vm4547_vm15 = vcmask 254976  }
0x2b87   :  { %2669 = vmin.xlane.f32.xlu1 %v2668_v50 }
0x2bdf   :  { %v6562_v4 = vpop.permute.xlu1 %2863 }
0x2be0   :  { %v6564_v23 = vpop.permute.xlu0 %2868  ;;  %v2871_v62 = vmul.f32 %v6382_v24, %v6562_v4 }
0x2be1   :  { %v2872_v31 = vmul.f32 %v6388_v47, %v6564_v23 }
0x2be2   :  { %v2873_v2 = vsel %vm104_vm1, %v2871_v62, 0.0 }
0x2be3   :  { %v2880_v42 = vsel %vm104_vm1, %v2872_v31, 0.0  ;;  %v2874_v12 = vrot.slane %v2873_v2, 4  ;;  %v2672_v31 = vcvt.f32.s32 %v2666_v0 }
0x2be4   :  { %v2881_v28 = vrot.slane %v2880_v42, 4 }
0x2be5   :  { %v2875_v43 = vadd.f32 %v2874_v12, %v2873_v2 }
0x2be6   :  { %v2882_v59 = vadd.f32 %v2881_v28, %v2880_v42  ;;  %v2673_v42 = vshll.u32 %v2672_v31, 16 }
0x2be7   :  { %v2876_v63 = vrot.slane %v2875_v43, 2 }
0x2be8   :  { %v2883_v11 = vrot.slane %v2882_v59, 2 }
0x2be9   :  { %v2877_v21 = vadd.f32 %v2876_v63, %v2875_v43 }
0x2bea   :  { %v2884_v19 = vadd.f32 %v2883_v11, %v2882_v59 }
0x2beb   :  { %v2878_v48 = vrot.slane %v2877_v21, 1 }
0x2bec   :  { %v2885_v50 = vrot.slane %v2884_v19, 1 }
0x2bed   :  { %v2879_v35 = vadd.f32 %v2878_v48, %v2877_v21 }
0x2bee   :  { %v2886_v33 = vadd.f32 %v2885_v50, %v2884_v19 }
0x2bf0   :  { %v2889_v58 = vsel %vm239_vm2, %v2886_v33, %v2879_v35 }
0x2bf1   :  { %2890 = vrot.lane.b32.xlu0 %v2889_v58, %s5770_s4 }
0x2bf5   :  { %2967 = vrot.lane.b32.xlu0 %v6525_v38, %s5768_s23 }
0x2bf9   :  { %2977 = vrot.lane.b32.xlu0 %v6525_v38, %s5769_s24 }
0x2c14   :  { %v2670_v62 = vpop.xlane.xlu1 %2669 }
0x2c15   :  { %v2671_v2 = vcvt.f32.s32 %v2670_v62 }
0x2c17   :  { %v2674_v12 = vadd.s32 %v2673_v42, %v2671_v2 }
0x2c19   :  { %vm2675_vm4 = vcmp.eq.s32.totalorder %v5937_v37, %v2674_v12 }
0x2c1a   :  { %v4612_v43 = vsel %vm2675_vm4, 1.0, %v7045_v14 }
0x2c63   :  { %v2891_v28 = vpop.permute.xlu0 %2890 }
0x2c64   :  { %v2893_v33 = vsel %vm331_vm5, %v4612_v43, %v2891_v28 }
0x2c65   :  { %5048 = vmatmul.mubr.msk.f32.vlgmr.msra.gmra.mrb[18].mxu1 %vm333_vm6, %v2893_v33 }
0x2c66   :  { %5321 = vmatpush3.bf16.msra.mxu1 %v5883_v5  ;;  %5069 = vmatprep.mubr.msk.f32.mxu1 %vm5764_vm0, %v7045_v14 }
0x2c67   :  { %5322 = vmatprep.subr.bf16.mxu1 %v7046_v1  ;;  %v2968_v58 = vpop.permute.xlu0 %2967 }
0x2c6a   :  { %5324 = vmatpush3.bf16.msra.mxu1 %v5886_v7 }
0x2c6b   :  { %5334 = vmatprep.subr.bf16.mxu1 %v7046_v1  ;;  %v2978_v19 = vpop.permute.xlu0 %2977 }
0x2d38   :  { %v2963_v35 = vpop.f32.mrb[18].mxu1 }
0x2d39   :  { %v2970_v38 = vadd.f32 %v2968_v58, %v2963_v35  ;;  %v5049_v0 = vpop.f32.mrb[19].mxu1 }
0x2d3b   :  { %v4615_v59 = vmul.f32 -1.442695, %v2970_v38 }
0x2d3d   :  { %5526 = vpow2.f32 %v4615_v59 }
0x2d47   :  { %v5527_v63 = vpop.eup %5526 }
0x2d48   :  { %v2974_v11 = vadd.f32 1.0, %v5527_v63 }
0x2d4a   :  { %5528 = vrcp.f32 %v2974_v11 }
0x2d54   :  { %v5529_v21 = vpop.eup %5528 }
0x2d55   :  { %v2980_v48 = vmul.f32 %v5529_v21, %v2978_v19  ;;  %v2987_v2 = vsub.f32 1.0, %v5529_v21  ;;  %v2993_v12 = vmul.f32 %v5529_v21, %v6504_v30 }
0x2d57   :  { %2982 = vrot.lane.b32.xlu0 %v2980_v48, %s5771_s15 }
0x2dc9   :  { %v2983_v50 = vpop.permute.xlu0 %2982 }
0x2dca   :  { %v2985_v62 = vadd.f32 %v2983_v50, %v2963_v35 }
0x2dcc   :  { %5530 = vtanh.f32 %v2985_v62 }
0x2dd6   :  { %v5531_v31 = vpop.eup %5530 }
0x2dd7   :  { %2989 = vrot.lane.b32.xlu0 %v5531_v31, %s5768_s23 }
0x2e49   :  { %v2990_v42 = vpop.permute.xlu0 %2989 }
0x2e4a   :  { %v2992_v28 = vmul.f32 %v2990_v42, %v2987_v2 }
0x2e4c   :  { %v6591_v43 = vadd.f32 %v2993_v12, %v2992_v28 }
0x2e4e   :  { %2996 = vrot.lane.b32.xlu0 %v6591_v43, %s5768_s23 }
0x2ec0   :  { %v2997_v33 = vpop.permute.xlu0 %2996 }
0x2ec1   :  { %5059 = vmatmul.mubr.msk.f32.vlgmr.msra.gmra.mrb[20].mxu0 %vm104_vm1, %v2997_v33  ;;  %5070 = vmatmul.mubr.msk.f32.vlgmr.msra.gmra.mrb[20].mxu1 %vm104_vm1, %v2997_v33 }
0x2ec2   :  { %5327 = vmatpush3.bf16.msra.mxu0 %v5971_v16  ;;  %5084 = vmatprep.mubr.msk.f32.mxu0 %vm5764_vm0, %v7045_v14 }
0x2ec3   :  { %5328 = vmatprep.subr.bf16.mxu0 %v7046_v1  ;;  %5336 = vmatpush3.bf16.msra.mxu1 %v6030_v6 }
0x2ec4   :  { %5337 = vmatprep.subr.bf16.mxu1 %v7046_v1  ;;  %5095 = vmatprep.mubr.msk.f32.mxu1 %vm5764_vm0, %v7045_v14 }
0x2ec6   :  { %5330 = vmatpush3.bf16.msra.mxu0 %v5977_v17 }
0x2ec7   :  { %5331 = vmatprep.subr.bf16.mxu0 %v7046_v1  ;;  %5339 = vmatpush3.bf16.msra.mxu1 %v6036_v10 }
0x2ec8   :  { %5346 = vmatprep.subr.bf16.mxu1 %v7046_v1 }
0x2eca   :  { %5333 = vmatpush3.bf16.msra.mxu0 %v5987_v22 }
0x2ecb   :  { %5340 = vmatprep.subr.bf16.mxu0 %v7046_v1 }
0x2f94   :  { %v3066_v30 = vpop.f32.mrb[20].mxu0  ;;  %v3169_v58 = vpop.f32.mrb[20].mxu1 }
0x2f95   :  { %v6612_v35 = vadd.f32 %v6331_v41, %v3169_v58  ;;  %v5060_v38 = vpop.f32.mrb[21].mxu0  ;;  %v5071_v0 = vpop.f32.mrb[21].mxu1  ;;  %v6624_v42 = vadd.f32 %v6448_v26, %v3066_v30 }
0x2f97   :  { %v3180_v59 = vrot.slane %v6612_v35, %v5908_v15 }
0x2f99   :  { %v3181_v63 = vcombine.high %v3180_v59, %v3180_v59  ;;  %v3188_v11 = vrot.slane %v3180_v59, %v5908_v15 }
0x2f9b   :  { %v3195_v21 = vrot.slane %v3181_v63, %v5908_v15  ;;  %v3199_v19 = vrot.slane %v3188_v11, %v5916_v20 }
0x2f9d   :  { %v3203_v48 = vrot.slane %v3195_v21, %v5916_v20  ;;  %v3206_v50 = vadd.f32 %v6342_v9, %v3199_v19  ;;  %v3070_v9 = vsel %vm519_vm7, %v6624_v42, -inf }
0x2f9f   :  { %v3207_v62 = vadd.f32 %v6345_v49, %v3203_v48  ;;  %5532 = vtanh.f32 %v3206_v50 }
0x2fa1   :  { %5534 = vtanh.f32 %v3207_v62 }
0x2fa9   :  { %v5533_v41 = vpop.eup %5532 }
0x2faa   :  { %v3210_v31 = vmul.f32 %v6351_v51, %v5533_v41 }
0x2fab   :  { %v5535_v2 = vpop.eup %5534 }
0x2fac   :  { %v3212_v12 = vsel %vm104_vm1, %v3210_v31, 0.0  ;;  %v3211_v28 = vmul.f32 %v6351_v51, %v5535_v2 }
0x2fad   :  { %3213 = vadd.xlane.f32.xlu0 %v3212_v12 }
0x2fae   :  { %v3215_v33 = vsel %vm104_vm1, %v3211_v28, 0.0 }
0x2faf   :  { %3216 = vadd.xlane.f32.xlu1 %v3215_v33 }
0x2fb1   :  { %3071 = vmax.xlane.f32.xlu0 %v3070_v9 }
0x303a   :  { %v3214_v49 = vpop.xlane.xlu0 %3213 }
0x303b   :  { %v3223_v38 = vrot.slane %v3214_v49, %v5941_v39 }
0x303c   :  { %v3217_v58 = vpop.xlane.xlu1 %3216 }
0x303d   :  { %v3227_v0 = vrot.slane %v3217_v58, %v5941_v39 }
0x303e   :  { %v6633_v30 = vpop.xlane.xlu0 %3071 }
0x303f   :  { %vm3083_vm8 = vcmp.eq.f32.partialorder %v6624_v42, %v6633_v30  ;;  %v3228_v51 = vsel %vm239_vm2, %v3227_v0, %v3223_v38 }
0x3040   :  { %v3084_v59 = vsel %vm3083_vm8, %v5937_v37, 16  ;;  %v3230_v63 = vsel %vm242_vm3, %v3228_v51, -inf }
0x3041   :  { %3231 = vmax.xlane.f32.xlu1 %v3230_v63  ;;  %v3085_v11 = vsel %vm519_vm7, %v3084_v59, 2147483647 }
0x3042   :  { %v3087_v21 = vshra.s32 %v3085_v11, 16 }
0x3044   :  { %v3089_v19 = vcvt.s32.f32 %v3087_v21 }
0x3046   :  { %3090 = vmin.xlane.f32.xlu0 %v3089_v19 }
0x30ce   :  { %v3232_v48 = vpop.xlane.xlu1 %3231 }
0x30cf   :  { %v3237_v50 = vrot.slane %v3232_v48, %v5916_v20  ;;  %v3241_v62 = vrot.slane %v3232_v48, %v5948_v46 }
0x30d1   :  { %v3244_v41 = vsub.f32 %v3214_v49, %v3237_v50  ;;  %v3245_v31 = vsub.f32 %v3217_v58, %v3241_v62 }
0x30d3   :  { %v3246_v2 = vmul.f32 1.442695, %v3244_v41  ;;  %v3248_v12 = vmul.f32 1.442695, %v3245_v31  ;;  %v3091_v31 = vpop.xlane.xlu0 %3090 }
0x30d4   :  { %vm3092_vm9 = vcmp.eq.f32.partialorder %v3089_v19, %v3091_v31 }
0x30d5   :  { %5536 = vpow2.f32 %v3246_v2  ;;  %v3086_v2 = vand.u32 65535, %v3085_v11 }
0x30d6   :  { %5538 = vpow2.f32 %v3248_v12 }
0x30d7   :  { %v3088_v12 = vcvt.s32.f32 %v3086_v2 }
0x30df   :  { %v5537_v28 = vpop.eup %5536 }
0x30e0   :  { %3253 = vperm.xlu1 %5404, %v5537_v28   ;;  %v5539_v33 = vpop.eup %5538 }
0x30e4   :  { %3256 = vperm.xlu1 %5404, %v5539_v33  }
0x315f   :  { %v3254_v9 = vpop.permute.xlu1 %3253 }
0x3160   :  { %v3261_v0 = vrot.slane %v3254_v9, %v5941_v39  ;;  %v3093_v9 = vsel %vm3092_vm9, %v3088_v12, inf }
0x3163   :  { %v3257_v38 = vpop.permute.xlu1 %3256 }
0x3164   :  { %v3265_v51 = vrot.slane %v3257_v38, %v5941_v39  ;;  %v4463_v38 = vadd.s32 4294967240, %v5937_v37 }
0x3166   :  { %v3266_v59 = vsel %vm239_vm2, %v3265_v51, %v3261_v0  ;;  %v4466_v51 = vsub.s32 %v4463_v38, %v5900_v13 }
0x3167   :  { %v3268_v63 = vsel %vm242_vm3, %v3266_v59, 0.0 }
0x3168   :  { %3269 = vadd.xlane.f32.xlu1 %v3268_v63 }
0x31f5   :  { %v3270_v49 = vpop.xlane.xlu1 %3269 }
0x31f6   :  { %v3275_v58 = vrot.slane %v3270_v49, %v5916_v20  ;;  %v3279_v21 = vrot.slane %v3270_v49, %v5948_v46 }
0x31f8   :  { %5540 = vrcp.f32 %v3275_v58 }
0x31f9   :  { %5542 = vrcp.f32 %v3279_v21 }
0x3202   :  { %v5541_v48 = vpop.eup %5540 }
0x3203   :  { %v3283_v50 = vmul.f32 %v5541_v48, %v5537_v28  ;;  %v5543_v62 = vpop.eup %5542 }
0x3204   :  { %v3285_v41 = vmul.f32 %v5543_v62, %v5539_v33 }
0x3205   :  { %3288 = vperm.xlu0 %5405, %v3283_v50  }
0x3209   :  { %3293 = vperm.xlu0 %5405, %v3285_v41  }
0x3228   :  { %3094 = vmin.xlane.f32.xlu0 %v3093_v9 }
0x3284   :  { %v3289_v0 = vpop.permute.xlu0 %3288 }
0x3285   :  { %v3296_v59 = vmul.f32 %v6382_v24, %v3289_v0  ;;  %v4467_v58 = vrot.slane %v3289_v0, %v4466_v51 }
0x3287   :  { %v3298_v63 = vsel %vm104_vm1, %v3296_v59, 0.0 }
0x3288   :  { %v3299_v28 = vrot.slane %v3298_v63, 4  ;;  %v3294_v49 = vpop.permute.xlu0 %3293 }
0x3289   :  { %v3297_v33 = vmul.f32 %v6388_v47, %v3294_v49  ;;  %v4471_v21 = vrot.slane %v3294_v49, %v4466_v51  ;;  %v3097_v51 = vcvt.f32.s32 %v3091_v31 }
0x328a   :  { %v3300_v11 = vadd.f32 %v3299_v28, %v3298_v63 }
0x328b   :  { %v3305_v19 = vsel %vm104_vm1, %v3297_v33, 0.0  ;;  %v6656_v48 = vsel %vm239_vm2, %v4471_v21, %v4467_v58  ;;  %v3098_v28 = vshll.u32 %v3097_v51, 16 }
0x328c   :  { %v3301_v50 = vrot.slane %v3300_v11, 2  ;;  %v3306_v62 = vrot.slane %v3305_v19, 4 }
0x328e   :  { %v3302_v41 = vadd.f32 %v3301_v50, %v3300_v11  ;;  %v3307_v2 = vadd.f32 %v3306_v62, %v3305_v19 }
0x3290   :  { %v3308_v12 = vrot.slane %v3307_v2, 2  ;;  %v3303_v24 = vrot.slane %v3302_v41, 1 }
0x3292   :  { %v3309_v9 = vadd.f32 %v3308_v12, %v3307_v2  ;;  %v3304_v59 = vadd.f32 %v3303_v24, %v3302_v41 }
0x3294   :  { %v3310_v38 = vrot.slane %v3309_v9, 1 }
0x3296   :  { %v3311_v61 = vadd.f32 %v3310_v38, %v3309_v9 }
0x3298   :  { %v3314_v0 = vsel %vm239_vm2, %v3311_v61, %v3304_v59 }
0x3299   :  { %3315 = vrot.lane.b32.xlu1 %v3314_v0, %s5770_s4 }
0x329d   :  { %3392 = vrot.lane.b32.xlu1 %v6612_v35, %s5768_s23 }
0x32a1   :  { %3402 = vrot.lane.b32.xlu1 %v6612_v35, %s5769_s24 }
0x32b5   :  { %v3095_v47 = vpop.xlane.xlu0 %3094 }
0x32b6   :  { %v3096_v63 = vcvt.f32.s32 %v3095_v47 }
0x32b8   :  { %v3099_v49 = vadd.s32 %v3098_v28, %v3096_v63 }
0x32ba   :  { %vm3100_vm10 = vcmp.eq.s32.totalorder %v5937_v37, %v3099_v49 }
0x32bb   :  { %v4617_v33 = vsel %vm3100_vm10, 1.0, %v7045_v14 }
0x330b   :  { %v3316_v58 = vpop.permute.xlu1 %3315 }
0x330c   :  { %v3318_v61 = vsel %vm331_vm5, %v4617_v33, %v3316_v58  ;;  %v6700_v58 = vld [vmem:[%s7020_s6] ss:$0 sm:$0xff] }
0x330d   :  { %5085 = vmatmul.mubr.msk.f32.vlgmr.msra.gmra.mrb[22].mxu0 %vm333_vm6, %v3318_v61 }
0x330e   :  { %5342 = vmatpush3.bf16.msra.mxu0 %v5883_v5  ;;  %5106 = vmatprep.mubr.msk.f32.mxu0 %vm5764_vm0, %v7045_v14 }
0x330f   :  { %5343 = vmatprep.subr.bf16.mxu0 %v7046_v1  ;;  %v3393_v35 = vpop.permute.xlu1 %3392 }
0x3312   :  { %5345 = vmatpush3.bf16.msra.mxu0 %v5886_v7 }
0x3313   :  { %5355 = vmatprep.subr.bf16.mxu0 %v7046_v1  ;;  %v3403_v2 = vpop.permute.xlu1 %3402 }
0x33e0   :  { %v3388_v31 = vpop.f32.mrb[22].mxu0 }
0x33e1   :  { %v3395_v21 = vadd.f32 %v3393_v35, %v3388_v31  ;;  %v5086_v11 = vpop.f32.mrb[23].mxu0 }
0x33e3   :  { %v4620_v19 = vmul.f32 -1.442695, %v3395_v21 }
0x33e5   :  { %5544 = vpow2.f32 %v4620_v19 }
0x33ef   :  { %v5545_v50 = vpop.eup %5544 }
0x33f0   :  { %v3399_v62 = vadd.f32 1.0, %v5545_v50 }
0x33f2   :  { %5546 = vrcp.f32 %v3399_v62 }
0x33fc   :  { %v5547_v41 = vpop.eup %5546 }
0x33fd   :  { %v3405_v12 = vmul.f32 %v5547_v41, %v3403_v2  ;;  %v3412_v59 = vsub.f32 1.0, %v5547_v41  ;;  %v3418_v47 = vmul.f32 %v5547_v41, %v6591_v43  ;;  %v6711_v41 = vld [vmem:[#allocation5] sm:$0xff] }
0x33ff   :  { %3407 = vrot.lane.b32.xlu1 %v3405_v12, %s5771_s15  ;;  %v6714_v12 = vld [vmem:[#allocation5 + $0x8] sm:$0xff] }
0x3471   :  { %v3408_v24 = vpop.permute.xlu1 %3407 }
0x3472   :  { %v3410_v9 = vadd.f32 %v3408_v24, %v3388_v31 }
0x3474   :  { %5548 = vtanh.f32 %v3410_v9 }
0x347e   :  { %v5549_v38 = vpop.eup %5548 }
0x347f   :  { %3414 = vrot.lane.b32.xlu0 %v5549_v38, %s5768_s23  ;;  %v6720_v38 = vld [vmem:[%s7020_s6 + $0x2] ss:$0 sm:$0xff] }
0x34f1   :  { %v3415_v0 = vpop.permute.xlu0 %3414 }
0x34f2   :  { %v3417_v51 = vmul.f32 %v3415_v0, %v3412_v59 }
0x34f4   :  { %v6677_v63 = vadd.f32 %v3418_v47, %v3417_v51 }
0x34f6   :  { %3421 = vrot.lane.b32.xlu1 %v6677_v63, %s5768_s23 }
0x3568   :  { %v3422_v28 = vpop.permute.xlu1 %3421 }
0x3569   :  { %5096 = vmatmul.mubr.msk.f32.vlgmr.msra.gmra.mrb[22].mxu1 %vm104_vm1, %v3422_v28  ;;  %5107 = vmatmul.mubr.msk.f32.vlgmr.msra.gmra.mrb[24].mxu0 %vm104_vm1, %v3422_v28 }
0x356a   :  { %5348 = vmatpush3.bf16.msra.mxu1 %v5971_v16  ;;  %5121 = vmatprep.mubr.msk.f32.mxu1 %vm5764_vm0, %v7045_v14 }
0x356b   :  { %5349 = vmatprep.subr.bf16.mxu1 %v7046_v1  ;;  %5357 = vmatpush3.bf16.msra.mxu0 %v6030_v6 }
0x356c   :  { %5358 = vmatprep.subr.bf16.mxu0 %v7046_v1  ;;  %5132 = vmatprep.mubr.msk.f32.mxu0 %vm5764_vm0, %v7045_v14 }
0x356e   :  { %5351 = vmatpush3.bf16.msra.mxu1 %v5977_v17 }
0x356f   :  { %5352 = vmatprep.subr.bf16.mxu1 %v7046_v1  ;;  %5360 = vmatpush3.bf16.msra.mxu0 %v6036_v10 }
0x3570   :  { %5367 = vmatprep.subr.bf16.mxu0 %v7046_v1 }
0x3572   :  { %5354 = vmatpush3.bf16.msra.mxu1 %v5987_v22 }
0x3573   :  { %5361 = vmatprep.subr.bf16.mxu1 %v7046_v1 }
0x363c   :  { %v3491_v43 = vpop.f32.mrb[22].mxu1  ;;  %v3594_v49 = vpop.f32.mrb[24].mxu0 }
0x363d   :  { %v6703_v33 = vadd.f32 %v6700_v58, %v3594_v49  ;;  %v5097_v61 = vpop.f32.mrb[23].mxu1  ;;  %v5108_v35 = vpop.f32.mrb[25].mxu0 }
0x363f   :  { %v3605_v31 = vrot.slane %v6703_v33, %v5908_v15 }
0x3641   :  { %v3606_v21 = vcombine.high %v3605_v31, %v3605_v31  ;;  %v3613_v11 = vrot.slane %v3605_v31, %v5908_v15 }
0x3643   :  { %v3620_v19 = vrot.slane %v3606_v21, %v5908_v15  ;;  %v3624_v50 = vrot.slane %v3613_v11, %v5916_v20 }
0x3645   :  { %v3628_v62 = vrot.slane %v3620_v19, %v5916_v20  ;;  %v3631_v2 = vadd.f32 %v6711_v41, %v3624_v50 }
0x3647   :  { %v3632_v24 = vadd.f32 %v6714_v12, %v3628_v62  ;;  %5550 = vtanh.f32 %v3631_v2 }
0x3649   :  { %5552 = vtanh.f32 %v3632_v24 }
0x3651   :  { %v5551_v9 = vpop.eup %5550 }
0x3652   :  { %v3635_v59 = vmul.f32 %v6720_v38, %v5551_v9 }
0x3653   :  { %v5553_v0 = vpop.eup %5552 }
0x3654   :  { %v3637_v47 = vsel %vm104_vm1, %v3635_v59, 0.0  ;;  %v3636_v51 = vmul.f32 %v6720_v38, %v5553_v0 }
0x3655   :  { %3638 = vadd.xlane.f32.xlu1 %v3637_v47 }
0x3656   :  { %v3640_v28 = vsel %vm104_vm1, %v3636_v51, 0.0  ;;  %v6733_v51 = vadd.f32 %v6448_v26, %v3491_v43 }
0x3657   :  { %3641 = vadd.xlane.f32.xlu0 %v3640_v28 }
0x3658   :  { %v3495_v28 = vsel %vm519_vm7, %v6733_v51, -inf }
0x36e2   :  { %v3639_v49 = vpop.xlane.xlu1 %3638 }
0x36e3   :  { %v3648_v35 = vrot.slane %v3639_v49, %v5941_v39 }
0x36e4   :  { %v3642_v61 = vpop.xlane.xlu0 %3641 }
0x36e5   :  { %v3652_v31 = vrot.slane %v3642_v61, %v5941_v39 }
0x36e7   :  { %v3653_v21 = vsel %vm239_vm2, %v3652_v31, %v3648_v35 }
0x36e8   :  { %v3655_v11 = vsel %vm242_vm3, %v3653_v21, -inf }
0x36e9   :  { %3656 = vmax.xlane.f32.xlu1 %v3655_v11 }
0x3776   :  { %v3657_v19 = vpop.xlane.xlu1 %3656 }
0x3777   :  { %v3662_v50 = vrot.slane %v3657_v19, %v5916_v20  ;;  %v3666_v62 = vrot.slane %v3657_v19, %v5948_v46 }
0x3779   :  { %v3669_v2 = vsub.f32 %v3639_v49, %v3662_v50  ;;  %v3670_v24 = vsub.f32 %v3642_v61, %v3666_v62 }
0x377b   :  { %v3671_v9 = vmul.f32 1.442695, %v3669_v2  ;;  %v3673_v59 = vmul.f32 1.442695, %v3670_v24 }
0x377d   :  { %5554 = vpow2.f32 %v3671_v9 }
0x377e   :  { %5556 = vpow2.f32 %v3673_v59 }
0x3787   :  { %v5555_v0 = vpop.eup %5554 }
0x3788   :  { %v5557_v47 = vpop.eup %5556  ;;  %3678 = vperm.xlu1 %5404, %v5555_v0  }
0x3789   :  { %3681 = vperm.xlu0 %5405, %v5557_v47  }
0x37ac   :  { %3496 = vmax.xlane.f32.xlu1 %v3495_v28 }
0x3807   :  { %v3679_v35 = vpop.permute.xlu1 %3678 }
0x3808   :  { %v3682_v31 = vpop.permute.xlu0 %3681  ;;  %v3686_v49 = vrot.slane %v3679_v35, %v5941_v39 }
0x3809   :  { %v3690_v61 = vrot.slane %v3682_v31, %v5941_v39 }
0x380b   :  { %v3691_v21 = vsel %vm239_vm2, %v3690_v61, %v3686_v49 }
0x380c   :  { %v3693_v11 = vsel %vm242_vm3, %v3691_v21, 0.0 }
0x380d   :  { %3694 = vadd.xlane.f32.xlu0 %v3693_v11 }
0x3839   :  { %v6741_v19 = vpop.xlane.xlu1 %3496 }
0x383a   :  { %vm3508_vm11 = vcmp.eq.f32.partialorder %v6733_v51, %v6741_v19 }
0x383b   :  { %v3509_v26 = vsel %vm3508_vm11, %v5937_v37, 16 }
0x383c   :  { %v3510_v43 = vsel %vm519_vm7, %v3509_v26, 2147483647 }
0x383d   :  { %v3512_v50 = vshra.s32 %v3510_v43, 16  ;;  %v3511_v49 = vand.u32 65535, %v3510_v43 }
0x383f   :  { %v3514_v62 = vcvt.s32.f32 %v3512_v50  ;;  %v3513_v21 = vcvt.s32.f32 %v3511_v49 }
0x3841   :  { %3515 = vmin.xlane.f32.xlu1 %v3514_v62 }
0x389a   :  { %v3695_v2 = vpop.xlane.xlu0 %3694 }
0x389b   :  { %v3700_v24 = vrot.slane %v3695_v2, %v5916_v20  ;;  %v3704_v9 = vrot.slane %v3695_v2, %v5948_v46 }
0x389d   :  { %5558 = vrcp.f32 %v3700_v24  ;;  %v6757_v24 = vld [vmem:[#allocation2 + $0x8] sm:$0xff] }
0x389e   :  { %5560 = vrcp.f32 %v3704_v9 }
0x38a7   :  { %v5559_v59 = vpop.eup %5558 }
0x38a8   :  { %v5561_v28 = vpop.eup %5560  ;;  %v3708_v35 = vmul.f32 %v5559_v59, %v5555_v0 }
0x38a9   :  { %v3710_v31 = vmul.f32 %v5561_v28, %v5557_v47 }
0x38aa   :  { %3713 = vperm.xlu1 %5404, %v3708_v35  }
0x38ab   :  { %3718 = vperm.xlu0 %5405, %v3710_v31  }
0x38ce   :  { %v3516_v61 = vpop.xlane.xlu1 %3515 }
0x38cf   :  { %vm3517_vm12 = vcmp.eq.f32.partialorder %v3514_v62, %v3516_v61 }
0x38d0   :  { %v3518_v11 = vsel %vm3517_vm12, %v3513_v21, inf }
0x38d1   :  { %3519 = vmin.xlane.f32.xlu1 %v3518_v11 }
0x3929   :  { %v6749_v26 = vpop.permute.xlu1 %3713 }
0x392a   :  { %v6751_v50 = vpop.permute.xlu0 %3718  ;;  %v3721_v2 = vmul.f32 %v6753_v8, %v6749_v26 }
0x392b   :  { %v3722_v0 = vmul.f32 %v6757_v24, %v6751_v50 }
0x392c   :  { %v3723_v47 = vsel %vm104_vm1, %v3721_v2, 0.0 }
0x392d   :  { %v3730_v43 = vsel %vm104_vm1, %v3722_v0, 0.0  ;;  %v3724_v62 = vrot.slane %v3723_v47, 4  ;;  %v3522_v0 = vcvt.f32.s32 %v3516_v61 }
0x392e   :  { %v3731_v9 = vrot.slane %v3730_v43, 4 }
0x392f   :  { %v3725_v59 = vadd.f32 %v3724_v62, %v3723_v47 }
0x3930   :  { %v3732_v28 = vadd.f32 %v3731_v9, %v3730_v43  ;;  %v3523_v43 = vshll.u32 %v3522_v0, 16 }
0x3931   :  { %v3726_v35 = vrot.slane %v3725_v59, 2 }
0x3932   :  { %v3733_v31 = vrot.slane %v3732_v28, 2 }
0x3933   :  { %v3727_v49 = vadd.f32 %v3726_v35, %v3725_v59 }
0x3934   :  { %v3734_v21 = vadd.f32 %v3733_v31, %v3732_v28 }
0x3935   :  { %v3728_v11 = vrot.slane %v3727_v49, 1 }
0x3936   :  { %v3735_v53 = vrot.slane %v3734_v21, 1 }
0x3937   :  { %v3729_v57 = vadd.f32 %v3728_v11, %v3727_v49 }
0x3938   :  { %v3736_v55 = vadd.f32 %v3735_v53, %v3734_v21 }
0x393a   :  { %v3739_v25 = vsel %vm239_vm2, %v3736_v55, %v3729_v57 }
0x393b   :  { %3740 = vrot.lane.b32.xlu0 %v3739_v25, %s5770_s4 }
0x393f   :  { %3817 = vrot.lane.b32.xlu0 %v6703_v33, %s5768_s23 }
0x3943   :  { %3827 = vrot.lane.b32.xlu0 %v6703_v33, %s5769_s24 }
0x395e   :  { %v3520_v2 = vpop.xlane.xlu1 %3519 }
0x395f   :  { %v3521_v47 = vcvt.f32.s32 %v3520_v2 }
0x3961   :  { %v3524_v62 = vadd.s32 %v3523_v43, %v3521_v47 }
0x3963   :  { %vm3525_vm13 = vcmp.eq.s32.totalorder %v5937_v37, %v3524_v62 }
0x3964   :  { %v4622_v53 = vsel %vm3525_vm13, 1.0, %v7045_v14 }
0x39ad   :  { %v3741_v9 = vpop.permute.xlu0 %3740 }
0x39ae   :  { %v3743_v55 = vsel %vm331_vm5, %v4622_v53, %v3741_v9 }
0x39af   :  { %5122 = vmatmul.mubr.msk.f32.vlgmr.msra.gmra.mrb[24].mxu1 %vm333_vm6, %v3743_v55 }
0x39b0   :  { %5363 = vmatpush3.bf16.msra.mxu1 %v5883_v5  ;;  %5143 = vmatprep.mubr.msk.f32.mxu1 %vm5764_vm0, %v7045_v14 }
0x39b1   :  { %5364 = vmatprep.subr.bf16.mxu1 %v7046_v1  ;;  %v3818_v25 = vpop.permute.xlu0 %3817 }
0x39b4   :  { %5366 = vmatpush3.bf16.msra.mxu1 %v5886_v7 }
0x39b5   :  { %5376 = vmatprep.subr.bf16.mxu1 %v7046_v1  ;;  %v3828_v5 = vpop.permute.xlu0 %3827 }
0x3a82   :  { %v3813_v57 = vpop.f32.mrb[24].mxu1 }
0x3a83   :  { %v3820_v33 = vadd.f32 %v3818_v25, %v3813_v57  ;;  %v5123_v61 = vpop.f32.mrb[25].mxu1 }
0x3a85   :  { %v4625_v59 = vmul.f32 -1.442695, %v3820_v33 }
0x3a87   :  { %5562 = vpow2.f32 %v4625_v59 }
0x3a91   :  { %v5563_v28 = vpop.eup %5562 }
0x3a92   :  { %v3824_v35 = vadd.f32 1.0, %v5563_v28 }
0x3a94   :  { %5564 = vrcp.f32 %v3824_v35  ;;  %v6815_v35 = vld [vmem:[%s7020_s6 + $0x1] ss:$0 sm:$0xff]  ;;  %s5772_s6 = smov 24  }
0x3a9e   :  { %v5565_v31 = vpop.eup %5564 }
0x3a9f   :  { %v3830_v49 = vmul.f32 %v5565_v31, %v3828_v5  ;;  %v3837_v2 = vsub.f32 1.0, %v5565_v31  ;;  %v3843_v47 = vmul.f32 %v5565_v31, %v6677_v63 }
0x3aa1   :  { %3832 = vrot.lane.b32.xlu0 %v3830_v49, %s5771_s15 }
0x3b13   :  { %v3833_v21 = vpop.permute.xlu0 %3832 }
0x3b14   :  { %v3835_v11 = vadd.f32 %v3833_v21, %v3813_v57 }
0x3b16   :  { %5566 = vtanh.f32 %v3835_v11 }
0x3b20   :  { %v5567_v7 = vpop.eup %5566 }
0x3b21   :  { %3839 = vrot.lane.b32.xlu0 %v5567_v7, %s5768_s23 }
0x3b93   :  { %v3840_v0 = vpop.permute.xlu0 %3839 }
0x3b94   :  { %v3842_v43 = vmul.f32 %v3840_v0, %v3837_v2 }
0x3b96   :  { %v6782_v62 = vadd.f32 %v3843_v47, %v3842_v43 }
0x3b98   :  { %3846 = vrot.lane.b32.xlu0 %v6782_v62, %s5768_s23 }
0x3c0a   :  { %v3847_v9 = vpop.permute.xlu0 %3846 }
0x3c0b   :  { %5133 = vmatmul.mubr.msk.f32.vlgmr.msra.gmra.mrb[26].mxu0 %vm104_vm1, %v3847_v9  ;;  %5144 = vmatmul.mubr.msk.f32.vlgmr.msra.gmra.mrb[26].mxu1 %vm104_vm1, %v3847_v9 }
0x3c0c   :  { %5369 = vmatpush3.bf16.msra.mxu0 %v5971_v16  ;;  %5158 = vmatprep.mubr.msk.f32.mxu0 %vm5764_vm0, %v7045_v14 }
0x3c0d   :  { %5370 = vmatprep.subr.bf16.mxu0 %v7046_v1  ;;  %5378 = vmatpush3.bf16.msra.mxu1 %v6030_v6 }
0x3c0e   :  { %5379 = vmatprep.subr.bf16.mxu1 %v7046_v1  ;;  %5169 = vmatprep.mubr.msk.f32.mxu1 %vm5764_vm0, %v7045_v14 }
0x3c10   :  { %5372 = vmatpush3.bf16.msra.mxu0 %v5977_v17 }
0x3c11   :  { %5373 = vmatprep.subr.bf16.mxu0 %v7046_v1  ;;  %5381 = vmatpush3.bf16.msra.mxu1 %v6036_v10 }
0x3c14   :  { %5375 = vmatpush3.bf16.msra.mxu0 %v5987_v22 }
0x3cde   :  { %v3916_v16 = vpop.f32.mrb[26].mxu0  ;;  %v4019_v63 = vpop.f32.mrb[26].mxu1 }
0x3cdf   :  { %v6801_v53 = vadd.f32 %v6700_v58, %v4019_v63  ;;  %v5134_v55 = vpop.f32.mrb[27].mxu0  ;;  %v5145_v6 = vpop.f32.mrb[27].mxu1 }
0x3ce1   :  { %v4030_v25 = vrot.slane %v6801_v53, %v5908_v15 }
0x3ce3   :  { %v4031_v57 = vcombine.high %v4030_v25, %v4030_v25  ;;  %v4038_v33 = vrot.slane %v4030_v25, %v5908_v15 }
0x3ce5   :  { %v4045_v17 = vrot.slane %v4031_v57, %v5908_v15  ;;  %v4049_v1 = vrot.slane %v4038_v33, %v5916_v20  ;;  %v6818_v15 = vadd.f32 %v6815_v35, %v3916_v16 }
0x3ce7   :  { %v4053_v10 = vrot.slane %v4045_v17, %v5916_v20  ;;  %v4056_v22 = vadd.f32 %v6711_v41, %v4049_v1  ;;  %v3920_v5 = vsel %vm519_vm7, %v6818_v15, -inf }
0x3ce9   :  { %v4057_v61 = vadd.f32 %v6714_v12, %v4053_v10  ;;  %5568 = vtanh.f32 %v4056_v22 }
0x3ceb   :  { %5570 = vtanh.f32 %v4057_v61 }
0x3cf3   :  { %v5569_v58 = vpop.eup %5568 }
0x3cf4   :  { %v4060_v59 = vmul.f32 %v6720_v38, %v5569_v58 }
0x3cf5   :  { %v5571_v28 = vpop.eup %5570 }
0x3cf6   :  { %v4062_v31 = vsel %vm104_vm1, %v4060_v59, 0.0  ;;  %v4061_v41 = vmul.f32 %v6720_v38, %v5571_v28 }
0x3cf7   :  { %4063 = vadd.xlane.f32.xlu0 %v4062_v31 }
0x3cf8   :  { %v4065_v12 = vsel %vm104_vm1, %v4061_v41, 0.0 }
0x3cf9   :  { %4066 = vadd.xlane.f32.xlu1 %v4065_v12 }
0x3cfb   :  { %3921 = vmax.xlane.f32.xlu0 %v3920_v5 }
0x3d84   :  { %v4064_v49 = vpop.xlane.xlu0 %4063 }
0x3d85   :  { %v4073_v11 = vrot.slane %v4064_v49, %v5941_v39 }
0x3d86   :  { %v4067_v21 = vpop.xlane.xlu1 %4066 }
0x3d87   :  { %v4077_v7 = vrot.slane %v4067_v21, %v5941_v39 }
0x3d88   :  { %v6827_v2 = vpop.xlane.xlu0 %3921 }
0x3d89   :  { %vm3933_vm0 = vcmp.eq.f32.partialorder %v6818_v15, %v6827_v2  ;;  %v4078_v38 = vsel %vm239_vm2, %v4077_v7, %v4073_v11 }
0x3d8a   :  { %v3934_v0 = vsel %vm3933_vm0, %v5937_v37, 16  ;;  %v4080_v47 = vsel %vm242_vm3, %v4078_v38, -inf }
0x3d8b   :  { %4081 = vmax.xlane.f32.xlu1 %v4080_v47  ;;  %v3935_v43 = vsel %vm519_vm7, %v3934_v0, 2147483647 }
0x3d8c   :  { %v3937_v9 = vshra.s32 %v3935_v43, 16 }
0x3d8e   :  { %v3939_v16 = vcvt.s32.f32 %v3937_v9  ;;  %v4373_v9 = vadd.s32 4294967256, %v5937_v37 }
0x3d90   :  { %3940 = vmin.xlane.f32.xlu0 %v3939_v16 }
0x3e18   :  { %v4082_v63 = vpop.xlane.xlu1 %4081 }
0x3e19   :  { %v4087_v55 = vrot.slane %v4082_v63, %v5916_v20  ;;  %v4091_v6 = vrot.slane %v4082_v63, %v5948_v46 }
0x3e1b   :  { %v4094_v25 = vsub.f32 %v4064_v49, %v4087_v55  ;;  %v4095_v57 = vsub.f32 %v4067_v21, %v4091_v6 }
0x3e1d   :  { %v4096_v33 = vmul.f32 1.442695, %v4094_v25  ;;  %v4098_v17 = vmul.f32 1.442695, %v4095_v57  ;;  %v3941_v38 = vpop.xlane.xlu0 %3940 }
0x3e1e   :  { %vm3942_vm14 = vcmp.eq.f32.partialorder %v3939_v16, %v3941_v38 }
0x3e1f   :  { %5572 = vpow2.f32 %v4096_v33 }
0x3e20   :  { %5574 = vpow2.f32 %v4098_v17 }
0x3e29   :  { %v5573_v1 = vpop.eup %5572 }
0x3e2a   :  { %4103 = vperm.xlu1 %5404, %v5573_v1   ;;  %v5575_v10 = vpop.eup %5574 }
0x3e2e   :  { %4106 = vperm.xlu1 %5404, %v5575_v10  }
0x3ea9   :  { %v4104_v22 = vpop.permute.xlu1 %4103 }
0x3eaa   :  { %v4111_v58 = vrot.slane %v4104_v22, %v5941_v39 }
0x3ead   :  { %v4107_v61 = vpop.permute.xlu1 %4106 }
0x3eae   :  { %v4115_v59 = vrot.slane %v4107_v61, %v5941_v39  ;;  %v3936_v39 = vand.u32 65535, %v3935_v43 }
0x3eb0   :  { %v4116_v28 = vsel %vm239_vm2, %v4115_v59, %v4111_v58  ;;  %v3938_v0 = vcvt.s32.f32 %v3936_v39 }
0x3eb1   :  { %v4118_v31 = vsel %vm242_vm3, %v4116_v28, 0.0 }
0x3eb2   :  { %4119 = vadd.xlane.f32.xlu1 %v4118_v31  ;;  %v3943_v47 = vsel %vm3942_vm14, %v3938_v0, inf }
0x3f3f   :  { %v4120_v41 = vpop.xlane.xlu1 %4119 }
0x3f40   :  { %v4125_v12 = vrot.slane %v4120_v41, %v5916_v20  ;;  %v4129_v5 = vrot.slane %v4120_v41, %v5948_v46  ;;  %v6846_v46 = vsub.s32 %v4373_v9, %v5900_v13 }
0x3f42   :  { %5576 = vrcp.f32 %v4125_v12 }
0x3f43   :  { %5578 = vrcp.f32 %v4129_v5 }
0x3f4c   :  { %v5577_v49 = vpop.eup %5576 }
0x3f4d   :  { %v4133_v21 = vmul.f32 %v5577_v49, %v5573_v1  ;;  %v5579_v11 = vpop.eup %5578  ;;  %v3947_v49 = vcvt.f32.s32 %v3941_v38 }
0x3f4e   :  { %v4135_v7 = vmul.f32 %v5579_v11, %v5575_v10 }
0x3f4f   :  { %4138 = vperm.xlu0 %5405, %v4133_v21   ;;  %v3948_v11 = vshll.u32 %v3947_v49, 16 }
0x3f53   :  { %4143 = vperm.xlu0 %5405, %v4135_v7  }
0x3f72   :  { %3944 = vmin.xlane.f32.xlu0 %v3943_v47 }
0x3fce   :  { %v4139_v63 = vpop.permute.xlu0 %4138 }
0x3fcf   :  { %v4146_v20 = vmul.f32 %v6753_v8, %v4139_v63  ;;  %v4516_v57 = vrot.slane %v4139_v63, %v6846_v46 }
0x3fd1   :  { %v4148_v55 = vsel %vm104_vm1, %v4146_v20, 0.0 }
0x3fd2   :  { %v4149_v6 = vrot.slane %v4148_v55, 4  ;;  %v4144_v25 = vpop.permute.xlu0 %4143 }
0x3fd3   :  { %v4147_v43 = vmul.f32 %v6757_v24, %v4144_v25  ;;  %v4520_v16 = vrot.slane %v4144_v25, %v6846_v46 }
0x3fd4   :  { %v4150_v33 = vadd.f32 %v4149_v6, %v4148_v55 }
0x3fd5   :  { %v4155_v17 = vsel %vm104_vm1, %v4147_v43, 0.0  ;;  %v6854_v1 = vsel %vm239_vm2, %v4520_v16, %v4516_v57 }
0x3fd6   :  { %v4151_v8 = vrot.slane %v4150_v33, 2  ;;  %v4156_v10 = vrot.slane %v4155_v17, 4 }
0x3fd8   :  { %v4152_v22 = vadd.f32 %v4151_v8, %v4150_v33  ;;  %v4157_v61 = vadd.f32 %v4156_v10, %v4155_v17 }
0x3fda   :  { %v4158_v58 = vrot.slane %v4157_v61, 2  ;;  %v4153_v59 = vrot.slane %v4152_v22, 1 }
0x3fdc   :  { %v4159_v28 = vadd.f32 %v4158_v58, %v4157_v61  ;;  %v4154_v41 = vadd.f32 %v4153_v59, %v4152_v22  ;;  %v948_v59 = vsub.f32 %v6176_v3, %v6184_v36 }
0x3fde   :  { %v4160_v31 = vrot.slane %v4159_v28, 1 }
0x3fe0   :  { %v4161_v12 = vadd.f32 %v4160_v31, %v4159_v28  ;;  %v949_v28 = vmul.f32 1.442695, %v948_v59  ;;  %v1373_v31 = vsub.f32 %v6263_v27, %v6271_v44 }
0x3fe2   :  { %v4164_v24 = vsel %vm239_vm2, %v4161_v12, %v4154_v41  ;;  %v1374_v41 = vmul.f32 1.442695, %v1373_v31 }
0x3fe3   :  { %4165 = vrot.lane.b32.xlu1 %v4164_v24, %s5770_s4  ;;  %v3073_v24 = vsub.f32 %v6624_v42, %v6633_v30 }
0x3fe7   :  { %4242 = vrot.lane.b32.xlu1 %v6801_v53, %s5768_s23 }
0x3feb   :  { %4252 = vrot.lane.b32.xlu1 %v6801_v53, %s5769_s24  ;;  %s5774_s24 = smov 120  }
0x3fff   :  { %v3945_v5 = vpop.xlane.xlu0 %3944 }
0x4000   :  { %v3946_v21 = vcvt.f32.s32 %v3945_v5 }
0x4002   :  { %v3949_v7 = vadd.s32 %v3948_v11, %v3946_v21  ;;  %v2223_v11 = vsub.f32 %v6451_v56, %v6460_v29 }
0x4004   :  { %vm3950_vm3 = vcmp.eq.s32.totalorder %v5937_v37, %v3949_v7  ;;  %v3074_v7 = vmul.f32 1.442695, %v3073_v24 }
0x4005   :  { %v4627_v0 = vsel %vm3950_vm3, 1.0, %v7045_v14 }
0x4055   :  { %v4166_v39 = vpop.permute.xlu1 %4165 }
0x4056   :  { %v4168_v47 = vsel %vm331_vm5, %v4627_v0, %v4166_v39 }
0x4057   :  { %5159 = vmatmul.mubr.msk.f32.vlgmr.msra.gmra.mrb[28].mxu0 %vm333_vm6, %v4168_v47  ;;  %v2224_v47 = vmul.f32 1.442695, %v2223_v11 }
0x4059   :  { %v4243_v9 = vpop.permute.xlu1 %4242 }
0x405d   :  { %v4253_v57 = vpop.permute.xlu1 %4252 }
0x412a   :  { %v4238_v63 = vpop.f32.mrb[28].mxu0 }
0x412b   :  { %v4245_v20 = vadd.f32 %v4243_v9, %v4238_v63  ;;  %v5160_v55 = vpop.f32.mrb[29].mxu0 }
0x412d   :  { %v4630_v6 = vmul.f32 -1.442695, %v4245_v20 }
0x412f   :  { %5580 = vpow2.f32 %v4630_v6 }
0x4139   :  { %v5581_v53 = vpop.eup %5580 }
0x413a   :  { %v4249_v38 = vadd.f32 1.0, %v5581_v53 }
0x413c   :  { %5582 = vrcp.f32 %v4249_v38 }
0x4146   :  { %v5583_v25 = vpop.eup %5582 }
0x4147   :  { %v4255_v43 = vmul.f32 %v5583_v25, %v4253_v57  ;;  %v4262_v17 = vsub.f32 1.0, %v5583_v25  ;;  %v4268_v10 = vmul.f32 %v5583_v25, %v6782_v62  ;;  %v2648_v62 = vsub.f32 %v6546_v60, %v6554_v52 }
0x4148   :  { %v1798_v57 = vsub.f32 %v6364_v45, %v6372_v54 }
0x4149   :  { %4257 = vrot.lane.b32.xlu1 %v4255_v43, %s5771_s15  ;;  %v2649_v12 = vmul.f32 1.442695, %v2648_v62 }
0x41bb   :  { %v4258_v16 = vpop.permute.xlu1 %4257 }
0x41bc   :  { %v4260_v14 = vadd.f32 %v4258_v16, %v4238_v63 }
0x41be   :  { %5584 = vtanh.f32 %v4260_v14  ;;  %v1799_v14 = vmul.f32 1.442695, %v1798_v57 }
0x41bf   :  { %5586 = vpow2.f32 %v949_v28 }
0x41c0   :  { %5588 = vpow2.f32 %v1374_v41 }
0x41c1   :  { %5590 = vpow2.f32 %v2649_v12 }
0x41c2   :  { %5592 = vpow2.f32 %v3074_v7 }
0x41c3   :  { %5594 = vpow2.f32 %v2224_v47 }
0x41c8   :  { %v5585_v33 = vpop.eup %5584 }
0x41c9   :  { %4264 = vrot.lane.b32.xlu0 %v5585_v33, %s5768_s23  ;;  %v5587_v0 = vpop.eup %5586  ;;  %v3923_v33 = vsub.f32 %v6818_v15, %v6827_v2 }
0x41ca   :  { %v951_v9 = vsel %vm519_vm7, %v5587_v0, 0.0  ;;  %v5589_v63 = vpop.eup %5588 }
0x41cb   :  { %v5591_v20 = vpop.eup %5590 }
0x41cc   :  { %v2651_v55 = vsel %vm519_vm7, %v5591_v20, 0.0  ;;  %v5593_v6 = vpop.eup %5592 }
0x41cd   :  { %v3076_v53 = vsel %vm519_vm7, %v5593_v6, 0.0  ;;  %v5595_v38 = vpop.eup %5594 }
0x41ce   :  { %v2226_v25 = vsel %vm519_vm7, %v5595_v38, 0.0 }
0x423b   :  { %v4265_v8 = vpop.permute.xlu0 %4264 }
0x423c   :  { %v4267_v22 = vmul.f32 %v4265_v8, %v4262_v17  ;;  %v3498_v8 = vsub.f32 %v6733_v51, %v6741_v19 }
0x423e   :  { %v4269_v61 = vadd.f32 %v4268_v10, %v4267_v22  ;;  %v3924_v10 = vmul.f32 1.442695, %v3923_v33 }
0x4240   :  { %4271 = vrot.lane.b32.xlu1 %v4269_v61, %s5768_s23  ;;  %v523_v61 = vsub.f32 %v6089_v18, %v6097_v40 }
0x4242   :  { %v524_v28 = vmul.f32 1.442695, %v523_v61 }
0x42b2   :  { %v4272_v58 = vpop.permute.xlu1 %4271 }
0x42b3   :  { %5170 = vmatmul.mubr.msk.f32.vlgmr.msra.gmra.mrb[28].mxu1 %vm104_vm1, %v4272_v58  ;;  %4548 = vst.msk [vmem:[#allocation9] sm:$0x3] %vm4547_vm15, %v4272_v58  ;;  %v3499_v58 = vmul.f32 1.442695, %v3498_v8 }
0x4386   :  { %v4341_v5 = vpop.f32.mrb[28].mxu1 }
0x4387   :  { %v6880_v49 = vadd.f32 %v6815_v35, %v4341_v5  ;;  %v5171_v21 = vpop.f32.mrb[29].mxu1  ;;  %v1376_v35 = vsel %vm519_vm7, %v5589_v63, 0.0 }
0x4389   :  { %v4345_v39 = vsel %vm519_vm7, %v6880_v49, -inf }
0x438a   :  { %4346 = vmax.xlane.f32.xlu1 %v4345_v39 }
0x438e   :  { %952 = vadd.xlane.f32.xlu1 %v951_v9 }
0x4392   :  { %1377 = vadd.xlane.f32.xlu1 %v1376_v35 }
0x4396   :  { %2652 = vadd.xlane.f32.xlu1 %v2651_v55 }
0x439a   :  { %3077 = vadd.xlane.f32.xlu1 %v3076_v53 }
0x439e   :  { %2227 = vadd.xlane.f32.xlu1 %v2226_v25 }
0x4417   :  { %v6893_v43 = vpop.xlane.xlu1 %4346 }
0x4418   :  { %v4348_v16 = vsub.f32 %v6880_v49, %v6893_v43 }
0x441a   :  { %v4349_v17 = vmul.f32 1.442695, %v4348_v16 }
0x441b   :  { %v953_v22 = vpop.xlane.xlu1 %952 }
0x441c   :  { %5596 = vpow2.f32 %v4349_v17 }
0x441d   :  { %5598 = vpow2.f32 %v1799_v14 }
0x441e   :  { %5600 = vpow2.f32 %v3924_v10 }
0x441f   :  { %5602 = vpow2.f32 %v3499_v58  ;;  %v1378_v31 = vpop.xlane.xlu1 %1377 }
0x4420   :  { %5604 = vpow2.f32 %v524_v28 }
0x4421   :  { %5606 = vlog2.f32 %v953_v22 }
0x4423   :  { %v2653_v5 = vpop.xlane.xlu1 %2652 }
0x4426   :  { %v5597_v59 = vpop.eup %5596 }
0x4427   :  { %v4351_v41 = vsel %vm519_vm7, %v5597_v59, 0.0  ;;  %v5599_v62 = vpop.eup %5598  ;;  %v3078_v7 = vpop.xlane.xlu1 %3077 }
0x4428   :  { %4352 = vadd.xlane.f32.xlu0 %v4351_v41  ;;  %v1801_v12 = vsel %vm519_vm7, %v5599_v62, 0.0  ;;  %v5601_v24 = vpop.eup %5600 }
0x4429   :  { %v3926_v21 = vsel %vm519_vm7, %v5601_v24, 0.0  ;;  %v5603_v11 = vpop.eup %5602 }
0x442a   :  { %v3501_v39 = vsel %vm519_vm7, %v5603_v11, 0.0  ;;  %v5605_v0 = vpop.eup %5604 }
0x442b   :  { %v526_v47 = vsel %vm519_vm7, %v5605_v0, 0.0  ;;  %v2228_v9 = vpop.xlane.xlu1 %2227  ;;  %v5607_v63 = vpop.eup %5606 }
0x442c   :  { %1802 = vadd.xlane.f32.xlu0 %v1801_v12  ;;  %5608 = vlog2.f32 %v2228_v9  ;;  %v955_v35 = vmul.f32 0.6931472, %v5607_v63 }
0x442d   :  { %5610 = vlog2.f32 %v1378_v31 }
0x442e   :  { %v956_v55 = vadd.f32 %v955_v35, %v6184_v36 }
0x4430   :  { %3927 = vadd.xlane.f32.xlu0 %v3926_v21  ;;  %v957_v53 = vsub.f32 %v6176_v3, %v956_v55 }
0x4434   :  { %3502 = vadd.xlane.f32.xlu0 %v3501_v39 }
0x4436   :  { %v5609_v20 = vpop.eup %5608 }
0x4437   :  { %v2230_v6 = vmul.f32 0.6931472, %v5609_v20  ;;  %v5611_v33 = vpop.eup %5610 }
0x4438   :  { %527 = vadd.xlane.f32.xlu0 %v526_v47  ;;  %v1380_v3 = vmul.f32 0.6931472, %v5611_v33 }
0x4439   :  { %v2231_v38 = vadd.f32 %v2230_v6, %v6460_v29 }
0x443a   :  { %v1381_v22 = vadd.f32 %v1380_v3, %v6271_v44 }
0x443b   :  { %v2232_v25 = vsub.f32 %v6451_v56, %v2231_v38  ;;  %v4358_v56 = vadd.s32 4294967280, %v5937_v37 }
0x443c   :  { %v1382_v41 = vsub.f32 %v6263_v27, %v1381_v22 }
0x443d   :  { %v6918_v31 = vsub.s32 %v4358_v56, %v5900_v13 }
0x443f   :  { %v4502_v44 = vrot.slane %v6749_v26, %v6918_v31 }
0x444e   :  { %4370 = vrot.lane.b32.xlu0 %v957_v53, %s5772_s6 }
0x4452   :  { %4415 = vrot.lane.b32.xlu0 %v2232_v25, %s5768_s23  ;;  %s5773_s23 = smov 48  }
0x44b5   :  { %v4353_v57 = vpop.xlane.xlu0 %4352 }
0x44b6   :  { %5612 = vlog2.f32 %v4353_v57 }
0x44b7   :  { %5614 = vlog2.f32 %v2653_v5  ;;  %v4506_v5 = vrot.slane %v6751_v50, %v6918_v31 }
0x44b9   :  { %v1803_v16 = vpop.xlane.xlu0 %1802  ;;  %v4507_v39 = vsel %vm239_vm2, %v4506_v5, %v4502_v44 }
0x44ba   :  { %5616 = vlog2.f32 %v1803_v16 }
0x44bd   :  { %v3928_v14 = vpop.xlane.xlu0 %3927 }
0x44be   :  { %5618 = vlog2.f32 %v3928_v14 }
0x44bf   :  { %5620 = vlog2.f32 %v3078_v7 }
0x44c0   :  { %v5613_v36 = vpop.eup %5612 }
0x44c1   :  { %v4355_v17 = vmul.f32 0.6931472, %v5613_v36  ;;  %v3503_v29 = vpop.xlane.xlu0 %3502  ;;  %v5615_v8 = vpop.eup %5614 }
0x44c2   :  { %5622 = vlog2.f32 %v3503_v29  ;;  %v2655_v61 = vmul.f32 0.6931472, %v5615_v8 }
0x44c3   :  { %v4356_v10 = vadd.f32 %v4355_v17, %v6893_v43 }
0x44c4   :  { %v5617_v59 = vpop.eup %5616  ;;  %v2656_v62 = vadd.f32 %v2655_v61, %v6554_v52 }
0x44c5   :  { %v4357_v58 = vsub.f32 %v6880_v49, %v4356_v10  ;;  %v1805_v12 = vmul.f32 0.6931472, %v5617_v59 }
0x44c6   :  { %v2657_v21 = vsub.f32 %v6546_v60, %v2656_v62 }
0x44c7   :  { %4510 = vrot.lane.b32.xlu1 %v4357_v58, %s5772_s6  ;;  %v1806_v27 = vadd.f32 %v1805_v12, %v6372_v54 }
0x44c8   :  { %v5619_v28 = vpop.eup %5618 }
0x44c9   :  { %v3930_v43 = vmul.f32 0.6931472, %v5619_v28  ;;  %v5621_v24 = vpop.eup %5620 }
0x44ca   :  { %v3080_v11 = vmul.f32 0.6931472, %v5621_v24 }
0x44cb   :  { %v3931_v49 = vadd.f32 %v3930_v43, %v6827_v2  ;;  %4385 = vrot.lane.b32.xlu1 %v1382_v41, %s5773_s23  ;;  %v1807_v2 = vsub.f32 %v6364_v45, %v1806_v27 }
0x44cc   :  { %v5623_v7 = vpop.eup %5622  ;;  %v3081_v26 = vadd.f32 %v3080_v11, %v6633_v30 }
0x44cd   :  { %v3932_v52 = vsub.f32 %v6818_v15, %v3931_v49  ;;  %v3505_v0 = vmul.f32 0.6931472, %v5623_v7 }
0x44ce   :  { %v3082_v60 = vsub.f32 %v6624_v42, %v3081_v26 }
0x44cf   :  { %4430 = vrot.lane.b32.xlu1 %v2657_v21, %s5774_s24  ;;  %v4523_v50 = vsel %vm331_vm5, %v3932_v52, %v4507_v39  ;;  %v3506_v54 = vadd.f32 %v3505_v0, %v6741_v19 }
0x44d1   :  { %v3507_v15 = vsub.f32 %v6733_v51, %v3506_v54 }
0x44d3   :  { %4400 = vrot.lane.b32.xlu1 %v1807_v2, %s5775_s13 }
0x44d7   :  { %4445 = vrot.lane.b32.xlu1 %v3082_v60, %s5770_s4 }
0x44db   :  { %4460 = vrot.lane.b32.xlu1 %v3507_v15, %s5776_s14 }
0x44dc   :  { %5717 = shalt.err (!%p5714_p0)
}
0x44dd   :  { %s5718_s3 = scalar_lea.hbm %s7022_s8, 32 }
0x44de   :  { %p5719_p1 = scmp.ne.s32.totalorder %s7022_s8, %s5718_s3  ;;  %p5722_p2 = scmp.lt.u32.totalorder %s5718_s3, %s7022_s8 }
0x44e0   :  { %p5724_p3 = pnand %p5722_p2, %p5719_p1 }
0x44e2   :  { %5727 = shalt.err (!%p5724_p3)
}
0x44e3   :  { %4568 = dma.vmem_to_hbm [thread:$0]  %s4566_s19, 32, %s7022_s8, [#allocation10]   ;;  %vm4475_vm7 = vcmask 195584   ;;  %vm4477_vm4 = vcmask 326656   ;;  %v4448_v19 = vadd.s32 4294967264, %v5937_v37  ;;  %vm4492_vm8 = vcmask 64512  }
0x44e4   :  { %vm4497_vm9 = vcmask 457728   ;;  %v7047_v3 = vld [vmem:[#allocation15_spill] sm:$0xff]  ;;  %v4388_v29 = vadd.s32 4294967232, %v5937_v37  ;;  %v7048_v10 = vld [vmem:[#allocation16_spill] sm:$0xff]  ;;  %v7049_v22 = vld [vmem:[#allocation17_spill] sm:$0xff]  ;;  %v4418_v24 = vadd.s32 4294967184, %v5937_v37 }
0x44e5   :  { %v4451_v9 = vsub.s32 %v4448_v19, %v5900_v13  ;;  %v4362_v17 = vrot.slane %v7047_v3, %v6918_v31  ;;  %v4377_v56 = vrot.slane %v7048_v10, %v6846_v46  ;;  %v7050_v59 = vld [vmem:[#allocation19_spill] sm:$0xff]  ;;  %v7052_v5 = vld [vmem:[#allocation21_spill] sm:$0xff]  ;;  %v7053_v21 = vld [vmem:[#allocation20_spill] sm:$0xff]  ;;  %vm4484_vm10 = vcmask 719872   ;;  %s5779_s8 = smov [#allocation8]  }
0x44e6   :  { %v4391_v61 = vsub.s32 %v4388_v29, %v5900_v13  ;;  %v4421_v52 = vsub.s32 %v4418_v24, %v5900_v13  ;;  %vm4486_vm11 = vcmask 785408   ;;  %v7054_v2 = vld [vmem:[#allocation22_spill] sm:$0xff]  ;;  %v7055_v60 = vld [vmem:[#allocation23_spill] sm:$0xff]  ;;  %vm4490_vm12 = vcmask 982016  }
0x44e7   :  { %v4456_v35 = vrot.slane %v6564_v23, %v4451_v9  ;;  %v4452_v20 = vrot.slane %v6562_v4, %v4451_v9  ;;  %v528_v23 = vpop.xlane.xlu0 %527  ;;  %vm4542_vm13 = vcmask 1041408   ;;  %vm4543_vm0 = vcmask 912386  }
0x44e8   :  { %5624 = vlog2.f32 %v528_v23  ;;  %v4396_v28 = vrot.slane %v7050_v59, %v4391_v61  ;;  %v4422_v0 = vrot.slane %v7054_v2, %v4421_v52  ;;  %v4426_v54 = vrot.slane %v7055_v60, %v4421_v52  ;;  %vm4544_vm14 = vmor %vm4543_vm0, %vm4542_vm13 }
0x44e9   :  { %v4457_v53 = vsel %vm239_vm2, %v4456_v35, %v4452_v20 }
0x44f2   :  { %v5625_v4 = vpop.eup %5624 }
0x44f3   :  { %v530_v14 = vmul.f32 0.6931472, %v5625_v4 }
0x44f5   :  { %v531_v33 = vadd.f32 %v530_v14, %v6097_v40  ;;  %v4381_v40 = vrot.slane %v7049_v22, %v6846_v46 }
0x44f7   :  { %v532_v36 = vsub.f32 %v6089_v18, %v531_v33  ;;  %v4371_v18 = vpop.permute.xlu0 %4370  ;;  %v4382_v62 = vsel %vm239_vm2, %v4381_v40, %v4377_v56 }
0x44fb   :  { %v4416_v15 = vpop.permute.xlu0 %4415 }
0x4539   :  { %v4511_v45 = vpop.permute.xlu1 %4510 }
0x453a   :  { %v4524_v42 = vsel %vm4475_vm7, %v4523_v50, %v4511_v45  ;;  %v5778_v50 = vmov 1983009808  }
0x453b   :  { %v4525_v30 = vsel %vm4477_vm4, %v4524_v42, %v6854_v1  ;;  %v4535_v26 = vunpack.c.l.s4 %v5778_v50 }
0x453c   :  { %4527 = vrot.lane.b32.xlu0 %v4525_v30, %s5771_s15  ;;  %v4427_v30 = vsel %vm239_vm2, %v4426_v54, %v4422_v0  ;;  %s4555_s15 = sshll.u32 %s5779_s8, 4  ;;  %s4556_s15 = int_to_ptr.vmem [resolvable:$true] %s4555_s15 }
0x453d   :  { %v4386_v51 = vpop.permute.xlu1 %4385  ;;  %v4536_v42 = vunpack.c.0.s8 %v4535_v26  ;;  %s5728_s22 = scalar_lea.vmem %s4556_s15, 64  ;;  %p5733_p5 = scmp.lt.s32.totalorder %s4556_s15, %s4556_s15 }
0x453e   :  { %p5729_p4 = scmp.ne.s32.totalorder %s4556_s15, %s5728_s22  ;;  %p5734_p6 = scmp.lt.s32.totalorder %s5728_s22, %s5728_s22 }
0x453f   :  { %v4539_v19 = vsub.s32 %v4536_v42, %v5900_v13 }
0x4540   :  { %p5735_p7 = por %p5734_p6, %p5733_p5 }
0x4541   :  { %v6955_v47 = vpop.permute.xlu1 %4430 }
0x4542   :  { %v4493_v55 = vsel %vm4492_vm8, %v6955_v47, %v6483_v34  ;;  %v4366_v34 = vrot.slane %v6001_v32, %v6918_v31  ;;  %v4403_v32 = vadd.s32 4294967208, %v5937_v37  ;;  %v7051_v31 = vld [vmem:[#allocation18_spill] sm:$0xff]  ;;  %p5736_p8 = pnand %p5735_p7, %p5729_p4 }
0x4543   :  { %v4392_v41 = vrot.slane %v7051_v31, %v4391_v61 }
0x4544   :  { %v4367_v8 = vsel %vm239_vm2, %v4366_v34, %v4362_v17  ;;  %v4406_v12 = vsub.s32 %v4403_v32, %v5900_v13 }
0x4545   :  { %v4401_v63 = vpop.permute.xlu1 %4400  ;;  %v4397_v49 = vsel %vm239_vm2, %v4396_v28, %v4392_v41 }
0x4546   :  { %v4411_v44 = vrot.slane %v7052_v5, %v4406_v12  ;;  %v4407_v11 = vrot.slane %v7053_v21, %v4406_v12 }
0x4548   :  { %v4412_v39 = vsel %vm239_vm2, %v4411_v44, %v4407_v11 }
0x4549   :  { %v4446_v6 = vpop.permute.xlu1 %4445 }
0x454a   :  { %v4494_v1 = vsel %vm331_vm5, %v4493_v55, %v4446_v6 }
0x454b   :  { %v4495_v38 = vsel %vm104_vm1, %v4494_v1, %v4457_v53  ;;  %vm4480_vm1 = vcmask 523264  }
0x454d   :  { %v4461_v25 = vpop.permute.xlu1 %4460 }
0x454e   :  { %v4496_v57 = vsel %vm4477_vm4, %v4495_v38, %v4461_v25 }
0x454f   :  { %v4498_v16 = vsel %vm4497_vm9, %v4496_v57, %v6656_v48  ;;  %v4474_v48 = vsel %vm331_vm5, %v532_v36, %v4367_v8  ;;  %vm4482_vm5 = vcmask 588800  }
0x4550   :  { %v4476_v58 = vsel %vm4475_vm7, %v4474_v48, %v4371_v18 }
0x4551   :  { %v4478_v43 = vsel %vm4477_vm4, %v4476_v58, %v4382_v62 }
0x4552   :  { %v4479_v46 = vsel %vm333_vm6, %v4478_v43, %v4386_v51  ;;  %vm4488_vm6 = vcmask 916480  }
0x4553   :  { %v4481_v27 = vsel %vm4480_vm1, %v4479_v46, %v4397_v49 }
0x4554   :  { %v4483_v7 = vsel %vm4482_vm5, %v4481_v27, %v4401_v63 }
0x4555   :  { %v4485_v37 = vsel %vm4484_vm10, %v4483_v7, %v4412_v39 }
0x4556   :  { %v4487_v45 = vsel %vm4486_vm11, %v4485_v37, %v4416_v15 }
0x4557   :  { %v4489_v51 = vsel %vm4488_vm6, %v4487_v45, %v4427_v30 }
0x4558   :  { %v4491_v63 = vsel %vm4490_vm12, %v4489_v51, %v6955_v47 }
0x45ae   :  { %v4528_v9 = vpop.permute.xlu0 %4527 }
0x45af   :  { %v4530_v35 = vsel %vm4480_vm1, %v4498_v16, %v4528_v9 }
0x45b0   :  { %v4533_v20 = vcombine.low %v4491_v63, %v4530_v35 }
0x45b2   :  { %v4540_v55 = vrot.slane %v4533_v20, %v4539_v19 }
0x45b4   :  { %4545 = vst.msk [vmem:[#allocation8] sm:$0xf] %vm4544_vm14, %v4540_v55 }
0x45b5   :  { %5739 = shalt.err (!%p5736_p8)
}
0x45b6   :  { %s5740_s27 = scalar_lea.hbm %s7021_s7, 64 }
0x45b7   :  { %p5741_p9 = scmp.ne.s32.totalorder %s7021_s7, %s5740_s27  ;;  %p5744_p10 = scmp.lt.u32.totalorder %s5740_s27, %s7021_s7 }
0x45b9   :  { %p5746_p11 = pnand %p5744_p10, %p5741_p9 }
0x45bb   :  { %5749 = shalt.err (!%p5746_p11)
}
0x45bc   :  { %4558 = dma.vmem_to_hbm [thread:$0]  %s4556_s15, 64, %s7021_s7, [#allocation4]  }
0x45bd   :  { %5754 = dma.done.wait [#allocation4], 64  }
0x45be   :  { %5755 = vsyncadd [#allocation4], 4294967232 }
0x45bf   :  { %5756 = dma.done.wait [#allocation10], 32  }
0x45c0   :  { %5757 = vsyncadd [#allocation10], 4294967264 }
0x45c1   :  { %4575 = vsyncpa [#allocation3], 1 }
0x45c2   :  { %4576 = vsyncpa [#allocation6], 1 }
0x45c3   :  { %4577 = vsyncpa [#allocation4], 1 }
0x45c4   :  { %4578 = vsyncpa [#allocation10], 1 }

</bundles_post_ra>
